<compile_context>
chip_gen: v7x
topology: tpu7x:2x2x1
jax: 0.10.0
libtpu: 0.0.40
codegen_flags: <defaults>
</compile_context>

<pallas_src>
import math
import functools

import jax
import jax.numpy as jnp
from jax import lax
from jax.experimental import pallas as pl
from jax.experimental.pallas import tpu as pltpu

LN_EPS = 1e-5

# Ordered keys for the stacked (leading layer axis) weight pytrees.
_ENC_KEYS = ("wqkv", "bqkv", "wo", "bo", "ln1_g", "ln1_b",
             "w1", "b1", "w2", "b2", "ln2_g", "ln2_b")
_DEC_KEYS = ("wqkv", "bqkv", "wo", "bo",
             "cwq", "cbq", "cwkv", "cbkv", "cwo", "cbo",
             "ln1_g", "ln1_b", "ln2_g", "ln2_b",
             "w1", "b1", "w2", "b2")


# ----------------------------- in-kernel helpers -----------------------------

def _layer_norm(x, g, b, eps=LN_EPS):
    # PyTorch nn.LayerNorm (biased variance), math in f32.
    mu = jnp.mean(x, axis=-1, keepdims=True)
    var = jnp.mean(jnp.square(x - mu), axis=-1, keepdims=True)
    return (x - mu) * lax.rsqrt(var + eps) * g + b


def _mh_attention(q, k, v, heads, scale):
    """Head-batched scaled-dot-product attention.

    q: (Lq, E); k, v: (Lk, E).  Heads become the batch dim of two einsums
    (no per-head Python loop, no 8-lane slices, no VMEM scratch).
    """
    lq, e = q.shape
    lk = k.shape[0]
    hd = e // heads
    q3 = q.reshape(lq, heads, hd)
    k3 = k.reshape(lk, heads, hd)
    v3 = v.reshape(lk, heads, hd)
    s = jnp.einsum("qhd,khd->hqk", q3, k3,
                   preferred_element_type=jnp.float32) * scale
    s = s - jnp.max(s, axis=-1, keepdims=True)
    p = jnp.exp(s)
    p = p / jnp.sum(p, axis=-1, keepdims=True)          # exact divide (parity)
    z3 = jnp.einsum("hqk,khd->qhd", p, v3, preferred_element_type=jnp.float32)
    return z3.reshape(lq, e)


# ----------------------------- fused full-model kernel -----------------------

def _fused_transformer_kernel(src_ref, tgt_ref, *refs, heads, n_blocks, scale):
    ne, nd = len(_ENC_KEYS), len(_DEC_KEYS)
    enc = dict(zip(_ENC_KEYS, refs[:ne]))
    dec = dict(zip(_DEC_KEYS, refs[ne:ne + nd]))
    out_w_ref = refs[ne + nd]
    out_b_ref = refs[ne + nd + 1]
    o_ref = refs[ne + nd + 2]

    e = src_ref.shape[-1]

    # ---------------- encoder stack (unrolled over layers) ----------------
    mem = src_ref[0].astype(jnp.float32)                       # (Ls, E)
    for i in range(n_blocks):
        qkv = jnp.dot(mem, enc["wqkv"][i],
                      preferred_element_type=jnp.float32) + enc["bqkv"][i]
        z = _mh_attention(qkv[:, :e], qkv[:, e:2 * e], qkv[:, 2 * e:],
                          heads, scale)
        attn = jnp.dot(z, enc["wo"][i],
                       preferred_element_type=jnp.float32) + enc["bo"][i]
        out = attn + mem                                        # out += x
        n1 = _layer_norm(out, enc["ln1_g"][i], enc["ln1_b"][i])
        h1 = jnp.maximum(
            jnp.dot(n1, enc["w1"][i],
                    preferred_element_type=jnp.float32) + enc["b1"][i], 0.0)
        ff = jnp.dot(h1, enc["w2"][i],
                     preferred_element_type=jnp.float32) + enc["b2"][i]
        mem = _layer_norm(ff + n1, enc["ln2_g"][i], enc["ln2_b"][i])

    # ---------------- decoder stack (unrolled over layers) ----------------
    # TODO(synk): attention mask path (masked_fill with mask==0 -> -1e9) is not
    # implemented; this forward matches the call site with all masks = None.
    x = tgt_ref[0].astype(jnp.float32)                          # (Lt, E)
    for i in range(n_blocks):
        # self-attention
        qkv = jnp.dot(x, dec["wqkv"][i],
                      preferred_element_type=jnp.float32) + dec["bqkv"][i]
        z1 = _mh_attention(qkv[:, :e], qkv[:, e:2 * e], qkv[:, 2 * e:],
                           heads, scale)
        a1 = jnp.dot(z1, dec["wo"][i],
                     preferred_element_type=jnp.float32) + dec["bo"][i]
        m1 = _layer_norm(a1, dec["ln1_g"][i], dec["ln1_b"][i]) + x  # norm THEN residual

        # cross-attention: Q from m1, fused K|V from encoder memory
        q = jnp.dot(m1, dec["cwq"][i],
                    preferred_element_type=jnp.float32) + dec["cbq"][i]
        kv = jnp.dot(mem, dec["cwkv"][i],
                     preferred_element_type=jnp.float32) + dec["cbkv"][i]
        z2 = _mh_attention(q, kv[:, :e], kv[:, e:], heads, scale)
        a2 = jnp.dot(z2, dec["cwo"][i],
                     preferred_element_type=jnp.float32) + dec["cbo"][i]
        m2 = _layer_norm(a2, dec["ln2_g"][i], dec["ln2_b"][i]) + m1

        # FFN; no residual / norm3 after it (faithful to DecoderLayer.forward)
        h1 = jnp.maximum(
            jnp.dot(m2, dec["w1"][i],
                    preferred_element_type=jnp.float32) + dec["b1"][i], 0.0)
        x = jnp.dot(h1, dec["w2"][i],
                    preferred_element_type=jnp.float32) + dec["b2"][i]

    # ------------- final vocab projection, lane-padded to 128 -------------
    o_ref[0] = (jnp.dot(x, out_w_ref[...],
                        preferred_element_type=jnp.float32)
                + out_b_ref[...]).astype(o_ref.dtype)


# ----------------------------- kernel wrapper --------------------------------

def _w_spec(shape):
    """Constant-index BlockSpec: full array, VMEM-resident across the grid."""
    nd = len(shape)
    # TODO(synk): when scaling E/inner up (v7x 64 MiB VMEM), add
    # pipeline_mode=pl.Buffered(1) here so constant weights are single-buffered.
    return pl.BlockSpec(shape, lambda i, _nd=nd: (0,) * _nd)


def custom_transformer(params, src, tgt, heads, embed_size):
    b, ls, e = src.shape
    lt = tgt.shape[1]
    pos = params["pos_embedding"]                    # (max_len, 1, E)

    # PositionalEncoding quirk: pos_embedding is indexed by dim-0 of its input,
    # which is the batch dimension here (pos[b] broadcast over the sequence).
    src_emb = src + pos[:b]

    # TODO(synk): token-embedding gather + positional add kept in plain JAX
    # (tiny, and a vocab gather is not a good fit for a Pallas tile).
    tok = jnp.take(params["tok_emb"], tgt, axis=0) * math.sqrt(embed_size)
    tgt_emb = tok + pos[:b]

    enc_stack = params["enc_stack"]
    dec_stack = params["dec_stack"]
    vp = params["out_w_pad"].shape[1]

    weight_args = ([enc_stack[k] for k in _ENC_KEYS]
                   + [dec_stack[k] for k in _DEC_KEYS]
                   + [params["out_w_pad"], params["out_b_pad"]])

    kernel = functools.partial(
        _fused_transformer_kernel, heads=heads,
        n_blocks=params["n_blocks"],
        scale=1.0 / math.sqrt(e // heads))

    logits_pad = pl.pallas_call(
        kernel,
        out_shape=jax.ShapeDtypeStruct((b, lt, vp), src.dtype),
        grid=(b,),
        in_specs=([pl.BlockSpec((1, ls, e), lambda i: (i, 0, 0)),
                   pl.BlockSpec((1, lt, e), lambda i: (i, 0, 0))]
                  + [_w_spec(w.shape) for w in weight_args]),
        out_specs=pl.BlockSpec((1, lt, vp), lambda i: (i, 0, 0)),
        # "parallel" batch axis: uses both TensorCores on v7x; on the 1-TC
        # v5e/v6e it is a cheap 2-step loop (weights never re-DMAed since
        # their block indices are constant).
        compiler_params=pltpu.CompilerParams(dimension_semantics=("parallel",)),
    )(src_emb, tgt_emb, *weight_args)

    # Un-pad the lane-padded vocab dim at the final consumer (tiny XLA slice).
    return logits_pad[:, :, :params["vocab_size"]]


# ----------------------------- parameter init --------------------------------

def _init_linear(key, fan_in, fan_out):
    k1, k2 = jax.random.split(key)
    bound = 1.0 / math.sqrt(fan_in)
    w = jax.random.uniform(k1, (fan_in, fan_out), jnp.float32, -bound, bound)
    b = jax.random.uniform(k2, (fan_out,), jnp.float32, -bound, bound)
    return w, b


def _init_mha(key, e):
    ks = jax.random.split(key, 4)
    wq, bq = _init_linear(ks[0], e, e)
    wk, bk = _init_linear(ks[1], e, e)
    wv, bv = _init_linear(ks[2], e, e)
    wo, bo = _init_linear(ks[3], e, e)
    return dict(
        wqkv=jnp.concatenate([wq, wk, wv], axis=1),             # fused (E, 3E)
        bqkv=jnp.concatenate([bq, bk, bv]).reshape(1, 3 * e),
        wq=wq, bq=bq.reshape(1, e),
        wkv=jnp.concatenate([wk, wv], axis=1),                  # fused (E, 2E)
        bkv=jnp.concatenate([bk, bv]).reshape(1, 2 * e),
        wo=wo, bo=bo.reshape(1, e),
    )


def _init_ffn(key, e, inner):
    k1, k2 = jax.random.split(key)
    w1, b1 = _init_linear(k1, e, inner)
    w2, b2 = _init_linear(k2, inner, e)
    return dict(w1=w1, b1=b1.reshape(1, inner), w2=w2, b2=b2.reshape(1, e))


def _init_encoder_layer(key, e, inner):
    k1, k2 = jax.random.split(key)
    mha = _init_mha(k1, e)
    ffn = _init_ffn(k2, e, inner)
    return dict(
        wqkv=mha["wqkv"], bqkv=mha["bqkv"], wo=mha["wo"], bo=mha["bo"],
        w1=ffn["w1"], b1=ffn["b1"], w2=ffn["w2"], b2=ffn["b2"],
        ln1_g=jnp.ones((1, e), jnp.float32), ln1_b=jnp.zeros((1, e), jnp.float32),
        ln2_g=jnp.ones((1, e), jnp.float32), ln2_b=jnp.zeros((1, e), jnp.float32),
    )


def _init_decoder_layer(key, e, inner):
    k1, k2, k3 = jax.random.split(key, 3)
    sa = _init_mha(k1, e)
    ca = _init_mha(k2, e)
    ffn = _init_ffn(k3, e, inner)
    return dict(
        wqkv=sa["wqkv"], bqkv=sa["bqkv"], wo=sa["wo"], bo=sa["bo"],
        cwq=ca["wq"], cbq=ca["bq"], cwkv=ca["wkv"], cbkv=ca["bkv"],
        cwo=ca["wo"], cbo=ca["bo"],
        w1=ffn["w1"], b1=ffn["b1"], w2=ffn["w2"], b2=ffn["b2"],
        ln1_g=jnp.ones((1, e), jnp.float32), ln1_b=jnp.zeros((1, e), jnp.float32),
        ln2_g=jnp.ones((1, e), jnp.float32), ln2_b=jnp.zeros((1, e), jnp.float32),
        # norm3 exists in the PyTorch module but is never used in forward.
    )


def _make_pos_embedding(e, max_len=512):
    den = jnp.exp(-jnp.arange(0, e, 2, dtype=jnp.float32) * (math.log(10000.0) / e))
    pos = jnp.arange(0, max_len, dtype=jnp.float32).reshape(max_len, 1)
    pe = jnp.zeros((max_len, e), jnp.float32)
    pe = pe.at[:, 0::2].set(jnp.sin(pos * den))
    pe = pe.at[:, 1::2].set(jnp.cos(pos * den))
    return pe[:, None, :]                            # (max_len, 1, E)


def init_params(key, embed_size, heads, inner_layer_size, n_blocks, vocab_size):
    keys = jax.random.split(key, 2 * n_blocks + 2)
    enc_layers = [_init_encoder_layer(keys[i], embed_size, inner_layer_size)
                  for i in range(n_blocks)]
    dec_layers = [_init_decoder_layer(keys[n_blocks + i], embed_size, inner_layer_size)
                  for i in range(n_blocks)]

    # Stack per-layer weights along a leading layer axis (VMEM-resident in kernel).
    enc_stack = {k: jnp.stack([lp[k] for lp in enc_layers], axis=0) for k in _ENC_KEYS}
    dec_stack = {k: jnp.stack([lp[k] for lp in dec_layers], axis=0) for k in _DEC_KEYS}

    out_w, out_b = _init_linear(keys[-2], embed_size, vocab_size)
    # Lane-pad the vocab projection to a multiple of 128 (dense final store).
    vp = max(128, ((vocab_size + 127) // 128) * 128)
    out_w_pad = jnp.zeros((embed_size, vp), jnp.float32).at[:, :vocab_size].set(out_w)
    out_b_pad = jnp.zeros((1, vp), jnp.float32).at[:, :vocab_size].set(out_b)

    tok_emb = jax.random.normal(keys[-1], (vocab_size, embed_size), jnp.float32)
    return dict(
        enc_stack=enc_stack, dec_stack=dec_stack, n_blocks=n_blocks,
        out_w_pad=out_w_pad, out_b_pad=out_b_pad, vocab_size=vocab_size,
        tok_emb=tok_emb,
        pos_embedding=_make_pos_embedding(embed_size),
    )


# --------------------------------- main ---------------------------------------

if __name__ == "__main__":
    embed_size = 32
    heads = 4
    inner_layer_size = 64
    n_blocks = 2
    vocab_size = 50

    batch = 2
    src_len = 8
    tgt_len = 8

    root = jax.random.PRNGKey(0)
    k_params, k_src, k_tgt = jax.random.split(root, 3)

    params = init_params(k_params, embed_size, heads, inner_layer_size,
                         n_blocks, vocab_size)

    # src is already an embedding-like float tensor; tgt is token ids.
    src = jax.random.normal(k_src, (batch, src_len, embed_size), jnp.float32)
    tgt = jax.random.randint(k_tgt, (batch, tgt_len), 0, vocab_size, jnp.int32)

    out = custom_transformer(params, src, tgt, heads, embed_size)
    out = jax.block_until_ready(out)

    assert out.shape == (batch, tgt_len, vocab_size), out.shape
    assert jnp.all(jnp.isfinite(out))
    print("KERNEL_OK")
</pallas_src>

<mosaic_0001>
module attributes {stable_mosaic.version = 11 : i64} {
  func.func @_fused_transformer_kernel(%arg0: i32, %arg1: memref<1x8x32xf32, #tpu.memory_space<vmem>>, %arg2: memref<1x8x32xf32, #tpu.memory_space<vmem>>, %arg3: memref<2x32x96xf32, #tpu.memory_space<vmem>>, %arg4: memref<2x1x96xf32, #tpu.memory_space<vmem>>, %arg5: memref<2x32x32xf32, #tpu.memory_space<vmem>>, %arg6: memref<2x1x32xf32, #tpu.memory_space<vmem>>, %arg7: memref<2x1x32xf32, #tpu.memory_space<vmem>>, %arg8: memref<2x1x32xf32, #tpu.memory_space<vmem>>, %arg9: memref<2x32x64xf32, #tpu.memory_space<vmem>>, %arg10: memref<2x1x64xf32, #tpu.memory_space<vmem>>, %arg11: memref<2x64x32xf32, #tpu.memory_space<vmem>>, %arg12: memref<2x1x32xf32, #tpu.memory_space<vmem>>, %arg13: memref<2x1x32xf32, #tpu.memory_space<vmem>>, %arg14: memref<2x1x32xf32, #tpu.memory_space<vmem>>, %arg15: memref<2x32x96xf32, #tpu.memory_space<vmem>>, %arg16: memref<2x1x96xf32, #tpu.memory_space<vmem>>, %arg17: memref<2x32x32xf32, #tpu.memory_space<vmem>>, %arg18: memref<2x1x32xf32, #tpu.memory_space<vmem>>, %arg19: memref<2x32x32xf32, #tpu.memory_space<vmem>>, %arg20: memref<2x1x32xf32, #tpu.memory_space<vmem>>, %arg21: memref<2x32x64xf32, #tpu.memory_space<vmem>>, %arg22: memref<2x1x64xf32, #tpu.memory_space<vmem>>, %arg23: memref<2x32x32xf32, #tpu.memory_space<vmem>>, %arg24: memref<2x1x32xf32, #tpu.memory_space<vmem>>, %arg25: memref<2x1x32xf32, #tpu.memory_space<vmem>>, %arg26: memref<2x1x32xf32, #tpu.memory_space<vmem>>, %arg27: memref<2x1x32xf32, #tpu.memory_space<vmem>>, %arg28: memref<2x1x32xf32, #tpu.memory_space<vmem>>, %arg29: memref<2x32x64xf32, #tpu.memory_space<vmem>>, %arg30: memref<2x1x64xf32, #tpu.memory_space<vmem>>, %arg31: memref<2x64x32xf32, #tpu.memory_space<vmem>>, %arg32: memref<2x1x32xf32, #tpu.memory_space<vmem>>, %arg33: memref<32x128xf32, #tpu.memory_space<vmem>>, %arg34: memref<1x128xf32, #tpu.memory_space<vmem>>, %arg35: memref<1x8x128xf32, #tpu.memory_space<vmem>>) attributes {dimension_semantics = [#tpu.dimension_semantics<parallel>], iteration_bounds = array<i64: 2>, scalar_prefetch = 0 : i64, scratch_operands = 0 : i64, tpu.core_type = #tpu.core_type<tc>, window_params = [{transform_indices = @transform_0, window_bounds = array<i64: 1, 8, 32>}, {transform_indices = @transform_1, window_bounds = array<i64: 1, 8, 32>}, {pipeline_mode = #tpu.pipeline_mode<synchronous>, transform_indices = @transform_2, window_bounds = array<i64: 2, 32, 96>}, {pipeline_mode = #tpu.pipeline_mode<synchronous>, transform_indices = @transform_3, window_bounds = array<i64: 2, 1, 96>}, {pipeline_mode = #tpu.pipeline_mode<synchronous>, transform_indices = @transform_4, window_bounds = array<i64: 2, 32, 32>}, {pipeline_mode = #tpu.pipeline_mode<synchronous>, transform_indices = @transform_5, window_bounds = array<i64: 2, 1, 32>}, {pipeline_mode = #tpu.pipeline_mode<synchronous>, transform_indices = @transform_6, window_bounds = array<i64: 2, 1, 32>}, {pipeline_mode = #tpu.pipeline_mode<synchronous>, transform_indices = @transform_7, window_bounds = array<i64: 2, 1, 32>}, {pipeline_mode = #tpu.pipeline_mode<synchronous>, transform_indices = @transform_8, window_bounds = array<i64: 2, 32, 64>}, {pipeline_mode = #tpu.pipeline_mode<synchronous>, transform_indices = @transform_9, window_bounds = array<i64: 2, 1, 64>}, {pipeline_mode = #tpu.pipeline_mode<synchronous>, transform_indices = @transform_10, window_bounds = array<i64: 2, 64, 32>}, {pipeline_mode = #tpu.pipeline_mode<synchronous>, transform_indices = @transform_11, window_bounds = array<i64: 2, 1, 32>}, {pipeline_mode = #tpu.pipeline_mode<synchronous>, transform_indices = @transform_12, window_bounds = array<i64: 2, 1, 32>}, {pipeline_mode = #tpu.pipeline_mode<synchronous>, transform_indices = @transform_13, window_bounds = array<i64: 2, 1, 32>}, {pipeline_mode = #tpu.pipeline_mode<synchronous>, transform_indices = @transform_14, window_bounds = array<i64: 2, 32, 96>}, {pipeline_mode = #tpu.pipeline_mode<synchronous>, transform_indices = @transform_15, window_bounds = array<i64: 2, 1, 96>}, {pipeline_mode = #tpu.pipeline_mode<synchronous>, transform_indices = @transform_16, window_bounds = array<i64: 2, 32, 32>}, {pipeline_mode = #tpu.pipeline_mode<synchronous>, transform_indices = @transform_17, window_bounds = array<i64: 2, 1, 32>}, {pipeline_mode = #tpu.pipeline_mode<synchronous>, transform_indices = @transform_18, window_bounds = array<i64: 2, 32, 32>}, {pipeline_mode = #tpu.pipeline_mode<synchronous>, transform_indices = @transform_19, window_bounds = array<i64: 2, 1, 32>}, {pipeline_mode = #tpu.pipeline_mode<synchronous>, transform_indices = @transform_20, window_bounds = array<i64: 2, 32, 64>}, {pipeline_mode = #tpu.pipeline_mode<synchronous>, transform_indices = @transform_21, window_bounds = array<i64: 2, 1, 64>}, {pipeline_mode = #tpu.pipeline_mode<synchronous>, transform_indices = @transform_22, window_bounds = array<i64: 2, 32, 32>}, {pipeline_mode = #tpu.pipeline_mode<synchronous>, transform_indices = @transform_23, window_bounds = array<i64: 2, 1, 32>}, {pipeline_mode = #tpu.pipeline_mode<synchronous>, transform_indices = @transform_24, window_bounds = array<i64: 2, 1, 32>}, {pipeline_mode = #tpu.pipeline_mode<synchronous>, transform_indices = @transform_25, window_bounds = array<i64: 2, 1, 32>}, {pipeline_mode = #tpu.pipeline_mode<synchronous>, transform_indices = @transform_26, window_bounds = array<i64: 2, 1, 32>}, {pipeline_mode = #tpu.pipeline_mode<synchronous>, transform_indices = @transform_27, window_bounds = array<i64: 2, 1, 32>}, {pipeline_mode = #tpu.pipeline_mode<synchronous>, transform_indices = @transform_28, window_bounds = array<i64: 2, 32, 64>}, {pipeline_mode = #tpu.pipeline_mode<synchronous>, transform_indices = @transform_29, window_bounds = array<i64: 2, 1, 64>}, {pipeline_mode = #tpu.pipeline_mode<synchronous>, transform_indices = @transform_30, window_bounds = array<i64: 2, 64, 32>}, {pipeline_mode = #tpu.pipeline_mode<synchronous>, transform_indices = @transform_31, window_bounds = array<i64: 2, 1, 32>}, {pipeline_mode = #tpu.pipeline_mode<synchronous>, transform_indices = @transform_32, window_bounds = array<i64: 32, 128>}, {pipeline_mode = #tpu.pipeline_mode<synchronous>, transform_indices = @transform_33, window_bounds = array<i64: 1, 128>}, {transform_indices = @transform_34, window_bounds = array<i64: 1, 8, 128>}]} {
    %c0 = arith.constant 0 : index
    %c0_0 = arith.constant 0 : index
    %c0_1 = arith.constant 0 : index
    %0 = vector.load %arg1[%c0, %c0_0, %c0_1] : memref<1x8x32xf32, #tpu.memory_space<vmem>>, vector<1x8x32xf32>
    %1 = vector.shape_cast %0 : vector<1x8x32xf32> to vector<8x32xf32>
    %c0_2 = arith.constant 0 : index
    %c0_3 = arith.constant 0 : index
    %c0_4 = arith.constant 0 : index
    %2 = vector.load %arg3[%c0_2, %c0_3, %c0_4] : memref<2x32x96xf32, #tpu.memory_space<vmem>>, vector<1x32x96xf32>
    %3 = vector.shape_cast %2 : vector<1x32x96xf32> to vector<32x96xf32>
    %cst = arith.constant dense<0.000000e+00> : vector<8x96xf32>
    %4 = tpu.matmul %1, %3, %cst {dimension_numbers = #tpu.dot_dimension_numbers<[1], [0], [0], [1], [0, 0, 1, 1], [], []>} : vector<8x32xf32>, vector<32x96xf32>, vector<8x96xf32> -> vector<8x96xf32>
    %c0_5 = arith.constant 0 : index
    %c0_6 = arith.constant 0 : index
    %c0_7 = arith.constant 0 : index
    %5 = vector.load %arg4[%c0_5, %c0_6, %c0_7] : memref<2x1x96xf32, #tpu.memory_space<vmem>>, vector<1x1x96xf32>
    %6 = vector.shape_cast %5 : vector<1x1x96xf32> to vector<1x96xf32>
    %7 = vector.broadcast %6 : vector<1x96xf32> to vector<8x96xf32>
    %8 = arith.addf %4, %7 : vector<8x96xf32>
    %9 = vector.extract_strided_slice %8 {offsets = [0, 0], sizes = [8, 32], strides = [1, 1]} : vector<8x96xf32> to vector<8x32xf32>
    %10 = vector.extract_strided_slice %8 {offsets = [0, 32], sizes = [8, 32], strides = [1, 1]} : vector<8x96xf32> to vector<8x32xf32>
    %11 = vector.extract_strided_slice %8 {offsets = [0, 64], sizes = [8, 32], strides = [1, 1]} : vector<8x96xf32> to vector<8x32xf32>
    %12 = vector.shape_cast %9 : vector<8x32xf32> to vector<8x4x8xf32>
    %13 = vector.shape_cast %10 : vector<8x32xf32> to vector<8x4x8xf32>
    %14 = vector.shape_cast %11 : vector<8x32xf32> to vector<8x4x8xf32>
    "tpu.trace_start"() <{level = 10 : i32, message = "qhd,khd->hqk"}> : () -> ()
    %cst_8 = arith.constant dense<0.000000e+00> : vector<4x8x8xf32>
    %15 = tpu.matmul %12, %13, %cst_8 {dimension_numbers = #tpu.dot_dimension_numbers<[2], [2], [0], [0], [0, 1, 0, 0, 1, 0], [1], [1]>} : vector<8x4x8xf32>, vector<8x4x8xf32>, vector<4x8x8xf32> -> vector<4x8x8xf32>
    "tpu.trace_stop"() : () -> ()
    %cst_9 = arith.constant 0.353553385 : f32
    %16 = vector.broadcast %cst_9 : f32 to vector<4x8x8xf32>
    %17 = arith.mulf %15, %16 : vector<4x8x8xf32>
    %cst_10 = arith.constant dense<0xFF800000> : vector<4x8xf32>
    %18 = vector.multi_reduction <maximumf>, %17, %cst_10 [2] : vector<4x8x8xf32> to vector<4x8xf32>
    %19 = vector.shape_cast %18 : vector<4x8xf32> to vector<4x8x1xf32>
    %20 = vector.broadcast %19 : vector<4x8x1xf32> to vector<4x8x8xf32>
    %21 = arith.subf %17, %20 : vector<4x8x8xf32>
    %22 = math.exp %21 : vector<4x8x8xf32>
    %cst_11 = arith.constant dense<0.000000e+00> : vector<4x8xf32>
    %23 = vector.multi_reduction <add>, %22, %cst_11 [2] : vector<4x8x8xf32> to vector<4x8xf32>
    %24 = vector.shape_cast %23 : vector<4x8xf32> to vector<4x8x1xf32>
    %25 = vector.broadcast %24 : vector<4x8x1xf32> to vector<4x8x8xf32>
    %26 = arith.divf %22, %25 : vector<4x8x8xf32>
    "tpu.trace_start"() <{level = 10 : i32, message = "hqk,khd->qhd"}> : () -> ()
    %cst_12 = arith.constant dense<0.000000e+00> : vector<4x8x8xf32>
    %27 = tpu.matmul %14, %26, %cst_12 {dimension_numbers = #tpu.dot_dimension_numbers<[0], [2], [2], [1], [0, 1, 0, 2, 1, 1], [1], [0]>} : vector<8x4x8xf32>, vector<4x8x8xf32>, vector<4x8x8xf32> -> vector<4x8x8xf32>
    %28 = tpu.transpose %27, [2, 0, 1] : vector<4x8x8xf32> -> vector<8x4x8xf32>
    "tpu.trace_stop"() : () -> ()
    %29 = vector.shape_cast %28 : vector<8x4x8xf32> to vector<8x32xf32>
    %c0_13 = arith.constant 0 : index
    %c0_14 = arith.constant 0 : index
    %c0_15 = arith.constant 0 : index
    %30 = vector.load %arg5[%c0_13, %c0_14, %c0_15] : memref<2x32x32xf32, #tpu.memory_space<vmem>>, vector<1x32x32xf32>
    %31 = vector.shape_cast %30 : vector<1x32x32xf32> to vector<32x32xf32>
    %cst_16 = arith.constant dense<0.000000e+00> : vector<8x32xf32>
    %32 = tpu.matmul %29, %31, %cst_16 {dimension_numbers = #tpu.dot_dimension_numbers<[1], [0], [0], [1], [0, 0, 1, 1], [], []>} : vector<8x32xf32>, vector<32x32xf32>, vector<8x32xf32> -> vector<8x32xf32>
    %c0_17 = arith.constant 0 : index
    %c0_18 = arith.constant 0 : index
    %c0_19 = arith.constant 0 : index
    %33 = vector.load %arg6[%c0_17, %c0_18, %c0_19] : memref<2x1x32xf32, #tpu.memory_space<vmem>>, vector<1x1x32xf32>
    %34 = vector.shape_cast %33 : vector<1x1x32xf32> to vector<1x32xf32>
    %35 = vector.broadcast %34 : vector<1x32xf32> to vector<8x32xf32>
    %36 = arith.addf %32, %35 : vector<8x32xf32>
    %37 = arith.addf %36, %1 : vector<8x32xf32>
    %c0_20 = arith.constant 0 : index
    %c0_21 = arith.constant 0 : index
    %c0_22 = arith.constant 0 : index
    %38 = vector.load %arg7[%c0_20, %c0_21, %c0_22] : memref<2x1x32xf32, #tpu.memory_space<vmem>>, vector<1x1x32xf32>
    %39 = vector.shape_cast %38 : vector<1x1x32xf32> to vector<1x32xf32>
    %c0_23 = arith.constant 0 : index
    %c0_24 = arith.constant 0 : index
    %c0_25 = arith.constant 0 : index
    %40 = vector.load %arg8[%c0_23, %c0_24, %c0_25] : memref<2x1x32xf32, #tpu.memory_space<vmem>>, vector<1x1x32xf32>
    %41 = vector.shape_cast %40 : vector<1x1x32xf32> to vector<1x32xf32>
    %cst_26 = arith.constant dense<0.000000e+00> : vector<8xf32>
    %42 = vector.multi_reduction <add>, %37, %cst_26 [1] : vector<8x32xf32> to vector<8xf32>
    %43 = vector.shape_cast %42 : vector<8xf32> to vector<8x1xf32>
    %cst_27 = arith.constant 3.200000e+01 : f32
    %44 = vector.broadcast %cst_27 : f32 to vector<8x1xf32>
    %45 = arith.divf %43, %44 : vector<8x1xf32>
    %46 = vector.broadcast %45 : vector<8x1xf32> to vector<8x32xf32>
    %47 = arith.subf %37, %46 : vector<8x32xf32>
    %48 = arith.mulf %47, %47 : vector<8x32xf32>
    %cst_28 = arith.constant dense<0.000000e+00> : vector<8xf32>
    %49 = vector.multi_reduction <add>, %48, %cst_28 [1] : vector<8x32xf32> to vector<8xf32>
    %50 = vector.shape_cast %49 : vector<8xf32> to vector<8x1xf32>
    %cst_29 = arith.constant 3.200000e+01 : f32
    %51 = vector.broadcast %cst_29 : f32 to vector<8x1xf32>
    %52 = arith.divf %50, %51 : vector<8x1xf32>
    %53 = vector.broadcast %45 : vector<8x1xf32> to vector<8x32xf32>
    %54 = arith.subf %37, %53 : vector<8x32xf32>
    %cst_30 = arith.constant 9.99999974E-6 : f32
    %55 = vector.broadcast %cst_30 : f32 to vector<8x1xf32>
    %56 = arith.addf %52, %55 : vector<8x1xf32>
    %57 = math.rsqrt %56 : vector<8x1xf32>
    %58 = vector.broadcast %57 : vector<8x1xf32> to vector<8x32xf32>
    %59 = arith.mulf %54, %58 : vector<8x32xf32>
    %60 = vector.broadcast %39 : vector<1x32xf32> to vector<8x32xf32>
    %61 = arith.mulf %59, %60 : vector<8x32xf32>
    %62 = vector.broadcast %41 : vector<1x32xf32> to vector<8x32xf32>
    %63 = arith.addf %61, %62 : vector<8x32xf32>
    %c0_31 = arith.constant 0 : index
    %c0_32 = arith.constant 0 : index
    %c0_33 = arith.constant 0 : index
    %64 = vector.load %arg9[%c0_31, %c0_32, %c0_33] : memref<2x32x64xf32, #tpu.memory_space<vmem>>, vector<1x32x64xf32>
    %65 = vector.shape_cast %64 : vector<1x32x64xf32> to vector<32x64xf32>
    %cst_34 = arith.constant dense<0.000000e+00> : vector<8x64xf32>
    %66 = tpu.matmul %63, %65, %cst_34 {dimension_numbers = #tpu.dot_dimension_numbers<[1], [0], [0], [1], [0, 0, 1, 1], [], []>} : vector<8x32xf32>, vector<32x64xf32>, vector<8x64xf32> -> vector<8x64xf32>
    %c0_35 = arith.constant 0 : index
    %c0_36 = arith.constant 0 : index
    %c0_37 = arith.constant 0 : index
    %67 = vector.load %arg10[%c0_35, %c0_36, %c0_37] : memref<2x1x64xf32, #tpu.memory_space<vmem>>, vector<1x1x64xf32>
    %68 = vector.shape_cast %67 : vector<1x1x64xf32> to vector<1x64xf32>
    %69 = vector.broadcast %68 : vector<1x64xf32> to vector<8x64xf32>
    %70 = arith.addf %66, %69 : vector<8x64xf32>
    %cst_38 = arith.constant 0.000000e+00 : f32
    %71 = vector.broadcast %cst_38 : f32 to vector<8x64xf32>
    %72 = arith.maximumf %70, %71 : vector<8x64xf32>
    %c0_39 = arith.constant 0 : index
    %c0_40 = arith.constant 0 : index
    %c0_41 = arith.constant 0 : index
    %73 = vector.load %arg11[%c0_39, %c0_40, %c0_41] : memref<2x64x32xf32, #tpu.memory_space<vmem>>, vector<1x64x32xf32>
    %74 = vector.shape_cast %73 : vector<1x64x32xf32> to vector<64x32xf32>
    %cst_42 = arith.constant dense<0.000000e+00> : vector<8x32xf32>
    %75 = tpu.matmul %72, %74, %cst_42 {dimension_numbers = #tpu.dot_dimension_numbers<[1], [0], [0], [1], [0, 0, 1, 1], [], []>} : vector<8x64xf32>, vector<64x32xf32>, vector<8x32xf32> -> vector<8x32xf32>
    %c0_43 = arith.constant 0 : index
    %c0_44 = arith.constant 0 : index
    %c0_45 = arith.constant 0 : index
    %76 = vector.load %arg12[%c0_43, %c0_44, %c0_45] : memref<2x1x32xf32, #tpu.memory_space<vmem>>, vector<1x1x32xf32>
    %77 = vector.shape_cast %76 : vector<1x1x32xf32> to vector<1x32xf32>
    %78 = vector.broadcast %77 : vector<1x32xf32> to vector<8x32xf32>
    %79 = arith.addf %75, %78 : vector<8x32xf32>
    %80 = arith.addf %79, %63 : vector<8x32xf32>
    %c0_46 = arith.constant 0 : index
    %c0_47 = arith.constant 0 : index
    %c0_48 = arith.constant 0 : index
    %81 = vector.load %arg13[%c0_46, %c0_47, %c0_48] : memref<2x1x32xf32, #tpu.memory_space<vmem>>, vector<1x1x32xf32>
    %82 = vector.shape_cast %81 : vector<1x1x32xf32> to vector<1x32xf32>
    %c0_49 = arith.constant 0 : index
    %c0_50 = arith.constant 0 : index
    %c0_51 = arith.constant 0 : index
    %83 = vector.load %arg14[%c0_49, %c0_50, %c0_51] : memref<2x1x32xf32, #tpu.memory_space<vmem>>, vector<1x1x32xf32>
    %84 = vector.shape_cast %83 : vector<1x1x32xf32> to vector<1x32xf32>
    %cst_52 = arith.constant dense<0.000000e+00> : vector<8xf32>
    %85 = vector.multi_reduction <add>, %80, %cst_52 [1] : vector<8x32xf32> to vector<8xf32>
    %86 = vector.shape_cast %85 : vector<8xf32> to vector<8x1xf32>
    %cst_53 = arith.constant 3.200000e+01 : f32
    %87 = vector.broadcast %cst_53 : f32 to vector<8x1xf32>
    %88 = arith.divf %86, %87 : vector<8x1xf32>
    %89 = vector.broadcast %88 : vector<8x1xf32> to vector<8x32xf32>
    %90 = arith.subf %80, %89 : vector<8x32xf32>
    %91 = arith.mulf %90, %90 : vector<8x32xf32>
    %cst_54 = arith.constant dense<0.000000e+00> : vector<8xf32>
    %92 = vector.multi_reduction <add>, %91, %cst_54 [1] : vector<8x32xf32> to vector<8xf32>
    %93 = vector.shape_cast %92 : vector<8xf32> to vector<8x1xf32>
    %cst_55 = arith.constant 3.200000e+01 : f32
    %94 = vector.broadcast %cst_55 : f32 to vector<8x1xf32>
    %95 = arith.divf %93, %94 : vector<8x1xf32>
    %96 = vector.broadcast %88 : vector<8x1xf32> to vector<8x32xf32>
    %97 = arith.subf %80, %96 : vector<8x32xf32>
    %cst_56 = arith.constant 9.99999974E-6 : f32
    %98 = vector.broadcast %cst_56 : f32 to vector<8x1xf32>
    %99 = arith.addf %95, %98 : vector<8x1xf32>
    %100 = math.rsqrt %99 : vector<8x1xf32>
    %101 = vector.broadcast %100 : vector<8x1xf32> to vector<8x32xf32>
    %102 = arith.mulf %97, %101 : vector<8x32xf32>
    %103 = vector.broadcast %82 : vector<1x32xf32> to vector<8x32xf32>
    %104 = arith.mulf %102, %103 : vector<8x32xf32>
    %105 = vector.broadcast %84 : vector<1x32xf32> to vector<8x32xf32>
    %106 = arith.addf %104, %105 : vector<8x32xf32>
    %c1 = arith.constant 1 : index
    %c0_57 = arith.constant 0 : index
    %c0_58 = arith.constant 0 : index
    %107 = vector.load %arg3[%c1, %c0_57, %c0_58] : memref<2x32x96xf32, #tpu.memory_space<vmem>>, vector<1x32x96xf32>
    %108 = vector.shape_cast %107 : vector<1x32x96xf32> to vector<32x96xf32>
    %cst_59 = arith.constant dense<0.000000e+00> : vector<8x96xf32>
    %109 = tpu.matmul %106, %108, %cst_59 {dimension_numbers = #tpu.dot_dimension_numbers<[1], [0], [0], [1], [0, 0, 1, 1], [], []>} : vector<8x32xf32>, vector<32x96xf32>, vector<8x96xf32> -> vector<8x96xf32>
    %c1_60 = arith.constant 1 : index
    %c0_61 = arith.constant 0 : index
    %c0_62 = arith.constant 0 : index
    %110 = vector.load %arg4[%c1_60, %c0_61, %c0_62] : memref<2x1x96xf32, #tpu.memory_space<vmem>>, vector<1x1x96xf32>
    %111 = vector.shape_cast %110 : vector<1x1x96xf32> to vector<1x96xf32>
    %112 = vector.broadcast %111 : vector<1x96xf32> to vector<8x96xf32>
    %113 = arith.addf %109, %112 : vector<8x96xf32>
    %114 = vector.extract_strided_slice %113 {offsets = [0, 0], sizes = [8, 32], strides = [1, 1]} : vector<8x96xf32> to vector<8x32xf32>
    %115 = vector.extract_strided_slice %113 {offsets = [0, 32], sizes = [8, 32], strides = [1, 1]} : vector<8x96xf32> to vector<8x32xf32>
    %116 = vector.extract_strided_slice %113 {offsets = [0, 64], sizes = [8, 32], strides = [1, 1]} : vector<8x96xf32> to vector<8x32xf32>
    %117 = vector.shape_cast %114 : vector<8x32xf32> to vector<8x4x8xf32>
    %118 = vector.shape_cast %115 : vector<8x32xf32> to vector<8x4x8xf32>
    %119 = vector.shape_cast %116 : vector<8x32xf32> to vector<8x4x8xf32>
    "tpu.trace_start"() <{level = 10 : i32, message = "qhd,khd->hqk"}> : () -> ()
    %cst_63 = arith.constant dense<0.000000e+00> : vector<4x8x8xf32>
    %120 = tpu.matmul %117, %118, %cst_63 {dimension_numbers = #tpu.dot_dimension_numbers<[2], [2], [0], [0], [0, 1, 0, 0, 1, 0], [1], [1]>} : vector<8x4x8xf32>, vector<8x4x8xf32>, vector<4x8x8xf32> -> vector<4x8x8xf32>
    "tpu.trace_stop"() : () -> ()
    %cst_64 = arith.constant 0.353553385 : f32
    %121 = vector.broadcast %cst_64 : f32 to vector<4x8x8xf32>
    %122 = arith.mulf %120, %121 : vector<4x8x8xf32>
    %cst_65 = arith.constant dense<0xFF800000> : vector<4x8xf32>
    %123 = vector.multi_reduction <maximumf>, %122, %cst_65 [2] : vector<4x8x8xf32> to vector<4x8xf32>
    %124 = vector.shape_cast %123 : vector<4x8xf32> to vector<4x8x1xf32>
    %125 = vector.broadcast %124 : vector<4x8x1xf32> to vector<4x8x8xf32>
    %126 = arith.subf %122, %125 : vector<4x8x8xf32>
    %127 = math.exp %126 : vector<4x8x8xf32>
    %cst_66 = arith.constant dense<0.000000e+00> : vector<4x8xf32>
    %128 = vector.multi_reduction <add>, %127, %cst_66 [2] : vector<4x8x8xf32> to vector<4x8xf32>
    %129 = vector.shape_cast %128 : vector<4x8xf32> to vector<4x8x1xf32>
    %130 = vector.broadcast %129 : vector<4x8x1xf32> to vector<4x8x8xf32>
    %131 = arith.divf %127, %130 : vector<4x8x8xf32>
    "tpu.trace_start"() <{level = 10 : i32, message = "hqk,khd->qhd"}> : () -> ()
    %cst_67 = arith.constant dense<0.000000e+00> : vector<4x8x8xf32>
    %132 = tpu.matmul %119, %131, %cst_67 {dimension_numbers = #tpu.dot_dimension_numbers<[0], [2], [2], [1], [0, 1, 0, 2, 1, 1], [1], [0]>} : vector<8x4x8xf32>, vector<4x8x8xf32>, vector<4x8x8xf32> -> vector<4x8x8xf32>
    %133 = tpu.transpose %132, [2, 0, 1] : vector<4x8x8xf32> -> vector<8x4x8xf32>
    "tpu.trace_stop"() : () -> ()
    %134 = vector.shape_cast %133 : vector<8x4x8xf32> to vector<8x32xf32>
    %c1_68 = arith.constant 1 : index
    %c0_69 = arith.constant 0 : index
    %c0_70 = arith.constant 0 : index
    %135 = vector.load %arg5[%c1_68, %c0_69, %c0_70] : memref<2x32x32xf32, #tpu.memory_space<vmem>>, vector<1x32x32xf32>
    %136 = vector.shape_cast %135 : vector<1x32x32xf32> to vector<32x32xf32>
    %cst_71 = arith.constant dense<0.000000e+00> : vector<8x32xf32>
    %137 = tpu.matmul %134, %136, %cst_71 {dimension_numbers = #tpu.dot_dimension_numbers<[1], [0], [0], [1], [0, 0, 1, 1], [], []>} : vector<8x32xf32>, vector<32x32xf32>, vector<8x32xf32> -> vector<8x32xf32>
    %c1_72 = arith.constant 1 : index
    %c0_73 = arith.constant 0 : index
    %c0_74 = arith.constant 0 : index
    %138 = vector.load %arg6[%c1_72, %c0_73, %c0_74] : memref<2x1x32xf32, #tpu.memory_space<vmem>>, vector<1x1x32xf32>
    %139 = vector.shape_cast %138 : vector<1x1x32xf32> to vector<1x32xf32>
    %140 = vector.broadcast %139 : vector<1x32xf32> to vector<8x32xf32>
    %141 = arith.addf %137, %140 : vector<8x32xf32>
    %142 = arith.addf %141, %106 : vector<8x32xf32>
    %c1_75 = arith.constant 1 : index
    %c0_76 = arith.constant 0 : index
    %c0_77 = arith.constant 0 : index
    %143 = vector.load %arg7[%c1_75, %c0_76, %c0_77] : memref<2x1x32xf32, #tpu.memory_space<vmem>>, vector<1x1x32xf32>
    %144 = vector.shape_cast %143 : vector<1x1x32xf32> to vector<1x32xf32>
    %c1_78 = arith.constant 1 : index
    %c0_79 = arith.constant 0 : index
    %c0_80 = arith.constant 0 : index
    %145 = vector.load %arg8[%c1_78, %c0_79, %c0_80] : memref<2x1x32xf32, #tpu.memory_space<vmem>>, vector<1x1x32xf32>
    %146 = vector.shape_cast %145 : vector<1x1x32xf32> to vector<1x32xf32>
    %cst_81 = arith.constant dense<0.000000e+00> : vector<8xf32>
    %147 = vector.multi_reduction <add>, %142, %cst_81 [1] : vector<8x32xf32> to vector<8xf32>
    %148 = vector.shape_cast %147 : vector<8xf32> to vector<8x1xf32>
    %cst_82 = arith.constant 3.200000e+01 : f32
    %149 = vector.broadcast %cst_82 : f32 to vector<8x1xf32>
    %150 = arith.divf %148, %149 : vector<8x1xf32>
    %151 = vector.broadcast %150 : vector<8x1xf32> to vector<8x32xf32>
    %152 = arith.subf %142, %151 : vector<8x32xf32>
    %153 = arith.mulf %152, %152 : vector<8x32xf32>
    %cst_83 = arith.constant dense<0.000000e+00> : vector<8xf32>
    %154 = vector.multi_reduction <add>, %153, %cst_83 [1] : vector<8x32xf32> to vector<8xf32>
    %155 = vector.shape_cast %154 : vector<8xf32> to vector<8x1xf32>
    %cst_84 = arith.constant 3.200000e+01 : f32
    %156 = vector.broadcast %cst_84 : f32 to vector<8x1xf32>
    %157 = arith.divf %155, %156 : vector<8x1xf32>
    %158 = vector.broadcast %150 : vector<8x1xf32> to vector<8x32xf32>
    %159 = arith.subf %142, %158 : vector<8x32xf32>
    %cst_85 = arith.constant 9.99999974E-6 : f32
    %160 = vector.broadcast %cst_85 : f32 to vector<8x1xf32>
    %161 = arith.addf %157, %160 : vector<8x1xf32>
    %162 = math.rsqrt %161 : vector<8x1xf32>
    %163 = vector.broadcast %162 : vector<8x1xf32> to vector<8x32xf32>
    %164 = arith.mulf %159, %163 : vector<8x32xf32>
    %165 = vector.broadcast %144 : vector<1x32xf32> to vector<8x32xf32>
    %166 = arith.mulf %164, %165 : vector<8x32xf32>
    %167 = vector.broadcast %146 : vector<1x32xf32> to vector<8x32xf32>
    %168 = arith.addf %166, %167 : vector<8x32xf32>
    %c1_86 = arith.constant 1 : index
    %c0_87 = arith.constant 0 : index
    %c0_88 = arith.constant 0 : index
    %169 = vector.load %arg9[%c1_86, %c0_87, %c0_88] : memref<2x32x64xf32, #tpu.memory_space<vmem>>, vector<1x32x64xf32>
    %170 = vector.shape_cast %169 : vector<1x32x64xf32> to vector<32x64xf32>
    %cst_89 = arith.constant dense<0.000000e+00> : vector<8x64xf32>
    %171 = tpu.matmul %168, %170, %cst_89 {dimension_numbers = #tpu.dot_dimension_numbers<[1], [0], [0], [1], [0, 0, 1, 1], [], []>} : vector<8x32xf32>, vector<32x64xf32>, vector<8x64xf32> -> vector<8x64xf32>
    %c1_90 = arith.constant 1 : index
    %c0_91 = arith.constant 0 : index
    %c0_92 = arith.constant 0 : index
    %172 = vector.load %arg10[%c1_90, %c0_91, %c0_92] : memref<2x1x64xf32, #tpu.memory_space<vmem>>, vector<1x1x64xf32>
    %173 = vector.shape_cast %172 : vector<1x1x64xf32> to vector<1x64xf32>
    %174 = vector.broadcast %173 : vector<1x64xf32> to vector<8x64xf32>
    %175 = arith.addf %171, %174 : vector<8x64xf32>
    %cst_93 = arith.constant 0.000000e+00 : f32
    %176 = vector.broadcast %cst_93 : f32 to vector<8x64xf32>
    %177 = arith.maximumf %175, %176 : vector<8x64xf32>
    %c1_94 = arith.constant 1 : index
    %c0_95 = arith.constant 0 : index
    %c0_96 = arith.constant 0 : index
    %178 = vector.load %arg11[%c1_94, %c0_95, %c0_96] : memref<2x64x32xf32, #tpu.memory_space<vmem>>, vector<1x64x32xf32>
    %179 = vector.shape_cast %178 : vector<1x64x32xf32> to vector<64x32xf32>
    %cst_97 = arith.constant dense<0.000000e+00> : vector<8x32xf32>
    %180 = tpu.matmul %177, %179, %cst_97 {dimension_numbers = #tpu.dot_dimension_numbers<[1], [0], [0], [1], [0, 0, 1, 1], [], []>} : vector<8x64xf32>, vector<64x32xf32>, vector<8x32xf32> -> vector<8x32xf32>
    %c1_98 = arith.constant 1 : index
    %c0_99 = arith.constant 0 : index
    %c0_100 = arith.constant 0 : index
    %181 = vector.load %arg12[%c1_98, %c0_99, %c0_100] : memref<2x1x32xf32, #tpu.memory_space<vmem>>, vector<1x1x32xf32>
    %182 = vector.shape_cast %181 : vector<1x1x32xf32> to vector<1x32xf32>
    %183 = vector.broadcast %182 : vector<1x32xf32> to vector<8x32xf32>
    %184 = arith.addf %180, %183 : vector<8x32xf32>
    %185 = arith.addf %184, %168 : vector<8x32xf32>
    %c1_101 = arith.constant 1 : index
    %c0_102 = arith.constant 0 : index
    %c0_103 = arith.constant 0 : index
    %186 = vector.load %arg13[%c1_101, %c0_102, %c0_103] : memref<2x1x32xf32, #tpu.memory_space<vmem>>, vector<1x1x32xf32>
    %187 = vector.shape_cast %186 : vector<1x1x32xf32> to vector<1x32xf32>
    %c1_104 = arith.constant 1 : index
    %c0_105 = arith.constant 0 : index
    %c0_106 = arith.constant 0 : index
    %188 = vector.load %arg14[%c1_104, %c0_105, %c0_106] : memref<2x1x32xf32, #tpu.memory_space<vmem>>, vector<1x1x32xf32>
    %189 = vector.shape_cast %188 : vector<1x1x32xf32> to vector<1x32xf32>
    %cst_107 = arith.constant dense<0.000000e+00> : vector<8xf32>
    %190 = vector.multi_reduction <add>, %185, %cst_107 [1] : vector<8x32xf32> to vector<8xf32>
    %191 = vector.shape_cast %190 : vector<8xf32> to vector<8x1xf32>
    %cst_108 = arith.constant 3.200000e+01 : f32
    %192 = vector.broadcast %cst_108 : f32 to vector<8x1xf32>
    %193 = arith.divf %191, %192 : vector<8x1xf32>
    %194 = vector.broadcast %193 : vector<8x1xf32> to vector<8x32xf32>
    %195 = arith.subf %185, %194 : vector<8x32xf32>
    %196 = arith.mulf %195, %195 : vector<8x32xf32>
    %cst_109 = arith.constant dense<0.000000e+00> : vector<8xf32>
    %197 = vector.multi_reduction <add>, %196, %cst_109 [1] : vector<8x32xf32> to vector<8xf32>
    %198 = vector.shape_cast %197 : vector<8xf32> to vector<8x1xf32>
    %cst_110 = arith.constant 3.200000e+01 : f32
    %199 = vector.broadcast %cst_110 : f32 to vector<8x1xf32>
    %200 = arith.divf %198, %199 : vector<8x1xf32>
    %201 = vector.broadcast %193 : vector<8x1xf32> to vector<8x32xf32>
    %202 = arith.subf %185, %201 : vector<8x32xf32>
    %cst_111 = arith.constant 9.99999974E-6 : f32
    %203 = vector.broadcast %cst_111 : f32 to vector<8x1xf32>
    %204 = arith.addf %200, %203 : vector<8x1xf32>
    %205 = math.rsqrt %204 : vector<8x1xf32>
    %206 = vector.broadcast %205 : vector<8x1xf32> to vector<8x32xf32>
    %207 = arith.mulf %202, %206 : vector<8x32xf32>
    %208 = vector.broadcast %187 : vector<1x32xf32> to vector<8x32xf32>
    %209 = arith.mulf %207, %208 : vector<8x32xf32>
    %210 = vector.broadcast %189 : vector<1x32xf32> to vector<8x32xf32>
    %211 = arith.addf %209, %210 : vector<8x32xf32>
    %c0_112 = arith.constant 0 : index
    %c0_113 = arith.constant 0 : index
    %c0_114 = arith.constant 0 : index
    %212 = vector.load %arg2[%c0_112, %c0_113, %c0_114] : memref<1x8x32xf32, #tpu.memory_space<vmem>>, vector<1x8x32xf32>
    %213 = vector.shape_cast %212 : vector<1x8x32xf32> to vector<8x32xf32>
    %c0_115 = arith.constant 0 : index
    %c0_116 = arith.constant 0 : index
    %c0_117 = arith.constant 0 : index
    %214 = vector.load %arg15[%c0_115, %c0_116, %c0_117] : memref<2x32x96xf32, #tpu.memory_space<vmem>>, vector<1x32x96xf32>
    %215 = vector.shape_cast %214 : vector<1x32x96xf32> to vector<32x96xf32>
    %cst_118 = arith.constant dense<0.000000e+00> : vector<8x96xf32>
    %216 = tpu.matmul %213, %215, %cst_118 {dimension_numbers = #tpu.dot_dimension_numbers<[1], [0], [0], [1], [0, 0, 1, 1], [], []>} : vector<8x32xf32>, vector<32x96xf32>, vector<8x96xf32> -> vector<8x96xf32>
    %c0_119 = arith.constant 0 : index
    %c0_120 = arith.constant 0 : index
    %c0_121 = arith.constant 0 : index
    %217 = vector.load %arg16[%c0_119, %c0_120, %c0_121] : memref<2x1x96xf32, #tpu.memory_space<vmem>>, vector<1x1x96xf32>
    %218 = vector.shape_cast %217 : vector<1x1x96xf32> to vector<1x96xf32>
    %219 = vector.broadcast %218 : vector<1x96xf32> to vector<8x96xf32>
    %220 = arith.addf %216, %219 : vector<8x96xf32>
    %221 = vector.extract_strided_slice %220 {offsets = [0, 0], sizes = [8, 32], strides = [1, 1]} : vector<8x96xf32> to vector<8x32xf32>
    %222 = vector.extract_strided_slice %220 {offsets = [0, 32], sizes = [8, 32], strides = [1, 1]} : vector<8x96xf32> to vector<8x32xf32>
    %223 = vector.extract_strided_slice %220 {offsets = [0, 64], sizes = [8, 32], strides = [1, 1]} : vector<8x96xf32> to vector<8x32xf32>
    %224 = vector.shape_cast %221 : vector<8x32xf32> to vector<8x4x8xf32>
    %225 = vector.shape_cast %222 : vector<8x32xf32> to vector<8x4x8xf32>
    %226 = vector.shape_cast %223 : vector<8x32xf32> to vector<8x4x8xf32>
    "tpu.trace_start"() <{level = 10 : i32, message = "qhd,khd->hqk"}> : () -> ()
    %cst_122 = arith.constant dense<0.000000e+00> : vector<4x8x8xf32>
    %227 = tpu.matmul %224, %225, %cst_122 {dimension_numbers = #tpu.dot_dimension_numbers<[2], [2], [0], [0], [0, 1, 0, 0, 1, 0], [1], [1]>} : vector<8x4x8xf32>, vector<8x4x8xf32>, vector<4x8x8xf32> -> vector<4x8x8xf32>
    "tpu.trace_stop"() : () -> ()
    %cst_123 = arith.constant 0.353553385 : f32
    %228 = vector.broadcast %cst_123 : f32 to vector<4x8x8xf32>
    %229 = arith.mulf %227, %228 : vector<4x8x8xf32>
    %cst_124 = arith.constant dense<0xFF800000> : vector<4x8xf32>
    %230 = vector.multi_reduction <maximumf>, %229, %cst_124 [2] : vector<4x8x8xf32> to vector<4x8xf32>
    %231 = vector.shape_cast %230 : vector<4x8xf32> to vector<4x8x1xf32>
    %232 = vector.broadcast %231 : vector<4x8x1xf32> to vector<4x8x8xf32>
    %233 = arith.subf %229, %232 : vector<4x8x8xf32>
    %234 = math.exp %233 : vector<4x8x8xf32>
    %cst_125 = arith.constant dense<0.000000e+00> : vector<4x8xf32>
    %235 = vector.multi_reduction <add>, %234, %cst_125 [2] : vector<4x8x8xf32> to vector<4x8xf32>
    %236 = vector.shape_cast %235 : vector<4x8xf32> to vector<4x8x1xf32>
    %237 = vector.broadcast %236 : vector<4x8x1xf32> to vector<4x8x8xf32>
    %238 = arith.divf %234, %237 : vector<4x8x8xf32>
    "tpu.trace_start"() <{level = 10 : i32, message = "hqk,khd->qhd"}> : () -> ()
    %cst_126 = arith.constant dense<0.000000e+00> : vector<4x8x8xf32>
    %239 = tpu.matmul %226, %238, %cst_126 {dimension_numbers = #tpu.dot_dimension_numbers<[0], [2], [2], [1], [0, 1, 0, 2, 1, 1], [1], [0]>} : vector<8x4x8xf32>, vector<4x8x8xf32>, vector<4x8x8xf32> -> vector<4x8x8xf32>
    %240 = tpu.transpose %239, [2, 0, 1] : vector<4x8x8xf32> -> vector<8x4x8xf32>
    "tpu.trace_stop"() : () -> ()
    %241 = vector.shape_cast %240 : vector<8x4x8xf32> to vector<8x32xf32>
    %c0_127 = arith.constant 0 : index
    %c0_128 = arith.constant 0 : index
    %c0_129 = arith.constant 0 : index
    %242 = vector.load %arg17[%c0_127, %c0_128, %c0_129] : memref<2x32x32xf32, #tpu.memory_space<vmem>>, vector<1x32x32xf32>
    %243 = vector.shape_cast %242 : vector<1x32x32xf32> to vector<32x32xf32>
    %cst_130 = arith.constant dense<0.000000e+00> : vector<8x32xf32>
    %244 = tpu.matmul %241, %243, %cst_130 {dimension_numbers = #tpu.dot_dimension_numbers<[1], [0], [0], [1], [0, 0, 1, 1], [], []>} : vector<8x32xf32>, vector<32x32xf32>, vector<8x32xf32> -> vector<8x32xf32>
    %c0_131 = arith.constant 0 : index
    %c0_132 = arith.constant 0 : index
    %c0_133 = arith.constant 0 : index
    %245 = vector.load %arg18[%c0_131, %c0_132, %c0_133] : memref<2x1x32xf32, #tpu.memory_space<vmem>>, vector<1x1x32xf32>
    %246 = vector.shape_cast %245 : vector<1x1x32xf32> to vector<1x32xf32>
    %247 = vector.broadcast %246 : vector<1x32xf32> to vector<8x32xf32>
    %248 = arith.addf %244, %247 : vector<8x32xf32>
    %c0_134 = arith.constant 0 : index
    %c0_135 = arith.constant 0 : index
    %c0_136 = arith.constant 0 : index
    %249 = vector.load %arg25[%c0_134, %c0_135, %c0_136] : memref<2x1x32xf32, #tpu.memory_space<vmem>>, vector<1x1x32xf32>
    %250 = vector.shape_cast %249 : vector<1x1x32xf32> to vector<1x32xf32>
    %c0_137 = arith.constant 0 : index
    %c0_138 = arith.constant 0 : index
    %c0_139 = arith.constant 0 : index
    %251 = vector.load %arg26[%c0_137, %c0_138, %c0_139] : memref<2x1x32xf32, #tpu.memory_space<vmem>>, vector<1x1x32xf32>
    %252 = vector.shape_cast %251 : vector<1x1x32xf32> to vector<1x32xf32>
    %cst_140 = arith.constant dense<0.000000e+00> : vector<8xf32>
    %253 = vector.multi_reduction <add>, %248, %cst_140 [1] : vector<8x32xf32> to vector<8xf32>
    %254 = vector.shape_cast %253 : vector<8xf32> to vector<8x1xf32>
    %cst_141 = arith.constant 3.200000e+01 : f32
    %255 = vector.broadcast %cst_141 : f32 to vector<8x1xf32>
    %256 = arith.divf %254, %255 : vector<8x1xf32>
    %257 = vector.broadcast %256 : vector<8x1xf32> to vector<8x32xf32>
    %258 = arith.subf %248, %257 : vector<8x32xf32>
    %259 = arith.mulf %258, %258 : vector<8x32xf32>
    %cst_142 = arith.constant dense<0.000000e+00> : vector<8xf32>
    %260 = vector.multi_reduction <add>, %259, %cst_142 [1] : vector<8x32xf32> to vector<8xf32>
    %261 = vector.shape_cast %260 : vector<8xf32> to vector<8x1xf32>
    %cst_143 = arith.constant 3.200000e+01 : f32
    %262 = vector.broadcast %cst_143 : f32 to vector<8x1xf32>
    %263 = arith.divf %261, %262 : vector<8x1xf32>
    %264 = vector.broadcast %256 : vector<8x1xf32> to vector<8x32xf32>
    %265 = arith.subf %248, %264 : vector<8x32xf32>
    %cst_144 = arith.constant 9.99999974E-6 : f32
    %266 = vector.broadcast %cst_144 : f32 to vector<8x1xf32>
    %267 = arith.addf %263, %266 : vector<8x1xf32>
    %268 = math.rsqrt %267 : vector<8x1xf32>
    %269 = vector.broadcast %268 : vector<8x1xf32> to vector<8x32xf32>
    %270 = arith.mulf %265, %269 : vector<8x32xf32>
    %271 = vector.broadcast %250 : vector<1x32xf32> to vector<8x32xf32>
    %272 = arith.mulf %270, %271 : vector<8x32xf32>
    %273 = vector.broadcast %252 : vector<1x32xf32> to vector<8x32xf32>
    %274 = arith.addf %272, %273 : vector<8x32xf32>
    %275 = arith.addf %274, %213 : vector<8x32xf32>
    %c0_145 = arith.constant 0 : index
    %c0_146 = arith.constant 0 : index
    %c0_147 = arith.constant 0 : index
    %276 = vector.load %arg19[%c0_145, %c0_146, %c0_147] : memref<2x32x32xf32, #tpu.memory_space<vmem>>, vector<1x32x32xf32>
    %277 = vector.shape_cast %276 : vector<1x32x32xf32> to vector<32x32xf32>
    %cst_148 = arith.constant dense<0.000000e+00> : vector<8x32xf32>
    %278 = tpu.matmul %275, %277, %cst_148 {dimension_numbers = #tpu.dot_dimension_numbers<[1], [0], [0], [1], [0, 0, 1, 1], [], []>} : vector<8x32xf32>, vector<32x32xf32>, vector<8x32xf32> -> vector<8x32xf32>
    %c0_149 = arith.constant 0 : index
    %c0_150 = arith.constant 0 : index
    %c0_151 = arith.constant 0 : index
    %279 = vector.load %arg20[%c0_149, %c0_150, %c0_151] : memref<2x1x32xf32, #tpu.memory_space<vmem>>, vector<1x1x32xf32>
    %280 = vector.shape_cast %279 : vector<1x1x32xf32> to vector<1x32xf32>
    %281 = vector.broadcast %280 : vector<1x32xf32> to vector<8x32xf32>
    %282 = arith.addf %278, %281 : vector<8x32xf32>
    %c0_152 = arith.constant 0 : index
    %c0_153 = arith.constant 0 : index
    %c0_154 = arith.constant 0 : index
    %283 = vector.load %arg21[%c0_152, %c0_153, %c0_154] : memref<2x32x64xf32, #tpu.memory_space<vmem>>, vector<1x32x64xf32>
    %284 = vector.shape_cast %283 : vector<1x32x64xf32> to vector<32x64xf32>
    %cst_155 = arith.constant dense<0.000000e+00> : vector<8x64xf32>
    %285 = tpu.matmul %211, %284, %cst_155 {dimension_numbers = #tpu.dot_dimension_numbers<[1], [0], [0], [1], [0, 0, 1, 1], [], []>} : vector<8x32xf32>, vector<32x64xf32>, vector<8x64xf32> -> vector<8x64xf32>
    %c0_156 = arith.constant 0 : index
    %c0_157 = arith.constant 0 : index
    %c0_158 = arith.constant 0 : index
    %286 = vector.load %arg22[%c0_156, %c0_157, %c0_158] : memref<2x1x64xf32, #tpu.memory_space<vmem>>, vector<1x1x64xf32>
    %287 = vector.shape_cast %286 : vector<1x1x64xf32> to vector<1x64xf32>
    %288 = vector.broadcast %287 : vector<1x64xf32> to vector<8x64xf32>
    %289 = arith.addf %285, %288 : vector<8x64xf32>
    %290 = vector.extract_strided_slice %289 {offsets = [0, 0], sizes = [8, 32], strides = [1, 1]} : vector<8x64xf32> to vector<8x32xf32>
    %291 = vector.extract_strided_slice %289 {offsets = [0, 32], sizes = [8, 32], strides = [1, 1]} : vector<8x64xf32> to vector<8x32xf32>
    %292 = vector.shape_cast %282 : vector<8x32xf32> to vector<8x4x8xf32>
    %293 = vector.shape_cast %290 : vector<8x32xf32> to vector<8x4x8xf32>
    %294 = vector.shape_cast %291 : vector<8x32xf32> to vector<8x4x8xf32>
    "tpu.trace_start"() <{level = 10 : i32, message = "qhd,khd->hqk"}> : () -> ()
    %cst_159 = arith.constant dense<0.000000e+00> : vector<4x8x8xf32>
    %295 = tpu.matmul %292, %293, %cst_159 {dimension_numbers = #tpu.dot_dimension_numbers<[2], [2], [0], [0], [0, 1, 0, 0, 1, 0], [1], [1]>} : vector<8x4x8xf32>, vector<8x4x8xf32>, vector<4x8x8xf32> -> vector<4x8x8xf32>
    "tpu.trace_stop"() : () -> ()
    %cst_160 = arith.constant 0.353553385 : f32
    %296 = vector.broadcast %cst_160 : f32 to vector<4x8x8xf32>
    %297 = arith.mulf %295, %296 : vector<4x8x8xf32>
    %cst_161 = arith.constant dense<0xFF800000> : vector<4x8xf32>
    %298 = vector.multi_reduction <maximumf>, %297, %cst_161 [2] : vector<4x8x8xf32> to vector<4x8xf32>
    %299 = vector.shape_cast %298 : vector<4x8xf32> to vector<4x8x1xf32>
    %300 = vector.broadcast %299 : vector<4x8x1xf32> to vector<4x8x8xf32>
    %301 = arith.subf %297, %300 : vector<4x8x8xf32>
    %302 = math.exp %301 : vector<4x8x8xf32>
    %cst_162 = arith.constant dense<0.000000e+00> : vector<4x8xf32>
    %303 = vector.multi_reduction <add>, %302, %cst_162 [2] : vector<4x8x8xf32> to vector<4x8xf32>
    %304 = vector.shape_cast %303 : vector<4x8xf32> to vector<4x8x1xf32>
    %305 = vector.broadcast %304 : vector<4x8x1xf32> to vector<4x8x8xf32>
    %306 = arith.divf %302, %305 : vector<4x8x8xf32>
    "tpu.trace_start"() <{level = 10 : i32, message = "hqk,khd->qhd"}> : () -> ()
    %cst_163 = arith.constant dense<0.000000e+00> : vector<4x8x8xf32>
    %307 = tpu.matmul %294, %306, %cst_163 {dimension_numbers = #tpu.dot_dimension_numbers<[0], [2], [2], [1], [0, 1, 0, 2, 1, 1], [1], [0]>} : vector<8x4x8xf32>, vector<4x8x8xf32>, vector<4x8x8xf32> -> vector<4x8x8xf32>
    %308 = tpu.transpose %307, [2, 0, 1] : vector<4x8x8xf32> -> vector<8x4x8xf32>
    "tpu.trace_stop"() : () -> ()
    %309 = vector.shape_cast %308 : vector<8x4x8xf32> to vector<8x32xf32>
    %c0_164 = arith.constant 0 : index
    %c0_165 = arith.constant 0 : index
    %c0_166 = arith.constant 0 : index
    %310 = vector.load %arg23[%c0_164, %c0_165, %c0_166] : memref<2x32x32xf32, #tpu.memory_space<vmem>>, vector<1x32x32xf32>
    %311 = vector.shape_cast %310 : vector<1x32x32xf32> to vector<32x32xf32>
    %cst_167 = arith.constant dense<0.000000e+00> : vector<8x32xf32>
    %312 = tpu.matmul %309, %311, %cst_167 {dimension_numbers = #tpu.dot_dimension_numbers<[1], [0], [0], [1], [0, 0, 1, 1], [], []>} : vector<8x32xf32>, vector<32x32xf32>, vector<8x32xf32> -> vector<8x32xf32>
    %c0_168 = arith.constant 0 : index
    %c0_169 = arith.constant 0 : index
    %c0_170 = arith.constant 0 : index
    %313 = vector.load %arg24[%c0_168, %c0_169, %c0_170] : memref<2x1x32xf32, #tpu.memory_space<vmem>>, vector<1x1x32xf32>
    %314 = vector.shape_cast %313 : vector<1x1x32xf32> to vector<1x32xf32>
    %315 = vector.broadcast %314 : vector<1x32xf32> to vector<8x32xf32>
    %316 = arith.addf %312, %315 : vector<8x32xf32>
    %c0_171 = arith.constant 0 : index
    %c0_172 = arith.constant 0 : index
    %c0_173 = arith.constant 0 : index
    %317 = vector.load %arg27[%c0_171, %c0_172, %c0_173] : memref<2x1x32xf32, #tpu.memory_space<vmem>>, vector<1x1x32xf32>
    %318 = vector.shape_cast %317 : vector<1x1x32xf32> to vector<1x32xf32>
    %c0_174 = arith.constant 0 : index
    %c0_175 = arith.constant 0 : index
    %c0_176 = arith.constant 0 : index
    %319 = vector.load %arg28[%c0_174, %c0_175, %c0_176] : memref<2x1x32xf32, #tpu.memory_space<vmem>>, vector<1x1x32xf32>
    %320 = vector.shape_cast %319 : vector<1x1x32xf32> to vector<1x32xf32>
    %cst_177 = arith.constant dense<0.000000e+00> : vector<8xf32>
    %321 = vector.multi_reduction <add>, %316, %cst_177 [1] : vector<8x32xf32> to vector<8xf32>
    %322 = vector.shape_cast %321 : vector<8xf32> to vector<8x1xf32>
    %cst_178 = arith.constant 3.200000e+01 : f32
    %323 = vector.broadcast %cst_178 : f32 to vector<8x1xf32>
    %324 = arith.divf %322, %323 : vector<8x1xf32>
    %325 = vector.broadcast %324 : vector<8x1xf32> to vector<8x32xf32>
    %326 = arith.subf %316, %325 : vector<8x32xf32>
    %327 = arith.mulf %326, %326 : vector<8x32xf32>
    %cst_179 = arith.constant dense<0.000000e+00> : vector<8xf32>
    %328 = vector.multi_reduction <add>, %327, %cst_179 [1] : vector<8x32xf32> to vector<8xf32>
    %329 = vector.shape_cast %328 : vector<8xf32> to vector<8x1xf32>
    %cst_180 = arith.constant 3.200000e+01 : f32
    %330 = vector.broadcast %cst_180 : f32 to vector<8x1xf32>
    %331 = arith.divf %329, %330 : vector<8x1xf32>
    %332 = vector.broadcast %324 : vector<8x1xf32> to vector<8x32xf32>
    %333 = arith.subf %316, %332 : vector<8x32xf32>
    %cst_181 = arith.constant 9.99999974E-6 : f32
    %334 = vector.broadcast %cst_181 : f32 to vector<8x1xf32>
    %335 = arith.addf %331, %334 : vector<8x1xf32>
    %336 = math.rsqrt %335 : vector<8x1xf32>
    %337 = vector.broadcast %336 : vector<8x1xf32> to vector<8x32xf32>
    %338 = arith.mulf %333, %337 : vector<8x32xf32>
    %339 = vector.broadcast %318 : vector<1x32xf32> to vector<8x32xf32>
    %340 = arith.mulf %338, %339 : vector<8x32xf32>
    %341 = vector.broadcast %320 : vector<1x32xf32> to vector<8x32xf32>
    %342 = arith.addf %340, %341 : vector<8x32xf32>
    %343 = arith.addf %342, %275 : vector<8x32xf32>
    %c0_182 = arith.constant 0 : index
    %c0_183 = arith.constant 0 : index
    %c0_184 = arith.constant 0 : index
    %344 = vector.load %arg29[%c0_182, %c0_183, %c0_184] : memref<2x32x64xf32, #tpu.memory_space<vmem>>, vector<1x32x64xf32>
    %345 = vector.shape_cast %344 : vector<1x32x64xf32> to vector<32x64xf32>
    %cst_185 = arith.constant dense<0.000000e+00> : vector<8x64xf32>
    %346 = tpu.matmul %343, %345, %cst_185 {dimension_numbers = #tpu.dot_dimension_numbers<[1], [0], [0], [1], [0, 0, 1, 1], [], []>} : vector<8x32xf32>, vector<32x64xf32>, vector<8x64xf32> -> vector<8x64xf32>
    %c0_186 = arith.constant 0 : index
    %c0_187 = arith.constant 0 : index
    %c0_188 = arith.constant 0 : index
    %347 = vector.load %arg30[%c0_186, %c0_187, %c0_188] : memref<2x1x64xf32, #tpu.memory_space<vmem>>, vector<1x1x64xf32>
    %348 = vector.shape_cast %347 : vector<1x1x64xf32> to vector<1x64xf32>
    %349 = vector.broadcast %348 : vector<1x64xf32> to vector<8x64xf32>
    %350 = arith.addf %346, %349 : vector<8x64xf32>
    %cst_189 = arith.constant 0.000000e+00 : f32
    %351 = vector.broadcast %cst_189 : f32 to vector<8x64xf32>
    %352 = arith.maximumf %350, %351 : vector<8x64xf32>
    %c0_190 = arith.constant 0 : index
    %c0_191 = arith.constant 0 : index
    %c0_192 = arith.constant 0 : index
    %353 = vector.load %arg31[%c0_190, %c0_191, %c0_192] : memref<2x64x32xf32, #tpu.memory_space<vmem>>, vector<1x64x32xf32>
    %354 = vector.shape_cast %353 : vector<1x64x32xf32> to vector<64x32xf32>
    %cst_193 = arith.constant dense<0.000000e+00> : vector<8x32xf32>
    %355 = tpu.matmul %352, %354, %cst_193 {dimension_numbers = #tpu.dot_dimension_numbers<[1], [0], [0], [1], [0, 0, 1, 1], [], []>} : vector<8x64xf32>, vector<64x32xf32>, vector<8x32xf32> -> vector<8x32xf32>
    %c0_194 = arith.constant 0 : index
    %c0_195 = arith.constant 0 : index
    %c0_196 = arith.constant 0 : index
    %356 = vector.load %arg32[%c0_194, %c0_195, %c0_196] : memref<2x1x32xf32, #tpu.memory_space<vmem>>, vector<1x1x32xf32>
    %357 = vector.shape_cast %356 : vector<1x1x32xf32> to vector<1x32xf32>
    %358 = vector.broadcast %357 : vector<1x32xf32> to vector<8x32xf32>
    %359 = arith.addf %355, %358 : vector<8x32xf32>
    %c1_197 = arith.constant 1 : index
    %c0_198 = arith.constant 0 : index
    %c0_199 = arith.constant 0 : index
    %360 = vector.load %arg15[%c1_197, %c0_198, %c0_199] : memref<2x32x96xf32, #tpu.memory_space<vmem>>, vector<1x32x96xf32>
    %361 = vector.shape_cast %360 : vector<1x32x96xf32> to vector<32x96xf32>
    %cst_200 = arith.constant dense<0.000000e+00> : vector<8x96xf32>
    %362 = tpu.matmul %359, %361, %cst_200 {dimension_numbers = #tpu.dot_dimension_numbers<[1], [0], [0], [1], [0, 0, 1, 1], [], []>} : vector<8x32xf32>, vector<32x96xf32>, vector<8x96xf32> -> vector<8x96xf32>
    %c1_201 = arith.constant 1 : index
    %c0_202 = arith.constant 0 : index
    %c0_203 = arith.constant 0 : index
    %363 = vector.load %arg16[%c1_201, %c0_202, %c0_203] : memref<2x1x96xf32, #tpu.memory_space<vmem>>, vector<1x1x96xf32>
    %364 = vector.shape_cast %363 : vector<1x1x96xf32> to vector<1x96xf32>
    %365 = vector.broadcast %364 : vector<1x96xf32> to vector<8x96xf32>
    %366 = arith.addf %362, %365 : vector<8x96xf32>
    %367 = vector.extract_strided_slice %366 {offsets = [0, 0], sizes = [8, 32], strides = [1, 1]} : vector<8x96xf32> to vector<8x32xf32>
    %368 = vector.extract_strided_slice %366 {offsets = [0, 32], sizes = [8, 32], strides = [1, 1]} : vector<8x96xf32> to vector<8x32xf32>
    %369 = vector.extract_strided_slice %366 {offsets = [0, 64], sizes = [8, 32], strides = [1, 1]} : vector<8x96xf32> to vector<8x32xf32>
    %370 = vector.shape_cast %367 : vector<8x32xf32> to vector<8x4x8xf32>
    %371 = vector.shape_cast %368 : vector<8x32xf32> to vector<8x4x8xf32>
    %372 = vector.shape_cast %369 : vector<8x32xf32> to vector<8x4x8xf32>
    "tpu.trace_start"() <{level = 10 : i32, message = "qhd,khd->hqk"}> : () -> ()
    %cst_204 = arith.constant dense<0.000000e+00> : vector<4x8x8xf32>
    %373 = tpu.matmul %370, %371, %cst_204 {dimension_numbers = #tpu.dot_dimension_numbers<[2], [2], [0], [0], [0, 1, 0, 0, 1, 0], [1], [1]>} : vector<8x4x8xf32>, vector<8x4x8xf32>, vector<4x8x8xf32> -> vector<4x8x8xf32>
    "tpu.trace_stop"() : () -> ()
    %cst_205 = arith.constant 0.353553385 : f32
    %374 = vector.broadcast %cst_205 : f32 to vector<4x8x8xf32>
    %375 = arith.mulf %373, %374 : vector<4x8x8xf32>
    %cst_206 = arith.constant dense<0xFF800000> : vector<4x8xf32>
    %376 = vector.multi_reduction <maximumf>, %375, %cst_206 [2] : vector<4x8x8xf32> to vector<4x8xf32>
    %377 = vector.shape_cast %376 : vector<4x8xf32> to vector<4x8x1xf32>
    %378 = vector.broadcast %377 : vector<4x8x1xf32> to vector<4x8x8xf32>
    %379 = arith.subf %375, %378 : vector<4x8x8xf32>
    %380 = math.exp %379 : vector<4x8x8xf32>
    %cst_207 = arith.constant dense<0.000000e+00> : vector<4x8xf32>
    %381 = vector.multi_reduction <add>, %380, %cst_207 [2] : vector<4x8x8xf32> to vector<4x8xf32>
    %382 = vector.shape_cast %381 : vector<4x8xf32> to vector<4x8x1xf32>
    %383 = vector.broadcast %382 : vector<4x8x1xf32> to vector<4x8x8xf32>
    %384 = arith.divf %380, %383 : vector<4x8x8xf32>
    "tpu.trace_start"() <{level = 10 : i32, message = "hqk,khd->qhd"}> : () -> ()
    %cst_208 = arith.constant dense<0.000000e+00> : vector<4x8x8xf32>
    %385 = tpu.matmul %372, %384, %cst_208 {dimension_numbers = #tpu.dot_dimension_numbers<[0], [2], [2], [1], [0, 1, 0, 2, 1, 1], [1], [0]>} : vector<8x4x8xf32>, vector<4x8x8xf32>, vector<4x8x8xf32> -> vector<4x8x8xf32>
    %386 = tpu.transpose %385, [2, 0, 1] : vector<4x8x8xf32> -> vector<8x4x8xf32>
    "tpu.trace_stop"() : () -> ()
    %387 = vector.shape_cast %386 : vector<8x4x8xf32> to vector<8x32xf32>
    %c1_209 = arith.constant 1 : index
    %c0_210 = arith.constant 0 : index
    %c0_211 = arith.constant 0 : index
    %388 = vector.load %arg17[%c1_209, %c0_210, %c0_211] : memref<2x32x32xf32, #tpu.memory_space<vmem>>, vector<1x32x32xf32>
    %389 = vector.shape_cast %388 : vector<1x32x32xf32> to vector<32x32xf32>
    %cst_212 = arith.constant dense<0.000000e+00> : vector<8x32xf32>
    %390 = tpu.matmul %387, %389, %cst_212 {dimension_numbers = #tpu.dot_dimension_numbers<[1], [0], [0], [1], [0, 0, 1, 1], [], []>} : vector<8x32xf32>, vector<32x32xf32>, vector<8x32xf32> -> vector<8x32xf32>
    %c1_213 = arith.constant 1 : index
    %c0_214 = arith.constant 0 : index
    %c0_215 = arith.constant 0 : index
    %391 = vector.load %arg18[%c1_213, %c0_214, %c0_215] : memref<2x1x32xf32, #tpu.memory_space<vmem>>, vector<1x1x32xf32>
    %392 = vector.shape_cast %391 : vector<1x1x32xf32> to vector<1x32xf32>
    %393 = vector.broadcast %392 : vector<1x32xf32> to vector<8x32xf32>
    %394 = arith.addf %390, %393 : vector<8x32xf32>
    %c1_216 = arith.constant 1 : index
    %c0_217 = arith.constant 0 : index
    %c0_218 = arith.constant 0 : index
    %395 = vector.load %arg25[%c1_216, %c0_217, %c0_218] : memref<2x1x32xf32, #tpu.memory_space<vmem>>, vector<1x1x32xf32>
    %396 = vector.shape_cast %395 : vector<1x1x32xf32> to vector<1x32xf32>
    %c1_219 = arith.constant 1 : index
    %c0_220 = arith.constant 0 : index
    %c0_221 = arith.constant 0 : index
    %397 = vector.load %arg26[%c1_219, %c0_220, %c0_221] : memref<2x1x32xf32, #tpu.memory_space<vmem>>, vector<1x1x32xf32>
    %398 = vector.shape_cast %397 : vector<1x1x32xf32> to vector<1x32xf32>
    %cst_222 = arith.constant dense<0.000000e+00> : vector<8xf32>
    %399 = vector.multi_reduction <add>, %394, %cst_222 [1] : vector<8x32xf32> to vector<8xf32>
    %400 = vector.shape_cast %399 : vector<8xf32> to vector<8x1xf32>
    %cst_223 = arith.constant 3.200000e+01 : f32
    %401 = vector.broadcast %cst_223 : f32 to vector<8x1xf32>
    %402 = arith.divf %400, %401 : vector<8x1xf32>
    %403 = vector.broadcast %402 : vector<8x1xf32> to vector<8x32xf32>
    %404 = arith.subf %394, %403 : vector<8x32xf32>
    %405 = arith.mulf %404, %404 : vector<8x32xf32>
    %cst_224 = arith.constant dense<0.000000e+00> : vector<8xf32>
    %406 = vector.multi_reduction <add>, %405, %cst_224 [1] : vector<8x32xf32> to vector<8xf32>
    %407 = vector.shape_cast %406 : vector<8xf32> to vector<8x1xf32>
    %cst_225 = arith.constant 3.200000e+01 : f32
    %408 = vector.broadcast %cst_225 : f32 to vector<8x1xf32>
    %409 = arith.divf %407, %408 : vector<8x1xf32>
    %410 = vector.broadcast %402 : vector<8x1xf32> to vector<8x32xf32>
    %411 = arith.subf %394, %410 : vector<8x32xf32>
    %cst_226 = arith.constant 9.99999974E-6 : f32
    %412 = vector.broadcast %cst_226 : f32 to vector<8x1xf32>
    %413 = arith.addf %409, %412 : vector<8x1xf32>
    %414 = math.rsqrt %413 : vector<8x1xf32>
    %415 = vector.broadcast %414 : vector<8x1xf32> to vector<8x32xf32>
    %416 = arith.mulf %411, %415 : vector<8x32xf32>
    %417 = vector.broadcast %396 : vector<1x32xf32> to vector<8x32xf32>
    %418 = arith.mulf %416, %417 : vector<8x32xf32>
    %419 = vector.broadcast %398 : vector<1x32xf32> to vector<8x32xf32>
    %420 = arith.addf %418, %419 : vector<8x32xf32>
    %421 = arith.addf %420, %359 : vector<8x32xf32>
    %c1_227 = arith.constant 1 : index
    %c0_228 = arith.constant 0 : index
    %c0_229 = arith.constant 0 : index
    %422 = vector.load %arg19[%c1_227, %c0_228, %c0_229] : memref<2x32x32xf32, #tpu.memory_space<vmem>>, vector<1x32x32xf32>
    %423 = vector.shape_cast %422 : vector<1x32x32xf32> to vector<32x32xf32>
    %cst_230 = arith.constant dense<0.000000e+00> : vector<8x32xf32>
    %424 = tpu.matmul %421, %423, %cst_230 {dimension_numbers = #tpu.dot_dimension_numbers<[1], [0], [0], [1], [0, 0, 1, 1], [], []>} : vector<8x32xf32>, vector<32x32xf32>, vector<8x32xf32> -> vector<8x32xf32>
    %c1_231 = arith.constant 1 : index
    %c0_232 = arith.constant 0 : index
    %c0_233 = arith.constant 0 : index
    %425 = vector.load %arg20[%c1_231, %c0_232, %c0_233] : memref<2x1x32xf32, #tpu.memory_space<vmem>>, vector<1x1x32xf32>
    %426 = vector.shape_cast %425 : vector<1x1x32xf32> to vector<1x32xf32>
    %427 = vector.broadcast %426 : vector<1x32xf32> to vector<8x32xf32>
    %428 = arith.addf %424, %427 : vector<8x32xf32>
    %c1_234 = arith.constant 1 : index
    %c0_235 = arith.constant 0 : index
    %c0_236 = arith.constant 0 : index
    %429 = vector.load %arg21[%c1_234, %c0_235, %c0_236] : memref<2x32x64xf32, #tpu.memory_space<vmem>>, vector<1x32x64xf32>
    %430 = vector.shape_cast %429 : vector<1x32x64xf32> to vector<32x64xf32>
    %cst_237 = arith.constant dense<0.000000e+00> : vector<8x64xf32>
    %431 = tpu.matmul %211, %430, %cst_237 {dimension_numbers = #tpu.dot_dimension_numbers<[1], [0], [0], [1], [0, 0, 1, 1], [], []>} : vector<8x32xf32>, vector<32x64xf32>, vector<8x64xf32> -> vector<8x64xf32>
    %c1_238 = arith.constant 1 : index
    %c0_239 = arith.constant 0 : index
    %c0_240 = arith.constant 0 : index
    %432 = vector.load %arg22[%c1_238, %c0_239, %c0_240] : memref<2x1x64xf32, #tpu.memory_space<vmem>>, vector<1x1x64xf32>
    %433 = vector.shape_cast %432 : vector<1x1x64xf32> to vector<1x64xf32>
    %434 = vector.broadcast %433 : vector<1x64xf32> to vector<8x64xf32>
    %435 = arith.addf %431, %434 : vector<8x64xf32>
    %436 = vector.extract_strided_slice %435 {offsets = [0, 0], sizes = [8, 32], strides = [1, 1]} : vector<8x64xf32> to vector<8x32xf32>
    %437 = vector.extract_strided_slice %435 {offsets = [0, 32], sizes = [8, 32], strides = [1, 1]} : vector<8x64xf32> to vector<8x32xf32>
    %438 = vector.shape_cast %428 : vector<8x32xf32> to vector<8x4x8xf32>
    %439 = vector.shape_cast %436 : vector<8x32xf32> to vector<8x4x8xf32>
    %440 = vector.shape_cast %437 : vector<8x32xf32> to vector<8x4x8xf32>
    "tpu.trace_start"() <{level = 10 : i32, message = "qhd,khd->hqk"}> : () -> ()
    %cst_241 = arith.constant dense<0.000000e+00> : vector<4x8x8xf32>
    %441 = tpu.matmul %438, %439, %cst_241 {dimension_numbers = #tpu.dot_dimension_numbers<[2], [2], [0], [0], [0, 1, 0, 0, 1, 0], [1], [1]>} : vector<8x4x8xf32>, vector<8x4x8xf32>, vector<4x8x8xf32> -> vector<4x8x8xf32>
    "tpu.trace_stop"() : () -> ()
    %cst_242 = arith.constant 0.353553385 : f32
    %442 = vector.broadcast %cst_242 : f32 to vector<4x8x8xf32>
    %443 = arith.mulf %441, %442 : vector<4x8x8xf32>
    %cst_243 = arith.constant dense<0xFF800000> : vector<4x8xf32>
    %444 = vector.multi_reduction <maximumf>, %443, %cst_243 [2] : vector<4x8x8xf32> to vector<4x8xf32>
    %445 = vector.shape_cast %444 : vector<4x8xf32> to vector<4x8x1xf32>
    %446 = vector.broadcast %445 : vector<4x8x1xf32> to vector<4x8x8xf32>
    %447 = arith.subf %443, %446 : vector<4x8x8xf32>
    %448 = math.exp %447 : vector<4x8x8xf32>
    %cst_244 = arith.constant dense<0.000000e+00> : vector<4x8xf32>
    %449 = vector.multi_reduction <add>, %448, %cst_244 [2] : vector<4x8x8xf32> to vector<4x8xf32>
    %450 = vector.shape_cast %449 : vector<4x8xf32> to vector<4x8x1xf32>
    %451 = vector.broadcast %450 : vector<4x8x1xf32> to vector<4x8x8xf32>
    %452 = arith.divf %448, %451 : vector<4x8x8xf32>
    "tpu.trace_start"() <{level = 10 : i32, message = "hqk,khd->qhd"}> : () -> ()
    %cst_245 = arith.constant dense<0.000000e+00> : vector<4x8x8xf32>
    %453 = tpu.matmul %440, %452, %cst_245 {dimension_numbers = #tpu.dot_dimension_numbers<[0], [2], [2], [1], [0, 1, 0, 2, 1, 1], [1], [0]>} : vector<8x4x8xf32>, vector<4x8x8xf32>, vector<4x8x8xf32> -> vector<4x8x8xf32>
    %454 = tpu.transpose %453, [2, 0, 1] : vector<4x8x8xf32> -> vector<8x4x8xf32>
    "tpu.trace_stop"() : () -> ()
    %455 = vector.shape_cast %454 : vector<8x4x8xf32> to vector<8x32xf32>
    %c1_246 = arith.constant 1 : index
    %c0_247 = arith.constant 0 : index
    %c0_248 = arith.constant 0 : index
    %456 = vector.load %arg23[%c1_246, %c0_247, %c0_248] : memref<2x32x32xf32, #tpu.memory_space<vmem>>, vector<1x32x32xf32>
    %457 = vector.shape_cast %456 : vector<1x32x32xf32> to vector<32x32xf32>
    %cst_249 = arith.constant dense<0.000000e+00> : vector<8x32xf32>
    %458 = tpu.matmul %455, %457, %cst_249 {dimension_numbers = #tpu.dot_dimension_numbers<[1], [0], [0], [1], [0, 0, 1, 1], [], []>} : vector<8x32xf32>, vector<32x32xf32>, vector<8x32xf32> -> vector<8x32xf32>
    %c1_250 = arith.constant 1 : index
    %c0_251 = arith.constant 0 : index
    %c0_252 = arith.constant 0 : index
    %459 = vector.load %arg24[%c1_250, %c0_251, %c0_252] : memref<2x1x32xf32, #tpu.memory_space<vmem>>, vector<1x1x32xf32>
    %460 = vector.shape_cast %459 : vector<1x1x32xf32> to vector<1x32xf32>
    %461 = vector.broadcast %460 : vector<1x32xf32> to vector<8x32xf32>
    %462 = arith.addf %458, %461 : vector<8x32xf32>
    %c1_253 = arith.constant 1 : index
    %c0_254 = arith.constant 0 : index
    %c0_255 = arith.constant 0 : index
    %463 = vector.load %arg27[%c1_253, %c0_254, %c0_255] : memref<2x1x32xf32, #tpu.memory_space<vmem>>, vector<1x1x32xf32>
    %464 = vector.shape_cast %463 : vector<1x1x32xf32> to vector<1x32xf32>
    %c1_256 = arith.constant 1 : index
    %c0_257 = arith.constant 0 : index
    %c0_258 = arith.constant 0 : index
    %465 = vector.load %arg28[%c1_256, %c0_257, %c0_258] : memref<2x1x32xf32, #tpu.memory_space<vmem>>, vector<1x1x32xf32>
    %466 = vector.shape_cast %465 : vector<1x1x32xf32> to vector<1x32xf32>
    %cst_259 = arith.constant dense<0.000000e+00> : vector<8xf32>
    %467 = vector.multi_reduction <add>, %462, %cst_259 [1] : vector<8x32xf32> to vector<8xf32>
    %468 = vector.shape_cast %467 : vector<8xf32> to vector<8x1xf32>
    %cst_260 = arith.constant 3.200000e+01 : f32
    %469 = vector.broadcast %cst_260 : f32 to vector<8x1xf32>
    %470 = arith.divf %468, %469 : vector<8x1xf32>
    %471 = vector.broadcast %470 : vector<8x1xf32> to vector<8x32xf32>
    %472 = arith.subf %462, %471 : vector<8x32xf32>
    %473 = arith.mulf %472, %472 : vector<8x32xf32>
    %cst_261 = arith.constant dense<0.000000e+00> : vector<8xf32>
    %474 = vector.multi_reduction <add>, %473, %cst_261 [1] : vector<8x32xf32> to vector<8xf32>
    %475 = vector.shape_cast %474 : vector<8xf32> to vector<8x1xf32>
    %cst_262 = arith.constant 3.200000e+01 : f32
    %476 = vector.broadcast %cst_262 : f32 to vector<8x1xf32>
    %477 = arith.divf %475, %476 : vector<8x1xf32>
    %478 = vector.broadcast %470 : vector<8x1xf32> to vector<8x32xf32>
    %479 = arith.subf %462, %478 : vector<8x32xf32>
    %cst_263 = arith.constant 9.99999974E-6 : f32
    %480 = vector.broadcast %cst_263 : f32 to vector<8x1xf32>
    %481 = arith.addf %477, %480 : vector<8x1xf32>
    %482 = math.rsqrt %481 : vector<8x1xf32>
    %483 = vector.broadcast %482 : vector<8x1xf32> to vector<8x32xf32>
    %484 = arith.mulf %479, %483 : vector<8x32xf32>
    %485 = vector.broadcast %464 : vector<1x32xf32> to vector<8x32xf32>
    %486 = arith.mulf %484, %485 : vector<8x32xf32>
    %487 = vector.broadcast %466 : vector<1x32xf32> to vector<8x32xf32>
    %488 = arith.addf %486, %487 : vector<8x32xf32>
    %489 = arith.addf %488, %421 : vector<8x32xf32>
    %c1_264 = arith.constant 1 : index
    %c0_265 = arith.constant 0 : index
    %c0_266 = arith.constant 0 : index
    %490 = vector.load %arg29[%c1_264, %c0_265, %c0_266] : memref<2x32x64xf32, #tpu.memory_space<vmem>>, vector<1x32x64xf32>
    %491 = vector.shape_cast %490 : vector<1x32x64xf32> to vector<32x64xf32>
    %cst_267 = arith.constant dense<0.000000e+00> : vector<8x64xf32>
    %492 = tpu.matmul %489, %491, %cst_267 {dimension_numbers = #tpu.dot_dimension_numbers<[1], [0], [0], [1], [0, 0, 1, 1], [], []>} : vector<8x32xf32>, vector<32x64xf32>, vector<8x64xf32> -> vector<8x64xf32>
    %c1_268 = arith.constant 1 : index
    %c0_269 = arith.constant 0 : index
    %c0_270 = arith.constant 0 : index
    %493 = vector.load %arg30[%c1_268, %c0_269, %c0_270] : memref<2x1x64xf32, #tpu.memory_space<vmem>>, vector<1x1x64xf32>
    %494 = vector.shape_cast %493 : vector<1x1x64xf32> to vector<1x64xf32>
    %495 = vector.broadcast %494 : vector<1x64xf32> to vector<8x64xf32>
    %496 = arith.addf %492, %495 : vector<8x64xf32>
    %cst_271 = arith.constant 0.000000e+00 : f32
    %497 = vector.broadcast %cst_271 : f32 to vector<8x64xf32>
    %498 = arith.maximumf %496, %497 : vector<8x64xf32>
    %c1_272 = arith.constant 1 : index
    %c0_273 = arith.constant 0 : index
    %c0_274 = arith.constant 0 : index
    %499 = vector.load %arg31[%c1_272, %c0_273, %c0_274] : memref<2x64x32xf32, #tpu.memory_space<vmem>>, vector<1x64x32xf32>
    %500 = vector.shape_cast %499 : vector<1x64x32xf32> to vector<64x32xf32>
    %cst_275 = arith.constant dense<0.000000e+00> : vector<8x32xf32>
    %501 = tpu.matmul %498, %500, %cst_275 {dimension_numbers = #tpu.dot_dimension_numbers<[1], [0], [0], [1], [0, 0, 1, 1], [], []>} : vector<8x64xf32>, vector<64x32xf32>, vector<8x32xf32> -> vector<8x32xf32>
    %c1_276 = arith.constant 1 : index
    %c0_277 = arith.constant 0 : index
    %c0_278 = arith.constant 0 : index
    %502 = vector.load %arg32[%c1_276, %c0_277, %c0_278] : memref<2x1x32xf32, #tpu.memory_space<vmem>>, vector<1x1x32xf32>
    %503 = vector.shape_cast %502 : vector<1x1x32xf32> to vector<1x32xf32>
    %504 = vector.broadcast %503 : vector<1x32xf32> to vector<8x32xf32>
    %505 = arith.addf %501, %504 : vector<8x32xf32>
    %c0_279 = arith.constant 0 : index
    %c0_280 = arith.constant 0 : index
    %506 = vector.load %arg33[%c0_279, %c0_280] : memref<32x128xf32, #tpu.memory_space<vmem>>, vector<32x128xf32>
    %cst_281 = arith.constant dense<0.000000e+00> : vector<8x128xf32>
    %507 = tpu.matmul %505, %506, %cst_281 {dimension_numbers = #tpu.dot_dimension_numbers<[1], [0], [0], [1], [0, 0, 1, 1], [], []>} : vector<8x32xf32>, vector<32x128xf32>, vector<8x128xf32> -> vector<8x128xf32>
    %c0_282 = arith.constant 0 : index
    %c0_283 = arith.constant 0 : index
    %508 = vector.load %arg34[%c0_282, %c0_283] : memref<1x128xf32, #tpu.memory_space<vmem>>, vector<1x128xf32>
    %509 = vector.broadcast %508 : vector<1x128xf32> to vector<8x128xf32>
    %510 = arith.addf %507, %509 : vector<8x128xf32>
    %c0_284 = arith.constant 0 : index
    %c0_285 = arith.constant 0 : index
    %c0_286 = arith.constant 0 : index
    %511 = vector.load %arg35[%c0_284, %c0_285, %c0_286] : memref<1x8x128xf32, #tpu.memory_space<vmem>>, vector<1x8x128xf32>
    %512 = vector.shape_cast %511 : vector<1x8x128xf32> to vector<8x128xf32>
    %513 = vector.shape_cast %510 : vector<8x128xf32> to vector<1x8x128xf32>
    tpu.vector_store %arg35[%c0_284, %c0_285, %c0_286], %513 {strides = array<i32>} : memref<1x8x128xf32, #tpu.memory_space<vmem>>, vector<1x8x128xf32>,
    return
  }
  func.func @transform_0(%arg0: i32) -> (i32, i32, i32) {
    %c0_i32 = arith.constant 0 : i32
    %c0_i32_0 = arith.constant 0 : i32
    %c0_i32_1 = arith.constant 0 : i32
    return %arg0, %c0_i32, %c0_i32_0 : i32, i32, i32
  }
  func.func @transform_1(%arg0: i32) -> (i32, i32, i32) {
    %c0_i32 = arith.constant 0 : i32
    %c0_i32_0 = arith.constant 0 : i32
    %c0_i32_1 = arith.constant 0 : i32
    return %arg0, %c0_i32, %c0_i32_0 : i32, i32, i32
  }
  func.func @transform_2(%arg0: i32) -> (i32, i32, i32) {
    %c0_i32 = arith.constant 0 : i32
    %c0_i32_0 = arith.constant 0 : i32
    %c0_i32_1 = arith.constant 0 : i32
    %c0_i32_2 = arith.constant 0 : i32
    return %c0_i32, %c0_i32_0, %c0_i32_1 : i32, i32, i32
  }
  func.func @transform_3(%arg0: i32) -> (i32, i32, i32) {
    %c0_i32 = arith.constant 0 : i32
    %c0_i32_0 = arith.constant 0 : i32
    %c0_i32_1 = arith.constant 0 : i32
    %c0_i32_2 = arith.constant 0 : i32
    return %c0_i32, %c0_i32_0, %c0_i32_1 : i32, i32, i32
  }
  func.func @transform_4(%arg0: i32) -> (i32, i32, i32) {
    %c0_i32 = arith.constant 0 : i32
    %c0_i32_0 = arith.constant 0 : i32
    %c0_i32_1 = arith.constant 0 : i32
    %c0_i32_2 = arith.constant 0 : i32
    return %c0_i32, %c0_i32_0, %c0_i32_1 : i32, i32, i32
  }
  func.func @transform_5(%arg0: i32) -> (i32, i32, i32) {
    %c0_i32 = arith.constant 0 : i32
    %c0_i32_0 = arith.constant 0 : i32
    %c0_i32_1 = arith.constant 0 : i32
    %c0_i32_2 = arith.constant 0 : i32
    return %c0_i32, %c0_i32_0, %c0_i32_1 : i32, i32, i32
  }
  func.func @transform_6(%arg0: i32) -> (i32, i32, i32) {
    %c0_i32 = arith.constant 0 : i32
    %c0_i32_0 = arith.constant 0 : i32
    %c0_i32_1 = arith.constant 0 : i32
    %c0_i32_2 = arith.constant 0 : i32
    return %c0_i32, %c0_i32_0, %c0_i32_1 : i32, i32, i32
  }
  func.func @transform_7(%arg0: i32) -> (i32, i32, i32) {
    %c0_i32 = arith.constant 0 : i32
    %c0_i32_0 = arith.constant 0 : i32
    %c0_i32_1 = arith.constant 0 : i32
    %c0_i32_2 = arith.constant 0 : i32
    return %c0_i32, %c0_i32_0, %c0_i32_1 : i32, i32, i32
  }
  func.func @transform_8(%arg0: i32) -> (i32, i32, i32) {
    %c0_i32 = arith.constant 0 : i32
    %c0_i32_0 = arith.constant 0 : i32
    %c0_i32_1 = arith.constant 0 : i32
    %c0_i32_2 = arith.constant 0 : i32
    return %c0_i32, %c0_i32_0, %c0_i32_1 : i32, i32, i32
  }
  func.func @transform_9(%arg0: i32) -> (i32, i32, i32) {
    %c0_i32 = arith.constant 0 : i32
    %c0_i32_0 = arith.constant 0 : i32
    %c0_i32_1 = arith.constant 0 : i32
    %c0_i32_2 = arith.constant 0 : i32
    return %c0_i32, %c0_i32_0, %c0_i32_1 : i32, i32, i32
  }
  func.func @transform_10(%arg0: i32) -> (i32, i32, i32) {
    %c0_i32 = arith.constant 0 : i32
    %c0_i32_0 = arith.constant 0 : i32
    %c0_i32_1 = arith.constant 0 : i32
    %c0_i32_2 = arith.constant 0 : i32
    return %c0_i32, %c0_i32_0, %c0_i32_1 : i32, i32, i32
  }
  func.func @transform_11(%arg0: i32) -> (i32, i32, i32) {
    %c0_i32 = arith.constant 0 : i32
    %c0_i32_0 = arith.constant 0 : i32
    %c0_i32_1 = arith.constant 0 : i32
    %c0_i32_2 = arith.constant 0 : i32
    return %c0_i32, %c0_i32_0, %c0_i32_1 : i32, i32, i32
  }
  func.func @transform_12(%arg0: i32) -> (i32, i32, i32) {
    %c0_i32 = arith.constant 0 : i32
    %c0_i32_0 = arith.constant 0 : i32
    %c0_i32_1 = arith.constant 0 : i32
    %c0_i32_2 = arith.constant 0 : i32
    return %c0_i32, %c0_i32_0, %c0_i32_1 : i32, i32, i32
  }
  func.func @transform_13(%arg0: i32) -> (i32, i32, i32) {
    %c0_i32 = arith.constant 0 : i32
    %c0_i32_0 = arith.constant 0 : i32
    %c0_i32_1 = arith.constant 0 : i32
    %c0_i32_2 = arith.constant 0 : i32
    return %c0_i32, %c0_i32_0, %c0_i32_1 : i32, i32, i32
  }
  func.func @transform_14(%arg0: i32) -> (i32, i32, i32) {
    %c0_i32 = arith.constant 0 : i32
    %c0_i32_0 = arith.constant 0 : i32
    %c0_i32_1 = arith.constant 0 : i32
    %c0_i32_2 = arith.constant 0 : i32
    return %c0_i32, %c0_i32_0, %c0_i32_1 : i32, i32, i32
  }
  func.func @transform_15(%arg0: i32) -> (i32, i32, i32) {
    %c0_i32 = arith.constant 0 : i32
    %c0_i32_0 = arith.constant 0 : i32
    %c0_i32_1 = arith.constant 0 : i32
    %c0_i32_2 = arith.constant 0 : i32
    return %c0_i32, %c0_i32_0, %c0_i32_1 : i32, i32, i32
  }
  func.func @transform_16(%arg0: i32) -> (i32, i32, i32) {
    %c0_i32 = arith.constant 0 : i32
    %c0_i32_0 = arith.constant 0 : i32
    %c0_i32_1 = arith.constant 0 : i32
    %c0_i32_2 = arith.constant 0 : i32
    return %c0_i32, %c0_i32_0, %c0_i32_1 : i32, i32, i32
  }
  func.func @transform_17(%arg0: i32) -> (i32, i32, i32) {
    %c0_i32 = arith.constant 0 : i32
    %c0_i32_0 = arith.constant 0 : i32
    %c0_i32_1 = arith.constant 0 : i32
    %c0_i32_2 = arith.constant 0 : i32
    return %c0_i32, %c0_i32_0, %c0_i32_1 : i32, i32, i32
  }
  func.func @transform_18(%arg0: i32) -> (i32, i32, i32) {
    %c0_i32 = arith.constant 0 : i32
    %c0_i32_0 = arith.constant 0 : i32
    %c0_i32_1 = arith.constant 0 : i32
    %c0_i32_2 = arith.constant 0 : i32
    return %c0_i32, %c0_i32_0, %c0_i32_1 : i32, i32, i32
  }
  func.func @transform_19(%arg0: i32) -> (i32, i32, i32) {
    %c0_i32 = arith.constant 0 : i32
    %c0_i32_0 = arith.constant 0 : i32
    %c0_i32_1 = arith.constant 0 : i32
    %c0_i32_2 = arith.constant 0 : i32
    return %c0_i32, %c0_i32_0, %c0_i32_1 : i32, i32, i32
  }
  func.func @transform_20(%arg0: i32) -> (i32, i32, i32) {
    %c0_i32 = arith.constant 0 : i32
    %c0_i32_0 = arith.constant 0 : i32
    %c0_i32_1 = arith.constant 0 : i32
    %c0_i32_2 = arith.constant 0 : i32
    return %c0_i32, %c0_i32_0, %c0_i32_1 : i32, i32, i32
  }
  func.func @transform_21(%arg0: i32) -> (i32, i32, i32) {
    %c0_i32 = arith.constant 0 : i32
    %c0_i32_0 = arith.constant 0 : i32
    %c0_i32_1 = arith.constant 0 : i32
    %c0_i32_2 = arith.constant 0 : i32
    return %c0_i32, %c0_i32_0, %c0_i32_1 : i32, i32, i32
  }
  func.func @transform_22(%arg0: i32) -> (i32, i32, i32) {
    %c0_i32 = arith.constant 0 : i32
    %c0_i32_0 = arith.constant 0 : i32
    %c0_i32_1 = arith.constant 0 : i32
    %c0_i32_2 = arith.constant 0 : i32
    return %c0_i32, %c0_i32_0, %c0_i32_1 : i32, i32, i32
  }
  func.func @transform_23(%arg0: i32) -> (i32, i32, i32) {
    %c0_i32 = arith.constant 0 : i32
    %c0_i32_0 = arith.constant 0 : i32
    %c0_i32_1 = arith.constant 0 : i32
    %c0_i32_2 = arith.constant 0 : i32
    return %c0_i32, %c0_i32_0, %c0_i32_1 : i32, i32, i32
  }
  func.func @transform_24(%arg0: i32) -> (i32, i32, i32) {
    %c0_i32 = arith.constant 0 : i32
    %c0_i32_0 = arith.constant 0 : i32
    %c0_i32_1 = arith.constant 0 : i32
    %c0_i32_2 = arith.constant 0 : i32
    return %c0_i32, %c0_i32_0, %c0_i32_1 : i32, i32, i32
  }
  func.func @transform_25(%arg0: i32) -> (i32, i32, i32) {
    %c0_i32 = arith.constant 0 : i32
    %c0_i32_0 = arith.constant 0 : i32
    %c0_i32_1 = arith.constant 0 : i32
    %c0_i32_2 = arith.constant 0 : i32
    return %c0_i32, %c0_i32_0, %c0_i32_1 : i32, i32, i32
  }
  func.func @transform_26(%arg0: i32) -> (i32, i32, i32) {
    %c0_i32 = arith.constant 0 : i32
    %c0_i32_0 = arith.constant 0 : i32
    %c0_i32_1 = arith.constant 0 : i32
    %c0_i32_2 = arith.constant 0 : i32
    return %c0_i32, %c0_i32_0, %c0_i32_1 : i32, i32, i32
  }
  func.func @transform_27(%arg0: i32) -> (i32, i32, i32) {
    %c0_i32 = arith.constant 0 : i32
    %c0_i32_0 = arith.constant 0 : i32
    %c0_i32_1 = arith.constant 0 : i32
    %c0_i32_2 = arith.constant 0 : i32
    return %c0_i32, %c0_i32_0, %c0_i32_1 : i32, i32, i32
  }
  func.func @transform_28(%arg0: i32) -> (i32, i32, i32) {
    %c0_i32 = arith.constant 0 : i32
    %c0_i32_0 = arith.constant 0 : i32
    %c0_i32_1 = arith.constant 0 : i32
    %c0_i32_2 = arith.constant 0 : i32
    return %c0_i32, %c0_i32_0, %c0_i32_1 : i32, i32, i32
  }
  func.func @transform_29(%arg0: i32) -> (i32, i32, i32) {
    %c0_i32 = arith.constant 0 : i32
    %c0_i32_0 = arith.constant 0 : i32
    %c0_i32_1 = arith.constant 0 : i32
    %c0_i32_2 = arith.constant 0 : i32
    return %c0_i32, %c0_i32_0, %c0_i32_1 : i32, i32, i32
  }
  func.func @transform_30(%arg0: i32) -> (i32, i32, i32) {
    %c0_i32 = arith.constant 0 : i32
    %c0_i32_0 = arith.constant 0 : i32
    %c0_i32_1 = arith.constant 0 : i32
    %c0_i32_2 = arith.constant 0 : i32
    return %c0_i32, %c0_i32_0, %c0_i32_1 : i32, i32, i32
  }
  func.func @transform_31(%arg0: i32) -> (i32, i32, i32) {
    %c0_i32 = arith.constant 0 : i32
    %c0_i32_0 = arith.constant 0 : i32
    %c0_i32_1 = arith.constant 0 : i32
    %c0_i32_2 = arith.constant 0 : i32
    return %c0_i32, %c0_i32_0, %c0_i32_1 : i32, i32, i32
  }
  func.func @transform_32(%arg0: i32) -> (i32, i32) {
    %c0_i32 = arith.constant 0 : i32
    %c0_i32_0 = arith.constant 0 : i32
    %c0_i32_1 = arith.constant 0 : i32
    return %c0_i32, %c0_i32_0 : i32, i32
  }
  func.func @transform_33(%arg0: i32) -> (i32, i32) {
    %c0_i32 = arith.constant 0 : i32
    %c0_i32_0 = arith.constant 0 : i32
    %c0_i32_1 = arith.constant 0 : i32
    return %c0_i32, %c0_i32_0 : i32, i32
  }
  func.func @transform_34(%arg0: i32) -> (i32, i32, i32) {
    %c0_i32 = arith.constant 0 : i32
    %c0_i32_0 = arith.constant 0 : i32
    %c0_i32_1 = arith.constant 0 : i32
    return %arg0, %c0_i32, %c0_i32_0 : i32, i32, i32
  }
}

</mosaic_0001>

<bundles_post_ra>
// kernel: tpu_custom_call.1
= control target key start
LH: loop header
LB: loop body
LE: loop exit
PB: predicated region body
PF: predicated region fallthrough
CT: control target
= control target key end

     0   :  { %s13416_s6 = smov 1   ;;  %s13417_s10 = smov 2   ;;  %s14934_s0 = inlined_call_operand.smem [shape: u32[35], index: -1, kind: input, shape index: {}] }
   0x1   :  { %s13497_s5 = sld [smem:[%s14934_s0]]   ;;  %s13418_s14 = smov 3  }
   0x2   :  { %s13502_s9 = sld [smem:[%s14934_s0 + %s13416_s6]]   ;;  %s13419_s18 = smov 4  }
   0x3   :  { %s13507_s13 = sld [smem:[%s14934_s0 + %s13417_s10]]   ;;  %s13420_s22 = smov 5  }
   0x4   :  { %s13512_s17 = sld [smem:[%s14934_s0 + %s13418_s14]]   ;;  %s13421_s26 = smov 6  }
   0x5   :  { %s13517_s21 = sld [smem:[%s14934_s0 + %s13419_s18]]   ;;  %s13422_s30 = smov 7  }
   0x6   :  { %s13522_s25 = sld [smem:[%s14934_s0 + %s13420_s22]]   ;;  %s13423_s4 = smov 8  }
   0x7   :  { %15000 = sst [smem:[#allocation49_spill]] %s13497_s5  ;;  %s13424_s10 = smov 9  }
   0x8   :  { %15001 = sst [smem:[#allocation50_spill]] %s13502_s9  ;;  %s13425_s15 = smov 10  }
   0x9   :  { %15002 = sst [smem:[#allocation51_spill]] %s13507_s13  ;;  %s13426_s20 = smov 11  }
   0xa   :  { %15003 = sst [smem:[#allocation52_spill]] %s13512_s17  ;;  %s13428_s1 = smov 13  }
   0xb   :  { %15004 = sst [smem:[#allocation53_spill]] %s13517_s21  ;;  %s13429_s7 = smov 14  }
   0xc   :  { %15005 = sst [smem:[#allocation54_spill]] %s13522_s25  ;;  %s13431_s22 = smov 16  }
   0xd   :  { %s13527_s29 = sld [smem:[%s14934_s0 + %s13421_s26]]   ;;  %s13427_s26 = smov 12  }
   0xe   :  { %s13532_s3 = sld [smem:[%s14934_s0 + %s13422_s30]]   ;;  %s13432_s28 = smov 17  }
   0xf   :  { %s13537_s8 = sld [smem:[%s14934_s0 + %s13423_s4]]  }
  0x10   :  { %s13542_s14 = sld [smem:[%s14934_s0 + %s13424_s10]]  }
  0x11   :  { %s13547_s19 = sld [smem:[%s14934_s0 + %s13425_s15]]   ;;  %s13430_s15 = smov 15  }
  0x12   :  { %s13552_s24 = sld [smem:[%s14934_s0 + %s13426_s20]]  }
  0x13   :  { %15006 = sst [smem:[#allocation55_spill]] %s13527_s29 }
  0x14   :  { %15007 = sst [smem:[#allocation56_spill]] %s13532_s3 }
  0x15   :  { %15008 = sst [smem:[#allocation57_spill]] %s13537_s8 }
  0x16   :  { %15009 = sst [smem:[#allocation58_spill]] %s13542_s14 }
  0x17   :  { %15010 = sst [smem:[#allocation59_spill]] %s13547_s19 }
  0x18   :  { %s13557_s30 = sld [smem:[%s14934_s0 + %s13427_s26]]  }
  0x19   :  { %s13562_s6 = sld [smem:[%s14934_s0 + %s13428_s1]]  }
  0x1a   :  { %s13567_s12 = sld [smem:[%s14934_s0 + %s13429_s7]]   ;;  %s13433_s7 = smov 18  }
  0x1b   :  { %s13572_s20 = sld [smem:[%s14934_s0 + %s13430_s15]]   ;;  %s13434_s15 = smov 19  }
  0x1c   :  { %s13577_s27 = sld [smem:[%s14934_s0 + %s13431_s22]]   ;;  %s13435_s22 = smov 20  }
  0x1d   :  { %s13582_s4 = sld [smem:[%s14934_s0 + %s13432_s28]]   ;;  %s13436_s28 = smov 21  }
  0x1e   :  { %s13592_s19 = sld [smem:[%s14934_s0 + %s13434_s15]]   ;;  %s13438_s15 = smov 23  }
  0x1f   :  { %15011 = sst [smem:[#allocation60_spill]] %s13562_s6 }
  0x20   :  { %15012 = sst [smem:[#allocation61_spill]] %s13567_s12 }
  0x21   :  { %15013 = sst [smem:[#allocation62_spill]] %s13572_s20 }
  0x22   :  { %15014 = sst [smem:[#allocation63_spill]] %s13577_s27 }
  0x23   :  { %15015 = sst [smem:[#allocation64_spill]] %s13582_s4 }
  0x24   :  { %s13587_s12 = sld [smem:[%s14934_s0 + %s13433_s7]]   ;;  %s13437_s7 = smov 22  }
  0x25   :  { %15017 = sst [smem:[#allocation66_spill]] %s13592_s19 }
  0x26   :  { %s13597_s27 = sld [smem:[%s14934_s0 + %s13435_s22]]   ;;  %s13439_s22 = smov 24  }
  0x27   :  { %s13602_s8 = sld [smem:[%s14934_s0 + %s13436_s28]]   ;;  %s13440_s28 = smov 25  }
  0x28   :  { %s13612_s21 = sld [smem:[%s14934_s0 + %s13438_s15]]   ;;  %s13442_s15 = smov 27  }
  0x29   :  { %s13617_s17 = sld [smem:[%s14934_s0 + %s13439_s22]]   ;;  %s13443_s22 = smov 28  }
  0x2a   :  { %15016 = sst [smem:[#allocation65_spill]] %s13587_s12 }
  0x2b   :  { %s13607_s12 = sld [smem:[%s14934_s0 + %s13437_s7]]   ;;  %s13441_s7 = smov 26  }
  0x2c   :  { %15018 = sst [smem:[#allocation67_spill]] %s13597_s27 }
  0x2d   :  { %15019 = sst [smem:[#allocation68_spill]] %s13602_s8 }
  0x2e   :  { %15021 = sst [smem:[#allocation70_spill]] %s13612_s21 }
  0x2f   :  { %15022 = sst [smem:[#allocation71_spill]] %s13617_s17 }
  0x30   :  { %s13622_s13 = sld [smem:[%s14934_s0 + %s13440_s28]]   ;;  %s13444_s28 = smov 29  }
  0x31   :  { %15020 = sst [smem:[#allocation69_spill]] %s13607_s12 }
  0x32   :  { %s13627_s9 = sld [smem:[%s14934_s0 + %s13441_s7]]   ;;  %s13445_s7 = smov 30  }
  0x33   :  { %s13632_s5 = sld [smem:[%s14934_s0 + %s13442_s15]]   ;;  %s13446_s15 = smov 31  }
  0x34   :  { %s13637_s17 = sld [smem:[%s14934_s0 + %s13443_s22]]   ;;  %s13447_s22 = smov 32  }
  0x35   :  { %s13642_s12 = sld [smem:[%s14934_s0 + %s13444_s28]]   ;;  %s13448_s28 = smov 33  }
  0x36   :  { %15023 = sst [smem:[#allocation72_spill]] %s13622_s13 }
  0x37   :  { %s13652_s27 = sld [smem:[%s14934_s0 + %s13446_s15]]  }
  0x38   :  { %15024 = sst [smem:[#allocation73_spill]] %s13627_s9 }
  0x39   :  { %15025 = sst [smem:[#allocation74_spill]] %s13632_s5 }
  0x3a   :  { %15026 = sst [smem:[#allocation75_spill]] %s13637_s17 }
  0x3b   :  { %15027 = sst [smem:[#allocation76_spill]] %s13642_s12 }
  0x3c   :  { %s13647_s9 = sld [smem:[%s14934_s0 + %s13445_s7]]   ;;  %s13449_s7 = smov 34  }
  0x3d   :  { %s13657_s17 = sld [smem:[%s14934_s0 + %s13447_s22]]  }
  0x3e   :  { %s13662_s12 = sld [smem:[%s14934_s0 + %s13448_s28]]  }
  0x42   :  { %15028 = sst [smem:[#allocation77_spill]] %s13647_s9 }
  0x43   :  { %s13667_s9 = sld [smem:[%s14934_s0 + %s13449_s7]]  }
  0x44   :  { %15029 = sst [smem:[#allocation78_spill]] %s13662_s12 }
  0x49   :  { %15030 = sst [smem:[#allocation79_spill]] %s13667_s9 }
  0x4a   :  { %74 = vsyncpa [#allocation3], 0 }
  0x4b   :  { %76 = vsyncpa [#allocation3 + $0x1], 0 }
  0x4c   :  { %77 = vsyncpa [#allocation6], 0 }
  0x4d   :  { %79 = vsyncpa [#allocation6 + $0x1], 0 }
  0x4e   :  { %80 = vsyncpa [#allocation9], 0 }
  0x4f   :  { %81 = vsyncpa [#allocation12], 0 }
  0x50   :  { %82 = vsyncpa [#allocation15], 0 }
  0x51   :  { %83 = vsyncpa [#allocation18], 0 }
  0x52   :  { %84 = vsyncpa [#allocation21], 0 }
  0x53   :  { %85 = vsyncpa [#allocation24], 0 }
  0x54   :  { %86 = vsyncpa [#allocation27], 0 }
  0x55   :  { %87 = vsyncpa [#allocation30], 0 }
  0x56   :  { %88 = vsyncpa [#allocation33], 0 }
  0x57   :  { %89 = vsyncpa [#allocation4], 0 }
  0x58   :  { %91 = vsyncpa [#allocation4 + $0x1], 0  ;;  %s13669_s15 = smov 0   ;;  %s13671_s16 = smov 0  }
  0x59   :  { %s13673_s0 = smov 0   ;;  %s13675_s18 = smov 0  }
  0x5a LB: > { %s15031_s21 = sld [smem:[#allocation70_spill]]  ;;  %s15033_s19 = sld [smem:[#allocation66_spill]]  ;;  %s13414_s18 = sphi %s13675_s18, %s15111_s18   ;;  %s13410_s0 = sphi %s13673_s0, %s15110_s0   ;;  %s13406_s16 = sphi %s13671_s16, %s15109_s16   ;;  %s13402_s15 = sphi %s13669_s15, %s15108_s15  }
  0x5b   : > { %s15032_s20 = sld [smem:[#allocation62_spill]]  ;;  %s15034_s14 = sld [smem:[#allocation58_spill]] }
  0x5c   : > { %s15035_s13 = sld [smem:[#allocation72_spill]]  ;;  %s15036_s8 = sld [smem:[#allocation68_spill]] }
  0x5d   : > { %s15037_s6 = sld [smem:[#allocation60_spill]]  ;;  %s15038_s5 = sld [smem:[#allocation74_spill]] }
  0x5e   : > { %s15039_s4 = sld [smem:[#allocation64_spill]]  ;;  %s15041_s29 = sld [smem:[#allocation55_spill]] }
  0x5f   : > { %s15040_s3 = sld [smem:[#allocation56_spill]]  ;;  %s15042_s25 = sld [smem:[#allocation54_spill]] }
  0x60   : > { %s13450_s22 = smov [#allocation7]   ;;  %s13690_s26 = sadd.s32 4294967295, %s13414_s18  }
  0x61   : > { %s873_s23 = sshll.u32 %s13450_s22, 4  ;;  %p11152_p0 = scmp.ge.s32.totalorder %s13414_s18, 1  ;;  %s13695_s23 = int_to_ptr.vmem [resolvable:$true] %s873_s23 }
  0x62   : > { %p14953_p1 = scmp.eq.s32.totalorder %s13690_s26, 0  ;;  %p852_p2 = scmp.lt.s32.totalorder %s13414_s18, 3 }
  0x63   : > { %s13451_s1 = smov [#allocation8]   ;;  %s13452_s10 = smov [#allocation11]  }
  0x64   : > { %p13697_p3 = pnand %p11152_p0, %p852_p2  ;;  %s886_s2 = sshll.u32 %s13451_s1, 4  ;;  %s13710_s2 = int_to_ptr.vmem [resolvable:$true] %s886_s2 }
  0x65   : > { %s915_s11 = sshll.u32 %s13452_s10, 4  ;;  %s12712_s22 = scalar_lea.hbm %s15042_s25, 32  ;;  %s13712_s11 = int_to_ptr.vmem [resolvable:$true] %s915_s11 }
  0x66   : > { %s15043_s28 = scalar_select %p13697_p3, 1, 0 }
  0x67   : > { %p12389_p5 = pneg %p13697_p3  ;;  %p12713_p7 = scmp.ne.s32.totalorder %s15042_s25, %s12712_s22 }
  0x68   : > { %p12719_p11 = scmp.lt.u32.totalorder %s12712_s22, %s15042_s25 }
  0x69   : > { %p13706_p6 = pnand %p12389_p5, %p14953_p1 }
  0x6b   : > { %p13718_p8 = pneg %p13706_p6 }
  0x6d   : > { %p12715_p9 = pnand %p13718_p8, %p12713_p7 }
  0x6f   : > { %p12716_p10 = pneg %p12715_p9 }
  0x71   : > { %p12721_p12 = pnand %p12719_p11, %p12716_p10 }
  0x73   : > { %12724 = shalt.err (!%p12721_p12)
}
  0x74   : > { %s12725_s1 = scalar_lea.vmem %s13695_s23, 32  ;;  %p12733_p5 = scmp.lt.s32.totalorder %s13695_s23, %s13695_s23 }
  0x75   : > { %p12726_p13 = scmp.ne.s32.totalorder %s13695_s23, %s12725_s1  ;;  %p12734_p4 = scmp.lt.s32.totalorder %s12725_s1, %s12725_s1 }
  0x77   : > { %p12728_p0 = pnand %p12726_p13, %p13718_p8  ;;  %p12735_p1 = por %p12734_p4, %p12733_p5 }
  0x79   : > { %p12729_p2 = pneg %p12728_p0 }
  0x7b   : > { %p12736_p3 = pnand %p12735_p1, %p12729_p2 }
  0x7d   : > { %12739 = shalt.err (!%p12736_p3)
}
  0x7e   : > { %s14957_s10 = smov 16   ;;  %s14959_s22 = smov 1  }
  0x7f   : > { %12392 = dma.hbm_to_vmem [thread:$0]  (!%p13706_p6), %s15042_s25, 32, %s13695_s23, [#allocation6], %s14957_s10, %s14957_s10, %s14959_s22  }
  0x80   : > { %s12740_s12 = scalar_lea.hbm %s15041_s29, 32 }
  0x81   : > { %p12741_p7 = scmp.ne.s32.totalorder %s15041_s29, %s12740_s12  ;;  %p12747_p3 = scmp.lt.u32.totalorder %s12740_s12, %s15041_s29 }
  0x83   : > { %p12743_p4 = pnand %p12741_p7, %p13718_p8 }
  0x85   : > { %p12744_p1 = pneg %p12743_p4 }
  0x87   : > { %p12749_p9 = pnand %p12747_p3, %p12744_p1 }
  0x89   : > { %12752 = shalt.err (!%p12749_p9)
}
  0x8a   : > { %s12753_s1 = scalar_lea.vmem %s13710_s2, 32  ;;  %p12761_p13 = scmp.lt.s32.totalorder %s13710_s2, %s13710_s2 }
  0x8b   : > { %p12754_p10 = scmp.ne.s32.totalorder %s13710_s2, %s12753_s1  ;;  %p12762_p0 = scmp.lt.s32.totalorder %s12753_s1, %s12753_s1 }
  0x8d   : > { %p12756_p11 = pnand %p12754_p10, %p13718_p8  ;;  %p12763_p2 = por %p12762_p0, %p12761_p13 }
  0x8f   : > { %p12757_p12 = pneg %p12756_p11 }
  0x91   : > { %p12764_p5 = pnand %p12763_p2, %p12757_p12 }
  0x93   : > { %12767 = shalt.err (!%p12764_p5)
}
  0x94   : > { %12395 = dma.hbm_to_vmem [thread:$0]  (!%p13706_p6), %s15041_s29, 32, %s13710_s2, [#allocation9], %s14957_s10, %s14957_s10, %s14959_s22  }
  0x95   : > { %s12768_s12 = scalar_lea.hbm %s15034_s14, 32 }
  0x96   : > { %p12769_p7 = scmp.ne.s32.totalorder %s15034_s14, %s12768_s12  ;;  %p12775_p3 = scmp.lt.u32.totalorder %s12768_s12, %s15034_s14 }
  0x98   : > { %p12771_p4 = pnand %p12769_p7, %p13718_p8 }
  0x9a   : > { %p12772_p1 = pneg %p12771_p4 }
  0x9c   : > { %p12777_p9 = pnand %p12775_p3, %p12772_p1 }
  0x9e   : > { %12780 = shalt.err (!%p12777_p9)
}
  0x9f   : > { %s12781_s23 = scalar_lea.vmem %s13712_s11, 32  ;;  %p12789_p13 = scmp.lt.s32.totalorder %s13712_s11, %s13712_s11 }
  0xa0   : > { %p12782_p10 = scmp.ne.s32.totalorder %s13712_s11, %s12781_s23  ;;  %p12790_p0 = scmp.lt.s32.totalorder %s12781_s23, %s12781_s23 }
  0xa2   : > { %p12784_p11 = pnand %p12782_p10, %p13718_p8  ;;  %p12791_p2 = por %p12790_p0, %p12789_p13 }
  0xa4   : > { %p12785_p12 = pneg %p12784_p11 }
  0xa6   : > { %p12792_p5 = pnand %p12791_p2, %p12785_p12 }
  0xa8   : > { %12795 = shalt.err (!%p12792_p5)
}
  0xa9   : > { %12401 = dma.hbm_to_vmem [thread:$0]  (!%p13706_p6), %s15034_s14, 32, %s13712_s11, [#allocation12], %s14957_s10, %s14957_s10, %s14959_s22  }
  0xaa   : > { %s13455_s2 = smov [#allocation14]   ;;  %s13456_s12 = smov [#allocation17]  }
  0xab   : > { %s944_s1 = sshll.u32 %s13455_s2, 4  ;;  %s973_s23 = sshll.u32 %s13456_s12, 4  ;;  %s945_s1 = int_to_ptr.vmem [resolvable:$true] %s944_s1  ;;  %s974_s23 = int_to_ptr.vmem [resolvable:$true] %s973_s23 }
  0xac   : > { %s12796_s25 = scalar_lea.hbm %s13557_s30, 32 }
  0xad   : > { %p12797_p7 = scmp.ne.s32.totalorder %s13557_s30, %s12796_s25  ;;  %p12803_p3 = scmp.lt.u32.totalorder %s12796_s25, %s13557_s30 }
  0xaf   : > { %p12799_p4 = pnand %p12797_p7, %p13718_p8 }
  0xb1   : > { %p12800_p1 = pneg %p12799_p4 }
  0xb3   : > { %p12805_p9 = pnand %p12803_p3, %p12800_p1 }
  0xb5   : > { %12808 = shalt.err (!%p12805_p9)
}
  0xb6   : > { %s12809_s29 = scalar_lea.vmem %s945_s1, 32  ;;  %p12817_p13 = scmp.lt.s32.totalorder %s945_s1, %s945_s1 }
  0xb7   : > { %p12810_p10 = scmp.ne.s32.totalorder %s945_s1, %s12809_s29  ;;  %p12818_p0 = scmp.lt.s32.totalorder %s12809_s29, %s12809_s29 }
  0xb9   : > { %p12812_p11 = pnand %p12810_p10, %p13718_p8  ;;  %p12819_p2 = por %p12818_p0, %p12817_p13 }
  0xbb   : > { %p12813_p12 = pneg %p12812_p11 }
  0xbd   : > { %p12820_p5 = pnand %p12819_p2, %p12813_p12 }
  0xbf   : > { %12823 = shalt.err (!%p12820_p5)
}
  0xc0   : > { %12407 = dma.hbm_to_vmem [thread:$0]  (!%p13706_p6), %s13557_s30, 32, %s945_s1, [#allocation15], %s14957_s10, %s14957_s10, %s14959_s22  }
  0xc1   : > { %s12824_s25 = scalar_lea.hbm %s15032_s20, 32 }
  0xc2   : > { %p12825_p7 = scmp.ne.s32.totalorder %s15032_s20, %s12824_s25  ;;  %p12831_p3 = scmp.lt.u32.totalorder %s12824_s25, %s15032_s20 }
  0xc4   : > { %p12827_p4 = pnand %p12825_p7, %p13718_p8 }
  0xc6   : > { %p12828_p1 = pneg %p12827_p4 }
  0xc8   : > { %p12833_p9 = pnand %p12831_p3, %p12828_p1 }
  0xca   : > { %12836 = shalt.err (!%p12833_p9)
}
  0xcb   : > { %s12837_s29 = scalar_lea.vmem %s974_s23, 32  ;;  %p12845_p13 = scmp.lt.s32.totalorder %s974_s23, %s974_s23 }
  0xcc   : > { %p12838_p10 = scmp.ne.s32.totalorder %s974_s23, %s12837_s29  ;;  %p12846_p0 = scmp.lt.s32.totalorder %s12837_s29, %s12837_s29 }
  0xce   : > { %p12840_p11 = pnand %p12838_p10, %p13718_p8  ;;  %p12847_p2 = por %p12846_p0, %p12845_p13 }
  0xd0   : > { %p12841_p12 = pneg %p12840_p11 }
  0xd2   : > { %p12848_p5 = pnand %p12847_p2, %p12841_p12 }
  0xd4   : > { %12851 = shalt.err (!%p12848_p5)
}
  0xd5   : > { %12413 = dma.hbm_to_vmem [thread:$0]  (!%p13706_p6), %s15032_s20, 32, %s974_s23, [#allocation18], %s14957_s10, %s14957_s10, %s14959_s22  }
  0xd6   : > { %s13457_s11 = smov [#allocation20]   ;;  %s13458_s1 = smov [#allocation23]  }
  0xd7   : > { %s1005_s2 = sshll.u32 %s13457_s11, 4  ;;  %s1031_s12 = sshll.u32 %s13458_s1, 4  ;;  %s1006_s2 = int_to_ptr.vmem [resolvable:$true] %s1005_s2  ;;  %s1032_s12 = int_to_ptr.vmem [resolvable:$true] %s1031_s12 }
  0xd8   : > { %s12852_s25 = scalar_lea.hbm %s15033_s19, 32 }
  0xd9   : > { %p12853_p7 = scmp.ne.s32.totalorder %s15033_s19, %s12852_s25  ;;  %p12859_p3 = scmp.lt.u32.totalorder %s12852_s25, %s15033_s19 }
  0xdb   : > { %p12855_p4 = pnand %p12853_p7, %p13718_p8 }
  0xdd   : > { %p12856_p1 = pneg %p12855_p4 }
  0xdf   : > { %p12861_p9 = pnand %p12859_p3, %p12856_p1 }
  0xe1   : > { %12864 = shalt.err (!%p12861_p9)
}
  0xe2   : > { %s12865_s29 = scalar_lea.vmem %s1006_s2, 32  ;;  %p12873_p13 = scmp.lt.s32.totalorder %s1006_s2, %s1006_s2 }
  0xe3   : > { %p12866_p10 = scmp.ne.s32.totalorder %s1006_s2, %s12865_s29  ;;  %p12874_p0 = scmp.lt.s32.totalorder %s12865_s29, %s12865_s29 }
  0xe5   : > { %p12868_p11 = pnand %p12866_p10, %p13718_p8  ;;  %p12875_p2 = por %p12874_p0, %p12873_p13 }
  0xe7   : > { %p12869_p12 = pneg %p12868_p11 }
  0xe9   : > { %p12876_p5 = pnand %p12875_p2, %p12869_p12 }
  0xeb   : > { %12879 = shalt.err (!%p12876_p5)
}
  0xec   : > { %12419 = dma.hbm_to_vmem [thread:$0]  (!%p13706_p6), %s15033_s19, 32, %s1006_s2, [#allocation21], %s14957_s10, %s14957_s10, %s14959_s22  }
  0xed   : > { %s12880_s23 = scalar_lea.hbm %s15036_s8, 32 }
  0xee   : > { %p12881_p7 = scmp.ne.s32.totalorder %s15036_s8, %s12880_s23  ;;  %p12887_p3 = scmp.lt.u32.totalorder %s12880_s23, %s15036_s8 }
  0xf0   : > { %p12883_p4 = pnand %p12881_p7, %p13718_p8 }
  0xf2   : > { %p12884_p1 = pneg %p12883_p4 }
  0xf4   : > { %p12889_p9 = pnand %p12887_p3, %p12884_p1 }
  0xf6   : > { %12892 = shalt.err (!%p12889_p9)
}
  0xf7   : > { %s12893_s11 = scalar_lea.vmem %s1032_s12, 32  ;;  %p12901_p13 = scmp.lt.s32.totalorder %s1032_s12, %s1032_s12 }
  0xf8   : > { %p12894_p10 = scmp.ne.s32.totalorder %s1032_s12, %s12893_s11  ;;  %p12902_p0 = scmp.lt.s32.totalorder %s12893_s11, %s12893_s11 }
  0xfa   : > { %p12896_p11 = pnand %p12894_p10, %p13718_p8  ;;  %p12903_p2 = por %p12902_p0, %p12901_p13 }
  0xfc   : > { %p12897_p12 = pneg %p12896_p11 }
  0xfe   : > { %p12904_p5 = pnand %p12903_p2, %p12897_p12 }
 0x100   : > { %12907 = shalt.err (!%p12904_p5)
}
 0x101   : > { %12425 = dma.hbm_to_vmem [thread:$0]  (!%p13706_p6), %s15036_s8, 32, %s1032_s12, [#allocation24], %s14957_s10, %s14957_s10, %s14959_s22  }
 0x102   : > { %s13459_s2 = smov [#allocation26]   ;;  %s13460_s25 = smov [#allocation29]  }
 0x103   : > { %s1057_s1 = sshll.u32 %s13459_s2, 4  ;;  %s1083_s29 = sshll.u32 %s13460_s25, 4  ;;  %s1058_s1 = int_to_ptr.vmem [resolvable:$true] %s1057_s1  ;;  %s1084_s29 = int_to_ptr.vmem [resolvable:$true] %s1083_s29 }
 0x104   : > { %s12908_s23 = scalar_lea.hbm %s15031_s21, 32 }
 0x105   : > { %p12909_p7 = scmp.ne.s32.totalorder %s15031_s21, %s12908_s23  ;;  %p12915_p3 = scmp.lt.u32.totalorder %s12908_s23, %s15031_s21 }
 0x107   : > { %p12911_p4 = pnand %p12909_p7, %p13718_p8 }
 0x109   : > { %p12912_p1 = pneg %p12911_p4 }
 0x10b   : > { %p12917_p9 = pnand %p12915_p3, %p12912_p1 }
 0x10d   : > { %12920 = shalt.err (!%p12917_p9)
}
 0x10e   : > { %s12921_s11 = scalar_lea.vmem %s1058_s1, 32  ;;  %p12929_p13 = scmp.lt.s32.totalorder %s1058_s1, %s1058_s1 }
 0x10f   : > { %p12922_p10 = scmp.ne.s32.totalorder %s1058_s1, %s12921_s11  ;;  %p12930_p0 = scmp.lt.s32.totalorder %s12921_s11, %s12921_s11 }
 0x111   : > { %p12924_p11 = pnand %p12922_p10, %p13718_p8  ;;  %p12931_p2 = por %p12930_p0, %p12929_p13 }
 0x113   : > { %p12925_p12 = pneg %p12924_p11 }
 0x115   : > { %p12932_p5 = pnand %p12931_p2, %p12925_p12 }
 0x117   : > { %12935 = shalt.err (!%p12932_p5)
}
 0x118   : > { %12431 = dma.hbm_to_vmem [thread:$0]  (!%p13706_p6), %s15031_s21, 32, %s1058_s1, [#allocation27], %s14957_s10, %s14957_s10, %s14959_s22  }
 0x119   : > { %s12936_s12 = scalar_lea.hbm %s15035_s13, 32 }
 0x11a   : > { %p12937_p7 = scmp.ne.s32.totalorder %s15035_s13, %s12936_s12  ;;  %p12943_p3 = scmp.lt.u32.totalorder %s12936_s12, %s15035_s13 }
 0x11c   : > { %p12939_p4 = pnand %p12937_p7, %p13718_p8 }
 0x11e   : > { %p12940_p1 = pneg %p12939_p4 }
 0x120   : > { %p12945_p9 = pnand %p12943_p3, %p12940_p1 }
 0x122   : > { %12948 = shalt.err (!%p12945_p9)
}
 0x123   : > { %s12949_s2 = scalar_lea.vmem %s1084_s29, 32  ;;  %p12957_p13 = scmp.lt.s32.totalorder %s1084_s29, %s1084_s29 }
 0x124   : > { %p12950_p10 = scmp.ne.s32.totalorder %s1084_s29, %s12949_s2  ;;  %p12958_p0 = scmp.lt.s32.totalorder %s12949_s2, %s12949_s2 }
 0x126   : > { %p12952_p11 = pnand %p12950_p10, %p13718_p8  ;;  %p12959_p2 = por %p12958_p0, %p12957_p13 }
 0x128   : > { %p12953_p12 = pneg %p12952_p11 }
 0x12a   : > { %p12960_p5 = pnand %p12959_p2, %p12953_p12 }
 0x12c   : > { %12963 = shalt.err (!%p12960_p5)
}
 0x12d   : > { %12437 = dma.hbm_to_vmem [thread:$0]  (!%p13706_p6), %s15035_s13, 32, %s1084_s29, [#allocation30], %s14957_s10, %s14957_s10, %s14959_s22  }
 0x12e   : > { %s13461_s1 = smov [#allocation32]   ;;  %s13462_s23 = smov [#allocation10]  }
 0x12f   : > { %s1109_s25 = sshll.u32 %s13461_s1, 4  ;;  %s899_s11 = sshll.u32 %s13462_s23, 4  ;;  %s1110_s25 = int_to_ptr.vmem [resolvable:$true] %s1109_s25  ;;  %s900_s11 = int_to_ptr.vmem [resolvable:$true] %s899_s11 }
 0x130   : > { %s12964_s12 = scalar_lea.hbm %s15038_s5, 32 }
 0x131   : > { %p12965_p7 = scmp.ne.s32.totalorder %s15038_s5, %s12964_s12  ;;  %p12971_p3 = scmp.lt.u32.totalorder %s12964_s12, %s15038_s5 }
 0x133   : > { %p12967_p4 = pnand %p12965_p7, %p13718_p8 }
 0x135   : > { %p12968_p1 = pneg %p12967_p4 }
 0x137   : > { %p12973_p9 = pnand %p12971_p3, %p12968_p1 }
 0x139   : > { %12976 = shalt.err (!%p12973_p9)
}
 0x13a   : > { %s12977_s2 = scalar_lea.vmem %s1110_s25, 32  ;;  %p12985_p13 = scmp.lt.s32.totalorder %s1110_s25, %s1110_s25 }
 0x13b   : > { %p12978_p10 = scmp.ne.s32.totalorder %s1110_s25, %s12977_s2  ;;  %p12986_p0 = scmp.lt.s32.totalorder %s12977_s2, %s12977_s2 }
 0x13d   : > { %p12980_p11 = pnand %p12978_p10, %p13718_p8  ;;  %p12987_p2 = por %p12986_p0, %p12985_p13 }
 0x13f   : > { %p12981_p12 = pneg %p12980_p11 }
 0x141   : > { %p12988_p5 = pnand %p12987_p2, %p12981_p12 }
 0x143   : > { %12991 = shalt.err (!%p12988_p5)
}
 0x144   : > { %12443 = dma.hbm_to_vmem [thread:$0]  (!%p13706_p6), %s15038_s5, 32, %s1110_s25, [#allocation33], %s14957_s10, %s14957_s10, %s14959_s22  }
 0x145   : > { %s12992_s29 = scalar_lea.hbm %s15040_s3, 32 }
 0x146   : > { %p12993_p7 = scmp.ne.s32.totalorder %s15040_s3, %s12992_s29  ;;  %p12999_p3 = scmp.lt.u32.totalorder %s12992_s29, %s15040_s3 }
 0x148   : > { %p12995_p4 = pnand %p12993_p7, %p13718_p8 }
 0x14a   : > { %p12996_p1 = pneg %p12995_p4 }
 0x14c   : > { %p13001_p9 = pnand %p12999_p3, %p12996_p1 }
 0x14e   : > { %13004 = shalt.err (!%p13001_p9)
}
 0x14f   : > { %s13005_s1 = scalar_lea.vmem %s900_s11, 32  ;;  %p13013_p13 = scmp.lt.s32.totalorder %s900_s11, %s900_s11 }
 0x150   : > { %p13006_p10 = scmp.ne.s32.totalorder %s900_s11, %s13005_s1  ;;  %p13014_p0 = scmp.lt.s32.totalorder %s13005_s1, %s13005_s1 }
 0x152   : > { %p13008_p11 = pnand %p13006_p10, %p13718_p8  ;;  %p13015_p2 = por %p13014_p0, %p13013_p13 }
 0x154   : > { %p13009_p12 = pneg %p13008_p11 }
 0x156   : > { %p13016_p5 = pnand %p13015_p2, %p13009_p12 }
 0x158   : > { %13019 = shalt.err (!%p13016_p5)
}
 0x159   : > { %12398 = dma.hbm_to_vmem [thread:$0]  (!%p13706_p6), %s15040_s3, 32, %s900_s11, [#allocation9], %s14957_s10, %s14957_s10, %s14959_s22  }
 0x15a   : > { %s13463_s25 = smov [#allocation13]   ;;  %s13464_s12 = smov [#allocation16]  }
 0x15b   : > { %s931_s23 = sshll.u32 %s13463_s25, 4  ;;  %s957_s2 = sshll.u32 %s13464_s12, 4  ;;  %s932_s23 = int_to_ptr.vmem [resolvable:$true] %s931_s23  ;;  %s958_s2 = int_to_ptr.vmem [resolvable:$true] %s957_s2 }
 0x15c   : > { %s13020_s29 = scalar_lea.hbm %s13552_s24, 32 }
 0x15d   : > { %p13021_p7 = scmp.ne.s32.totalorder %s13552_s24, %s13020_s29  ;;  %p13027_p3 = scmp.lt.u32.totalorder %s13020_s29, %s13552_s24 }
 0x15f   : > { %p13023_p4 = pnand %p13021_p7, %p13718_p8 }
 0x161   : > { %p13024_p1 = pneg %p13023_p4 }
 0x163   : > { %p13029_p9 = pnand %p13027_p3, %p13024_p1 }
 0x165   : > { %13032 = shalt.err (!%p13029_p9)
}
 0x166   : > { %s13033_s1 = scalar_lea.vmem %s932_s23, 32  ;;  %p13041_p13 = scmp.lt.s32.totalorder %s932_s23, %s932_s23 }
 0x167   : > { %p13034_p10 = scmp.ne.s32.totalorder %s932_s23, %s13033_s1  ;;  %p13042_p0 = scmp.lt.s32.totalorder %s13033_s1, %s13033_s1 }
 0x169   : > { %p13036_p11 = pnand %p13034_p10, %p13718_p8  ;;  %p13043_p2 = por %p13042_p0, %p13041_p13 }
 0x16b   : > { %p13037_p12 = pneg %p13036_p11 }
 0x16d   : > { %p13044_p5 = pnand %p13043_p2, %p13037_p12 }
 0x16f   : > { %13047 = shalt.err (!%p13044_p5)
}
 0x170   : > { %12404 = dma.hbm_to_vmem [thread:$0]  (!%p13706_p6), %s13552_s24, 32, %s932_s23, [#allocation12], %s14957_s10, %s14957_s10, %s14959_s22  }
 0x171   : > { %s13048_s11 = scalar_lea.hbm %s15037_s6, 32 }
 0x172   : > { %p13049_p7 = scmp.ne.s32.totalorder %s15037_s6, %s13048_s11  ;;  %p13055_p3 = scmp.lt.u32.totalorder %s13048_s11, %s15037_s6 }
 0x174   : > { %p13051_p4 = pnand %p13049_p7, %p13718_p8 }
 0x176   : > { %p13052_p1 = pneg %p13051_p4 }
 0x178   : > { %p13057_p9 = pnand %p13055_p3, %p13052_p1 }
 0x17a   : > { %13060 = shalt.err (!%p13057_p9)
}
 0x17b   : > { %s13061_s25 = scalar_lea.vmem %s958_s2, 32  ;;  %p13069_p13 = scmp.lt.s32.totalorder %s958_s2, %s958_s2 }
 0x17c   : > { %p13062_p10 = scmp.ne.s32.totalorder %s958_s2, %s13061_s25  ;;  %p13070_p0 = scmp.lt.s32.totalorder %s13061_s25, %s13061_s25 }
 0x17e   : > { %p13064_p11 = pnand %p13062_p10, %p13718_p8  ;;  %p13071_p2 = por %p13070_p0, %p13069_p13 }
 0x180   : > { %p13065_p12 = pneg %p13064_p11 }
 0x182   : > { %p13072_p5 = pnand %p13071_p2, %p13065_p12 }
 0x184   : > { %13075 = shalt.err (!%p13072_p5)
}
 0x185   : > { %12410 = dma.hbm_to_vmem [thread:$0]  (!%p13706_p6), %s15037_s6, 32, %s958_s2, [#allocation15], %s14957_s10, %s14957_s10, %s14959_s22  }
 0x186   : > { %s13465_s23 = smov [#allocation19]   ;;  %s13466_s29 = smov [#allocation22]  }
 0x187   : > { %s989_s12 = sshll.u32 %s13465_s23, 4  ;;  %s1018_s1 = sshll.u32 %s13466_s29, 4  ;;  %s990_s12 = int_to_ptr.vmem [resolvable:$true] %s989_s12  ;;  %s1019_s1 = int_to_ptr.vmem [resolvable:$true] %s1018_s1 }
 0x188   : > { %s13076_s11 = scalar_lea.hbm %s15039_s4, 32 }
 0x189   : > { %p13077_p7 = scmp.ne.s32.totalorder %s15039_s4, %s13076_s11  ;;  %p13083_p3 = scmp.lt.u32.totalorder %s13076_s11, %s15039_s4 }
 0x18b   : > { %p13079_p4 = pnand %p13077_p7, %p13718_p8 }
 0x18d   : > { %p13080_p1 = pneg %p13079_p4 }
 0x18f   : > { %p13085_p9 = pnand %p13083_p3, %p13080_p1 }
 0x191   : > { %13088 = shalt.err (!%p13085_p9)
}
 0x192   : > { %s13089_s25 = scalar_lea.vmem %s990_s12, 32  ;;  %p13097_p13 = scmp.lt.s32.totalorder %s990_s12, %s990_s12 }
 0x193   : > { %p13090_p10 = scmp.ne.s32.totalorder %s990_s12, %s13089_s25  ;;  %p13098_p0 = scmp.lt.s32.totalorder %s13089_s25, %s13089_s25 }
 0x195   : > { %p13092_p11 = pnand %p13090_p10, %p13718_p8  ;;  %p13099_p2 = por %p13098_p0, %p13097_p13 }
 0x197   : > { %p13093_p12 = pneg %p13092_p11 }
 0x199   : > { %p13100_p5 = pnand %p13099_p2, %p13093_p12 }
 0x19b   : > { %13103 = shalt.err (!%p13100_p5)
}
 0x19c   : > { %s15046_s2 = sld [smem:[#allocation67_spill]] }
 0x19d   : > { %12416 = dma.hbm_to_vmem [thread:$0]  (!%p13706_p6), %s15039_s4, 32, %s990_s12, [#allocation18], %s14957_s10, %s14957_s10, %s14959_s22  }
 0x1a2   : > { %s13104_s23 = scalar_lea.hbm %s15046_s2, 1024 }
 0x1a3   : > { %p13105_p7 = scmp.ne.s32.totalorder %s15046_s2, %s13104_s23  ;;  %p13111_p3 = scmp.lt.u32.totalorder %s13104_s23, %s15046_s2 }
 0x1a5   : > { %p13107_p4 = pnand %p13105_p7, %p13718_p8 }
 0x1a7   : > { %p13108_p1 = pneg %p13107_p4 }
 0x1a9   : > { %p13113_p9 = pnand %p13111_p3, %p13108_p1 }
 0x1ab   : > { %13116 = shalt.err (!%p13113_p9)
}
 0x1ac   : > { %s13117_s29 = scalar_lea.vmem %s1019_s1, 1024  ;;  %p13125_p13 = scmp.lt.s32.totalorder %s1019_s1, %s1019_s1 }
 0x1ad   : > { %p13118_p10 = scmp.ne.s32.totalorder %s1019_s1, %s13117_s29  ;;  %p13126_p0 = scmp.lt.s32.totalorder %s13117_s29, %s13117_s29 }
 0x1af   : > { %p13120_p11 = pnand %p13118_p10, %p13718_p8  ;;  %p13127_p2 = por %p13126_p0, %p13125_p13 }
 0x1b1   : > { %p13121_p12 = pneg %p13120_p11 }
 0x1b3   : > { %p13128_p5 = pnand %p13127_p2, %p13121_p12 }
 0x1b5   : > { %13131 = shalt.err (!%p13128_p5)
}
 0x1b6   : > { %s14963_s12 = smov 128   ;;  %s15047_s11 = sld [smem:[#allocation69_spill]] }
 0x1b7   : > { %s14964_s25 = smov 8   ;;  %s13469_s23 = smov [#allocation25]  }
 0x1b8   : > { %12422 = dma.hbm_to_vmem [thread:$0]  (!%p13706_p6), %s15046_s2, 1024, %s1019_s1, [#allocation21], %s14963_s12, %s14963_s12, %s14964_s25  }
 0x1b9   : > { %s1044_s10 = sshll.u32 %s13469_s23, 4  ;;  %s13470_s29 = smov [#allocation28]   ;;  %s1045_s10 = int_to_ptr.vmem [resolvable:$true] %s1044_s10 }
 0x1ba   : > { %s1070_s22 = sshll.u32 %s13470_s29, 4  ;;  %s1071_s22 = int_to_ptr.vmem [resolvable:$true] %s1070_s22 }
 0x1bc   : > { %s13132_s3 = scalar_lea.hbm %s15047_s11, 1024 }
 0x1bd   : > { %p13133_p7 = scmp.ne.s32.totalorder %s15047_s11, %s13132_s3  ;;  %p13139_p3 = scmp.lt.u32.totalorder %s13132_s3, %s15047_s11 }
 0x1bf   : > { %p13135_p4 = pnand %p13133_p7, %p13718_p8 }
 0x1c1   : > { %p13136_p1 = pneg %p13135_p4 }
 0x1c3   : > { %p13141_p9 = pnand %p13139_p3, %p13136_p1 }
 0x1c5   : > { %13144 = shalt.err (!%p13141_p9)
}
 0x1c6   : > { %s13145_s4 = scalar_lea.vmem %s1045_s10, 1024  ;;  %p13153_p13 = scmp.lt.s32.totalorder %s1045_s10, %s1045_s10 }
 0x1c7   : > { %p13146_p10 = scmp.ne.s32.totalorder %s1045_s10, %s13145_s4  ;;  %p13154_p0 = scmp.lt.s32.totalorder %s13145_s4, %s13145_s4 }
 0x1c9   : > { %p13148_p11 = pnand %p13146_p10, %p13718_p8  ;;  %p13155_p2 = por %p13154_p0, %p13153_p13 }
 0x1cb   : > { %p13149_p12 = pneg %p13148_p11 }
 0x1cd   : > { %p13156_p5 = pnand %p13155_p2, %p13149_p12 }
 0x1cf   : > { %13159 = shalt.err (!%p13156_p5)
}
 0x1d0   : > { %s15048_s3 = sld [smem:[#allocation71_spill]] }
 0x1d1   : > { %12428 = dma.hbm_to_vmem [thread:$0]  (!%p13706_p6), %s15047_s11, 1024, %s1045_s10, [#allocation24], %s14963_s12, %s14963_s12, %s14964_s25  }
 0x1d6   : > { %s13160_s1 = scalar_lea.hbm %s15048_s3, 32 }
 0x1d7   : > { %p13161_p7 = scmp.ne.s32.totalorder %s15048_s3, %s13160_s1  ;;  %p13167_p3 = scmp.lt.u32.totalorder %s13160_s1, %s15048_s3 }
 0x1d9   : > { %p13163_p4 = pnand %p13161_p7, %p13718_p8 }
 0x1db   : > { %p13164_p1 = pneg %p13163_p4 }
 0x1dd   : > { %p13169_p9 = pnand %p13167_p3, %p13164_p1 }
 0x1df   : > { %13172 = shalt.err (!%p13169_p9)
}
 0x1e0   : > { %s13173_s4 = scalar_lea.vmem %s1071_s22, 32  ;;  %p13181_p13 = scmp.lt.s32.totalorder %s1071_s22, %s1071_s22 }
 0x1e1   : > { %p13174_p10 = scmp.ne.s32.totalorder %s1071_s22, %s13173_s4  ;;  %p13182_p0 = scmp.lt.s32.totalorder %s13173_s4, %s13173_s4 }
 0x1e3   : > { %p13176_p11 = pnand %p13174_p10, %p13718_p8  ;;  %p13183_p2 = por %p13182_p0, %p13181_p13 }
 0x1e5   : > { %p13177_p12 = pneg %p13176_p11 }
 0x1e7   : > { %p13184_p5 = pnand %p13183_p2, %p13177_p12 }
 0x1e9   : > { %13187 = shalt.err (!%p13184_p5)
}
 0x1ea   : > { %s15049_s10 = smov 1   ;;  %s15050_s23 = smov 16  }
 0x1eb   : > { %s15051_s29 = sld [smem:[#allocation73_spill]]  ;;  %s13471_s1 = smov [#allocation31]  }
 0x1ec   : > { %12434 = dma.hbm_to_vmem [thread:$0]  (!%p13706_p6), %s15048_s3, 32, %s1071_s22, [#allocation27], %s15050_s23, %s15050_s23, %s15049_s10  }
 0x1ed   : > { %s1096_s12 = sshll.u32 %s13471_s1, 4  ;;  %s13472_s25 = smov [#allocation34]   ;;  %s1097_s12 = int_to_ptr.vmem [resolvable:$true] %s1096_s12 }
 0x1ee   : > { %s1122_s2 = sshll.u32 %s13472_s25, 4  ;;  %s1123_s2 = int_to_ptr.vmem [resolvable:$true] %s1122_s2 }
 0x1f1   : > { %s13188_s4 = scalar_lea.hbm %s15051_s29, 32 }
 0x1f2   : > { %p13189_p7 = scmp.ne.s32.totalorder %s15051_s29, %s13188_s4  ;;  %p13195_p3 = scmp.lt.u32.totalorder %s13188_s4, %s15051_s29 }
 0x1f4   : > { %p13191_p4 = pnand %p13189_p7, %p13718_p8 }
 0x1f6   : > { %p13192_p1 = pneg %p13191_p4 }
 0x1f8   : > { %p13197_p9 = pnand %p13195_p3, %p13192_p1 }
 0x1fa   : > { %13200 = shalt.err (!%p13197_p9)
}
 0x1fb   : > { %s13201_s5 = scalar_lea.vmem %s1097_s12, 32  ;;  %p13209_p13 = scmp.lt.s32.totalorder %s1097_s12, %s1097_s12 }
 0x1fc   : > { %p13202_p10 = scmp.ne.s32.totalorder %s1097_s12, %s13201_s5  ;;  %p13210_p0 = scmp.lt.s32.totalorder %s13201_s5, %s13201_s5 }
 0x1fe   : > { %p13204_p11 = pnand %p13202_p10, %p13718_p8  ;;  %p13211_p2 = por %p13210_p0, %p13209_p13 }
 0x200   : > { %p13205_p12 = pneg %p13204_p11 }
 0x202   : > { %p13212_p5 = pnand %p13211_p2, %p13205_p12 }
 0x204   : > { %13215 = shalt.err (!%p13212_p5)
}
 0x205   : > { %s15052_s22 = sld [smem:[#allocation75_spill]] }
 0x206   : > { %12440 = dma.hbm_to_vmem [thread:$0]  (!%p13706_p6), %s15051_s29, 32, %s1097_s12, [#allocation30], %s15050_s23, %s15050_s23, %s15049_s10  }
 0x20b   : > { %s13216_s25 = scalar_lea.hbm %s15052_s22, 1024 }
 0x20c   : > { %p13217_p7 = scmp.ne.s32.totalorder %s15052_s22, %s13216_s25  ;;  %p13223_p3 = scmp.lt.u32.totalorder %s13216_s25, %s15052_s22 }
 0x20e   : > { %p13219_p4 = pnand %p13217_p7, %p13718_p8 }
 0x210   : > { %p13220_p1 = pneg %p13219_p4 }
 0x212   : > { %p13225_p9 = pnand %p13223_p3, %p13220_p1 }
 0x214   : > { %13228 = shalt.err (!%p13225_p9)
}
 0x215   : > { %s13229_s5 = scalar_lea.vmem %s1123_s2, 1024  ;;  %p13237_p13 = scmp.lt.s32.totalorder %s1123_s2, %s1123_s2 }
 0x216   : > { %p13230_p10 = scmp.ne.s32.totalorder %s1123_s2, %s13229_s5  ;;  %p13238_p0 = scmp.lt.s32.totalorder %s13229_s5, %s13229_s5 }
 0x218   : > { %p13232_p11 = pnand %p13230_p10, %p13718_p8  ;;  %p13239_p2 = por %p13238_p0, %p13237_p13 }
 0x21a   : > { %p13233_p12 = pneg %p13232_p11 }
 0x21c   : > { %p13240_p5 = pnand %p13239_p2, %p13233_p12 }
 0x21e   : > { %13243 = shalt.err (!%p13240_p5)
}
 0x21f   : > { %s15053_s12 = smov 8   ;;  %s15054_s10 = smov 128  }
 0x220   : > { %12446 = dma.hbm_to_vmem [thread:$0]  (!%p13706_p6), %s15052_s22, 1024, %s1123_s2, [#allocation33], %s15054_s10, %s15054_s10, %s15053_s12  }
 0x221   : > { %s11151_s9 = sadd.s32 4294967294, %s13414_s18   ;;  %s13984_s7 = sadd.s32 1, %s13414_s18  }
 0x222   : > { %s104_s23 = sadd.s32 1, %s13410_s0  ;;  %s101_s1 = ssub.s32 %s13414_s18, %s13984_s7 }
 0x223   : > { %s15055_s4 = sld [smem:[#allocation49_spill]]  ;;  %p111_p8 = scmp.ne.s32.totalorder %s13410_s0, %s13406_s16 }
 0x224   : > { %p102_p7 = scmp.eq.s32.totalorder %s101_s1, 0  ;;  %p112_p4 = scmp.eq.s32.totalorder %s13414_s18, 0 }
 0x225   : > { %p117_p1 = scmp.ne.s32.totalorder %s13406_s16, %s13402_s15  ;;  %p839_p3 = scmp.eq.s32.totalorder %s13690_s26, 1 }
 0x226   : > { %s15056_s25 = sld [smem:[#allocation50_spill]]  ;;  %p113_p9 = por %p112_p4, %p111_p8 }
 0x227   : > { %s13996_s5 = scalar_select %p102_p7, %s13410_s0, %s104_s23  }
 0x228   : > { %p15057_p10 = scmp.eq.s32.totalorder %s13690_s26, 0  ;;  %p14004_p11 = por %p839_p3, %p111_p8 }
 0x229   : > { %p845_p12 = scmp.eq.s32.totalorder %s11151_s9, 1  ;;  %p12477_p13 = scmp.lt.s32.totalorder %s13414_s18, 2 }
 0x22a   : > { %p14000_p6 = por %p15057_p10, %p117_p1  ;;  %s1151_s10 = sand.u32 1, %s13410_s0  }
 0x22b   : > { %s15059_s12 = scalar_select %p14004_p11, 1, 0 }
 0x22c   : > { %s15058_s2 = scalar_select %p14000_p6, 1, 0 }
 0x22d   : > { %p14010_p0 = por %p845_p12, %p117_p1  ;;  %s14014_s23 = sshll.u32 %s1151_s10, 3 }
 0x22e   : > { %s11174_s3 = sshll.u32 %s13414_s18, 7  ;;  %s1155_s8 = scalar_lea.vmem [#allocation2], %s14014_s23 }
 0x22f   : > { %s15060_s1 = scalar_select %p14010_p0, 1, 0 }
 0x230   : > { %s14018_s6 = scalar_lea.hbm %s15055_s4, %s11174_s3  ;;  %s1162_s9 = sshll.u32 %s1155_s8, 4  ;;  %s14025_s9 = int_to_ptr.vmem [resolvable:$true] %s1162_s9 }
 0x231   : > { %p14021_p2 = pnand %p12477_p13, %p113_p9  ;;  %s14028_s13 = scalar_lea.hbm %s15056_s25, %s11174_s3 }
 0x232   : > { %s1152_s14 = scalar_lea.sflag [#allocation3], %s1151_s10  ;;  %s13244_s19 = scalar_lea.hbm %s14018_s6, 128 }
 0x233   : > { %p13245_p5 = scmp.ne.s32.totalorder %s14018_s6, %s13244_s19  ;;  %p13246_p8 = pneg %p14021_p2 }
 0x234   : > { %s13249_s8 = scalar_lea.hbm %s15055_s4, 256  ;;  %p13250_p1 = scmp.lt.u32.totalorder %s14018_s6, %s15055_s4 }
 0x235   : > { %p13247_p7 = pnand %p13246_p8, %p13245_p5  ;;  %p13251_p3 = scmp.lt.u32.totalorder %s13249_s8, %s13244_s19 }
 0x236   : > { %p13253_p10 = scmp.lt.u32.totalorder %s13244_s19, %s14018_s6 }
 0x237   : > { %p13248_p4 = pneg %p13247_p7  ;;  %p13252_p9 = por %p13251_p3, %p13250_p1 }
 0x239   : > { %p13254_p12 = por %p13253_p10, %p13252_p9 }
 0x23b   : > { %p13255_p13 = pnand %p13254_p12, %p13248_p4 }
 0x23d   : > { %13258 = shalt.err (!%p13255_p13)
}
 0x23e   : > { %s13259_s3 = scalar_lea.vmem %s14025_s9, 128  ;;  %s13473_s10 = smov [#allocation2]  }
 0x23f   : > { %p13260_p0 = scmp.ne.s32.totalorder %s14025_s9, %s13259_s3  ;;  %s13264_s20 = sshll.u32 %s13473_s10, 4  ;;  %s13265_s20 = int_to_ptr.vmem [resolvable:$false] %s13264_s20 }
 0x240   : > { %s13266_s4 = scalar_lea.vmem %s13265_s20, 256  ;;  %p13267_p5 = scmp.lt.s32.totalorder %s14025_s9, %s13265_s20 }
 0x241   : > { %p13262_p11 = pnand %p13260_p0, %p13246_p8  ;;  %p13268_p7 = scmp.lt.s32.totalorder %s13266_s4, %s13259_s3 }
 0x243   : > { %p13263_p6 = pneg %p13262_p11  ;;  %p13269_p1 = por %p13268_p7, %p13267_p5 }
 0x245   : > { %p13270_p3 = pnand %p13269_p1, %p13263_p6 }
 0x247   : > { %13273 = shalt.err (!%p13270_p3)
}
 0x248   : > { %12450 = dma.hbm_to_vmem [thread:$0]  (!%p14021_p2), %s14018_s6, 128, %s14025_s9, %s1152_s14  }
 0x249   : > { %s1169_s19 = sand.u32 1, %s13414_s18   ;;  %s1173_s20 = scalar_lea.vmem [#allocation5], %s14014_s23 }
 0x24a   : > { %s1180_s4 = sshll.u32 %s1173_s20, 4  ;;  %s1170_s8 = scalar_lea.sflag [#allocation6], %s1169_s19  ;;  %s1181_s4 = int_to_ptr.vmem [resolvable:$true] %s1180_s4 }
 0x24b   : > { %s13274_s3 = scalar_lea.hbm %s14028_s13, 128  ;;  %s13279_s10 = scalar_lea.hbm %s15056_s25, 256 }
 0x24c   : > { %p13275_p6 = scmp.ne.s32.totalorder %s14028_s13, %s13274_s3  ;;  %p13280_p4 = scmp.lt.u32.totalorder %s14028_s13, %s15056_s25 }
 0x24d   : > { %p13281_p9 = scmp.lt.u32.totalorder %s13279_s10, %s13274_s3  ;;  %p13283_p12 = scmp.lt.u32.totalorder %s13274_s3, %s14028_s13 }
 0x24e   : > { %p13277_p11 = pnand %p13275_p6, %p13246_p8 }
 0x24f   : > { %p13282_p10 = por %p13281_p9, %p13280_p4 }
 0x250   : > { %p13278_p0 = pneg %p13277_p11 }
 0x251   : > { %p13284_p13 = por %p13283_p12, %p13282_p10 }
 0x253   : > { %p13285_p5 = pnand %p13284_p13, %p13278_p0 }
 0x255   : > { %13288 = shalt.err (!%p13285_p5)
}
 0x256   : > { %s13289_s14 = scalar_lea.vmem %s1181_s4, 128  ;;  %s13474_s6 = smov [#allocation5]  }
 0x257   : > { %p13290_p7 = scmp.ne.s32.totalorder %s1181_s4, %s13289_s14  ;;  %s13294_s23 = sshll.u32 %s13474_s6, 4  ;;  %s13295_s23 = int_to_ptr.vmem [resolvable:$false] %s13294_s23 }
 0x258   : > { %s13296_s9 = scalar_lea.vmem %s13295_s23, 256  ;;  %p13297_p6 = scmp.lt.s32.totalorder %s1181_s4, %s13295_s23 }
 0x259   : > { %p13292_p1 = pnand %p13290_p7, %p13246_p8  ;;  %p13298_p11 = scmp.lt.s32.totalorder %s13296_s9, %s13289_s14 }
 0x25b   : > { %p13293_p3 = pneg %p13292_p1  ;;  %p13299_p4 = por %p13298_p11, %p13297_p6 }
 0x25d   : > { %p13300_p9 = pnand %p13299_p4, %p13293_p3 }
 0x25f   : > { %13303 = shalt.err (!%p13300_p9)
}
 0x260   : > { %12453 = dma.hbm_to_vmem [thread:$0]  (!%p14021_p2), %s14028_s13, 128, %s1181_s4, %s1170_s8  }
 0x261   : > { %p15062_p0 = scmp.ne.s32.totalorder %s15043_s28, 0 }
 0x262   : > { %s14071_s19 = sand.u32 (!%p15062_p0), 1, %s13406_s16   ;;  %p15063_p8 = scmp.ne.s32.totalorder (!%p15062_p0), %s15058_s2, 0 }
 0x263   : > { %1189 = sbr.rel (%p15062_p0) target bundleno = 15005 (0x3a9d), region = 156  ;;  %s14074_s20 = sshll.u32 (!%p15062_p0), %s14071_s19, 3 }
 0x264   : > { %s1192_s3 = scalar_lea.sflag (!%p15062_p0), [#allocation3], %s14071_s19  ;;  %s1195_s10 = scalar_lea.vmem (!%p15062_p0), [#allocation2], %s14074_s20 }
 0x26a   : > { %13349 = dma.done.wait (%p15063_p8), %s1192_s3, 128  }
 0x26b   : > { %13351 = vsyncadd (%p15063_p8), %s1192_s3, 4294967168  ;;  %s1200_s13 = sand.u32 1, %s13690_s26  }
 0x26c   : > { %s1201_s28 = scalar_lea.sflag [#allocation6], %s1200_s13 }
 0x26d   : > { %13353 = dma.done.wait (%p15063_p8), %s1201_s28, 128  }
 0x26e   : > { %13355 = vsyncadd (%p15063_p8), %s1201_s28, 4294967168  ;;  %p15064_p2 = scmp.eq.s32.totalorder %s13690_s26, 0 }
 0x270   : > { %13357 = dma.done.wait (%p15064_p2), [#allocation6], 32   ;;  %p15065_p10 = pmov %p15064_p2 }
 0x271   : > { %p15066_p12 = pmov %p15064_p2 }
 0x272   : > { %13359 = vsyncadd (%p15065_p10), [#allocation6], 4294967264 }
 0x273   : > { %13361 = dma.done.wait (%p15066_p12), [#allocation9], 64   ;;  %p15067_p13 = pmov %p15064_p2 }
 0x274   : > { %p15068_p5 = pmov %p15064_p2 }
 0x275   : > { %13363 = vsyncadd (%p15067_p13), [#allocation9], 4294967232 }
 0x276   : > { %13365 = dma.done.wait (%p15068_p5), [#allocation12], 64   ;;  %p15069_p7 = pmov %p15064_p2 }
 0x277   : > { %p15070_p1 = pmov %p15064_p2 }
 0x278   : > { %13367 = vsyncadd (%p15069_p7), [#allocation12], 4294967232 }
 0x279   : > { %13369 = dma.done.wait (%p15070_p1), [#allocation15], 64   ;;  %p15071_p3 = pmov %p15070_p1 }
 0x27a   : > { %p15072_p6 = pmov %p15070_p1 }
 0x27b   : > { %13371 = vsyncadd (%p15071_p3), [#allocation15], 4294967232 }
 0x27c   : > { %13373 = dma.done.wait (%p15072_p6), [#allocation18], 64   ;;  %p15073_p11 = pmov %p15070_p1 }
 0x27d   : > { %p15074_p4 = pmov %p15070_p1 }
 0x27e   : > { %13375 = vsyncadd (%p15073_p11), [#allocation18], 4294967232 }
 0x27f   : > { %13377 = dma.done.wait (%p15074_p4), [#allocation21], 1056   ;;  %p15075_p9 = pmov %p15070_p1 }
 0x280   : > { %p15076_p0 = pmov %p15070_p1 }
 0x281   : > { %13379 = vsyncadd (%p15075_p9), [#allocation21], 4294966240 }
 0x282   : > { %13381 = dma.done.wait (%p15076_p0), [#allocation24], 1056   ;;  %p15077_p8 = pmov %p15076_p0 }
 0x283   : > { %p15078_p2 = pmov %p15076_p0 }
 0x284   : > { %13383 = vsyncadd (%p15077_p8), [#allocation24], 4294966240 }
 0x285   : > { %13385 = dma.done.wait (%p15078_p2), [#allocation27], 64   ;;  %p15079_p10 = pmov %p15076_p0 }
 0x286   : > { %p15080_p12 = pmov %p15076_p0 }
 0x287   : > { %13387 = vsyncadd (%p15079_p10), [#allocation27], 4294967232 }
 0x288   : > { %13389 = dma.done.wait (%p15080_p12), [#allocation30], 64   ;;  %p15081_p13 = pmov %p15076_p0 }
 0x289   : > { %p15082_p5 = pmov %p15076_p0 }
 0x28a   : > { %13391 = vsyncadd (%p15081_p13), [#allocation30], 4294967232 }
 0x28b   : > { %13393 = dma.done.wait (%p15082_p5), [#allocation33], 1056   ;;  %p15083_p7 = pmov %p15076_p0 }
 0x28c   : > { %s15084_s2 = sld [smem:[#allocation51_spill]]  ;;  %v13475_v0 = vmov 0.0|0.0   ;;  %vm13476_vm0 = vmmov 0   ;;  %v13477_v1 = vmov 0.0   ;;  %s15085_s4 = sld [smem:[#allocation52_spill]]  ;;  %v14141_v8 = vld [vmem:[%s1195_s10] sm:$0xff] }
 0x28d   : > { %13395 = vsyncadd (%p15083_p7), [#allocation33], 4294966240  ;;  %12145 = vmatprep.subr.bf16.mxu0 %v13475_v0  ;;  %11628 = vmatprep.mubr.msk.f32.mxu0 %vm13476_vm0, %v13477_v1  ;;  %vm1382_vm1 = vcmask 261120   ;;  %s14988_s8 = smov 104   ;;  %s14990_s14 = smov 120   ;;  %vm1603_vm2 = vcmask 64512  }
 0x28e   : > { %11636 = vmatprep.subr.mxu1 %v13477_v1  ;;  %11638 = vmatprep.mubr.msk.f32.mxu1 %vm13476_vm0, %v13477_v1  ;;  %s14986_s6 = smov 96   ;;  %s14992_s23 = smov 112   ;;  %vm2661_vm3 = vcmask 130048   ;;  %vm2663_vm4 = vcmask 195584   ;;  %vm2880_vm5 = vcmask 523264  }
 0x28f   : > { %s14980_s9 = smov 64   ;;  %s15086_s3 = sld [smem:[#allocation53_spill]] }
 0x290   : > { %s14984_s10 = smov 16   ;;  %s14982_s13 = smov 8  }
 0x291   : > { %s14978_s28 = smov 24   ;;  %s15087_s11 = sld [smem:[#allocation57_spill]] }
 0x292   : > { %v1371_v2 = vld [vmem:[%s15084_s2] sm:$0xff]  ;;  %v1372_v3 = vld [vmem:[%s15084_s2 + $0x8] sm:$0xff]  ;;  %v1373_v4 = vld [vmem:[%s15084_s2 + $0x10] sm:$0xff]  ;;  %s15101_s21 = sld [smem:[#allocation77_spill]]  ;;  %s15102_s22 = sld [smem:[#allocation76_spill]] }
 0x293   : > { %v12146_v5 = vpack.c.bf16 %v1372_v3, %v1371_v2  ;;  %v1374_v6 = vld [vmem:[%s15084_s2 + $0x18] sm:$0xff]  ;;  %v11200_v9 = vld [vmem:[%s15085_s4] ss:$0 sm:$0xff]  ;;  %p15105_p3 = scmp.ne.s32.totalorder %s15059_s12, 0 }
 0x294   : > { %v12149_v7 = vpack.c.bf16 %v1374_v6, %v1373_v4 }
 0x295   : > { %12147 = vmatpush3.bf16.msra.mxu0 %v12146_v5 }
 0x296   : > { %12148 = vmatprep.subr.bf16.mxu0 %v13475_v0 }
 0x299   : > { %12150 = vmatpush3.bf16.msra.mxu0 %v12149_v7 }
 0x29a   : > { %11631 = vmatprep.subr.mxu0 %v13477_v1 }
 0x29c   : > { %11629 = vmatmul.mubr.msk.f32.vlgmr.msra.gmra.mrb[0].mxu0 %vm1382_vm1, %v14141_v8 }
 0x29d   : > { %11633 = vmatprep.mubr.msk.f32.mxu0 %vm13476_vm0, %v13477_v1 }
 0x36f   : > { %v1452_v10 = vpop.f32.mrb[0].mxu0 }
 0x370   : > { %v14149_v11 = vadd.f32 %v11200_v9, %v1452_v10  ;;  %v11630_v12 = vpop.f32.mrb[1].mxu0 }
 0x372   : > { %1461 = vrot.lane.b32.xlu1 %v14149_v11, %s14988_s8  ;;  %1457 = vrot.lane.b32.xlu0 %v14149_v11, %s14990_s14 }
 0x376   : > { %1463 = vrot.lane.b32.xlu1 %v14149_v11, %s14986_s6  ;;  %1459 = vrot.lane.b32.xlu0 %v14149_v11, %s14992_s23 }
 0x3e4   : > { %v1458_v13 = vpop.permute.xlu0 %1457  ;;  %v1462_v14 = vpop.permute.xlu1 %1461 }
 0x3e5   : > { %1465 = vrot.lane.b32.xlu0 %v1458_v13, %s14986_s6 }
 0x3e8   : > { %v1460_v15 = vpop.permute.xlu0 %1459  ;;  %v1464_v16 = vpop.permute.xlu1 %1463 }
 0x3e9   : > { %1469 = vrot.lane.b32.xlu0 %v1462_v14, %s14986_s6  ;;  %1467 = vrot.lane.b32.xlu1 %v1460_v15, %s14986_s6 }
 0x412   : > { %1475 = vxpose.xlu1.b32.start.end [1/1] (short) (narrow) %v1464_v16, 8 }
 0x457   : > { %v1466_v17 = vpop.permute.xlu0 %1465 }
 0x458   : > { %1507 = vxpose.xlu0.b32.start.end [1/1] (short) (narrow) %v1466_v17, 8 }
 0x45b   : > { %v1468_v18 = vpop.permute.xlu1 %1467  ;;  %v1470_v19 = vpop.permute.xlu0 %1469 }
 0x45c   : > { %1539 = vxpose.xlu0.b32.start.end [1/1] (short) (narrow) %v1468_v18, 8 }
 0x460   : > { %1571 = vxpose.xlu0.b32.start.end [1/1] (short) (narrow) %v1470_v19, 8 }
 0x492   : > { %v1491_v20 = vpop.trf.xlu1 }
 0x493   : > { %11632 = vmatpush3.msra.mxu0 %v1491_v20 }
 0x494   : > { %11634 = vmatmul.mubr.msk.f32.vlgmr.msra.gmra.mrb[2].mxu0 %vm1603_vm2, %v14149_v11  ;;  %11646 = vmatprep.subr.mxu0 %v13477_v1 }
 0x495   : > { %11648 = vmatprep.mubr.msk.f32.mxu0 %vm13476_vm0, %v13477_v1 }
 0x4d8   : > { %v1523_v21 = vpop.trf.xlu0 }
 0x4d9   : > { %11637 = vmatpush3.msra.mxu1 %v1523_v21 }
 0x4da   : > { %11639 = vmatmul.mubr.msk.f32.vlgmr.msra.gmra.mrb[0].mxu1 %vm1603_vm2, %v1458_v13  ;;  %11641 = vmatprep.subr.mxu1 %v13477_v1 }
 0x4db   : > { %11643 = vmatprep.mubr.msk.f32.mxu1 %vm13476_vm0, %v13477_v1 }
 0x4dc   : > { %v1555_v22 = vpop.trf.xlu0 }
 0x4dd   : > { %11642 = vmatpush3.msra.mxu1 %v1555_v22 }
 0x4de   : > { %11644 = vmatmul.mubr.msk.f32.vlgmr.msra.gmra.mrb[2].mxu1 %vm1603_vm2, %v1460_v15  ;;  %11651 = vmatprep.subr.mxu1 %v13477_v1 }
 0x4df   : > { %11653 = vmatprep.mubr.msk.f32.mxu1 %vm13476_vm0, %v13477_v1 }
 0x4e0   : > { %v1587_v23 = vpop.trf.xlu0 }
 0x4e1   : > { %11647 = vmatpush3.msra.mxu0 %v1587_v23 }
 0x4e2   : > { %11649 = vmatmul.mubr.msk.f32.vlgmr.msra.gmra.mrb[4].mxu0 %vm1603_vm2, %v1462_v14  ;;  %11656 = vmatprep.subr.mxu0 %v13477_v1 }
 0x4e3   : > { %11658 = vmatprep.mubr.msk.f32.mxu0 %vm13476_vm0, %v13477_v1 }
 0x567   : > { %v1672_v24 = vpop.f32.mrb[2].mxu0 }
 0x568   : > { %v1892_v25 = vmul.f32 0.35355338, %v1672_v24  ;;  %v11635_v26 = vpop.f32.mrb[3].mxu0 }
 0x56a   : > { %v1896_v27 = vsel %vm1603_vm2, %v1892_v25, -inf }
 0x56b   : > { %1897 = vmax.xlane.f32.xlu1 %v1896_v27  ;;  %v2665_v27 = vld [vmem:[%s15086_s3] sm:$0xff] }
 0x5ad   : > { %v1744_v28 = vpop.f32.mrb[0].mxu1 }
 0x5ae   : > { %v1893_v29 = vmul.f32 0.35355338, %v1744_v28  ;;  %v11640_v30 = vpop.f32.mrb[1].mxu1  ;;  %v2666_v28 = vld [vmem:[%s15086_s3 + $0x8] sm:$0xff] }
 0x5b0   : > { %v1899_v31 = vsel %vm1603_vm2, %v1893_v29, -inf }
 0x5b1   : > { %1900 = vmax.xlane.f32.xlu0 %v1899_v31  ;;  %v1816_v32 = vpop.f32.mrb[2].mxu1  ;;  %v13483_v31 = vmov 1983009808  }
 0x5b2   : > { %v1894_v33 = vmul.f32 0.35355338, %v1816_v32  ;;  %v11645_v34 = vpop.f32.mrb[3].mxu1  ;;  %v2515_v32 = vunpack.c.l.s4 %v13483_v31 }
 0x5b3   : > { %v13484_v34 = vmov 1934713408  }
 0x5b4   : > { %v1902_v35 = vsel %vm1603_vm2, %v1894_v33, -inf }
 0x5b5   : > { %1903 = vmax.xlane.f32.xlu1 %v1902_v35  ;;  %v1888_v36 = vpop.f32.mrb[4].mxu0  ;;  %v2547_v35 = vunpack.c.l.s4 %v13484_v34 }
 0x5b6   : > { %v1895_v37 = vmul.f32 0.35355338, %v1888_v36  ;;  %v11650_v38 = vpop.f32.mrb[5].mxu0  ;;  %v2516_v36 = vunpack.c.0.s8 %v2515_v32 }
 0x5b8   : > { %v1905_v39 = vsel %vm1603_vm2, %v1895_v37, -inf }
 0x5b9   : > { %1906 = vmax.xlane.f32.xlu1 %v1905_v39 }
 0x5c7   : > { %1940 = vrot.lane.b32.xlu0 %v14149_v11, %s14980_s9 }
 0x5ca   : > { %1942 = vrot.lane.b32.xlu1 %v1458_v13, %s14980_s9 }
 0x5cb   : > { %1946 = vrot.lane.b32.xlu0 %v1462_v14, %s14980_s9 }
 0x5ce   : > { %1944 = vrot.lane.b32.xlu1 %v1460_v15, %s14980_s9 }
 0x5f8   : > { %v1898_v40 = vpop.xlane.xlu1 %1897 }
 0x5f9   : > { %v1908_v41 = vsub.f32 %v1892_v25, %v1898_v40  ;;  %v2548_v40 = vunpack.c.0.s8 %v2547_v35 }
 0x5fb   : > { %v1912_v42 = vmul.f32 1.442695, %v1908_v41 }
 0x5fd   : > { %12600 = vpow2.f32 %v1912_v42 }
 0x607   : > { %v12601_v43 = vpop.eup %12600 }
 0x608   : > { %v1920_v44 = vsel %vm1603_vm2, %v12601_v43, 0.0 }
 0x609   : > { %1921 = vadd.xlane.f32.xlu1 %v1920_v44 }
 0x63e   : > { %v1901_v45 = vpop.xlane.xlu0 %1900 }
 0x63f   : > { %v1909_v46 = vsub.f32 %v1893_v29, %v1901_v45  ;;  %v12152_v29 = vpack.c.bf16 %v2666_v28, %v2665_v27  ;;  %v11216_v28 = vld [vmem:[#allocation7] ss:$0 sm:$0xff] }
 0x641   : > { %v1914_v47 = vmul.f32 1.442695, %v1909_v46 }
 0x642   : > { %v1904_v48 = vpop.xlane.xlu1 %1903  ;;  %v1941_v61 = vpop.permute.xlu0 %1940 }
 0x643   : > { %12602 = vpow2.f32 %v1914_v47  ;;  %v1910_v49 = vsub.f32 %v1894_v33, %v1904_v48  ;;  %v2517_v33 = vlaneseq }
 0x645   : > { %v1916_v50 = vmul.f32 1.442695, %v1910_v49 }
 0x646   : > { %v1907_v51 = vpop.xlane.xlu1 %1906  ;;  %v1947_v63 = vpop.permute.xlu0 %1946 }
 0x647   : > { %12604 = vpow2.f32 %v1916_v50  ;;  %v1911_v52 = vsub.f32 %v1895_v37, %v1907_v51  ;;  %v2518_v37 = vshrl.u32 %v2517_v33, 7 }
 0x649   : > { %v1918_v53 = vmul.f32 1.442695, %v1911_v52  ;;  %v14215_v41 = vsub.s32 %v2516_v36, %v2518_v37  ;;  %v14217_v47 = vsub.s32 %v2548_v40, %v2518_v37  ;;  %v2781_v40 = vld [vmem:[%s15087_s11 + $0x8] sm:$0xff] }
 0x64a   : > { %v1943_v60 = vpop.permute.xlu1 %1942 }
 0x64b   : > { %12606 = vpow2.f32 %v1918_v53 }
 0x64d   : > { %v12603_v54 = vpop.eup %12602 }
 0x64e   : > { %v1923_v55 = vsel %vm1603_vm2, %v12603_v54, 0.0  ;;  %v1945_v62 = vpop.permute.xlu1 %1944 }
 0x64f   : > { %1924 = vadd.xlane.f32.xlu0 %v1923_v55 }
 0x651   : > { %v12605_v56 = vpop.eup %12604 }
 0x652   : > { %v1926_v57 = vsel %vm1603_vm2, %v12605_v56, 0.0 }
 0x653   : > { %1927 = vadd.xlane.f32.xlu0 %v1926_v57  ;;  %v2668_v57 = vld [vmem:[%s15086_s3 + $0x18] sm:$0xff] }
 0x655   : > { %v12607_v58 = vpop.eup %12606 }
 0x656   : > { %v1929_v59 = vsel %vm1603_vm2, %v12607_v58, 0.0 }
 0x657   : > { %1930 = vadd.xlane.f32.xlu1 %v1929_v59 }
 0x680   : > { %1952 = vxpose.xlu0.b32.start.end [1/1] (short) (narrow) %v1941_v61, 8 }
 0x684   : > { %2016 = vxpose.xlu0.b32.start.end [1/1] (short) (narrow) %v1945_v62, 8 }
 0x688   : > { %2048 = vxpose.xlu0.b32.start.end [1/1] (short) (narrow) %v1947_v63, 8 }
 0x68a   : > { %1984 = vxpose.xlu1.b32.start.end [1/1] (short) (narrow) %v1943_v60, 8 }
 0x696   : > { %v1922_v2 = vpop.xlane.xlu1 %1921 }
 0x697   : > { %12608 = vrcp.f32 %v1922_v2 }
 0x6a1   : > { %v12609_v3 = vpop.eup %12608 }
 0x6a2   : > { %v1933_v4 = vmul.f32 %v12609_v3, %v12601_v43 }
 0x6a4   : > { %11652 = vmatpush3.xpose.msk.msra.mxu1 %vm1603_vm2, %v1933_v4 }
 0x6a5   : > { %11661 = vmatprep.subr.mxu1 %v13477_v1 }
 0x6dc   : > { %v1925_v5 = vpop.xlane.xlu0 %1924 }
 0x6dd   : > { %12610 = vrcp.f32 %v1925_v5 }
 0x6e0   : > { %v1928_v9 = vpop.xlane.xlu0 %1927 }
 0x6e1   : > { %12612 = vrcp.f32 %v1928_v9 }
 0x6e4   : > { %v1931_v10 = vpop.xlane.xlu1 %1930 }
 0x6e5   : > { %12614 = vrcp.f32 %v1931_v10 }
 0x6e7   : > { %v12611_v6 = vpop.eup %12610 }
 0x6e8   : > { %v1935_v7 = vmul.f32 %v12611_v6, %v12603_v54 }
 0x6ea   : > { %11657 = vmatpush3.xpose.msk.msra.mxu0 %vm1603_vm2, %v1935_v7 }
 0x6eb   : > { %11666 = vmatprep.subr.mxu0 %v13477_v1  ;;  %v12613_v11 = vpop.eup %12612 }
 0x6ec   : > { %v1937_v13 = vmul.f32 %v12613_v11, %v12605_v56  ;;  %v2667_v56 = vld [vmem:[%s15086_s3 + $0x10] sm:$0xff] }
 0x6ed   : > { %v12155_v62 = vpack.c.bf16 %v2668_v57, %v2667_v56 }
 0x6ef   : > { %v12615_v15 = vpop.eup %12614 }
 0x6f0   : > { %v1939_v17 = vmul.f32 %v12615_v15, %v12607_v58 }
 0x700   : > { %v1968_v12 = vpop.trf.xlu0 }
 0x701   : > { %11654 = vmatmul.mubr.msk.f32.vlgmr.msra.gmra.mrb[4].mxu1 %vm1603_vm2, %v1968_v12 }
 0x702   : > { %11662 = vmatpush3.xpose.msk.msra.mxu1 %vm1603_vm2, %v1937_v13  ;;  %11663 = vmatprep.mubr.msk.f32.mxu1 %vm13476_vm0, %v13477_v1 }
 0x703   : > { %12151 = vmatprep.subr.bf16.mxu1 %v13475_v0 }
 0x704   : > { %v2032_v14 = vpop.trf.xlu0 }
 0x705   : > { %11664 = vmatmul.mubr.msk.f32.vlgmr.msra.gmra.mrb[6].mxu1 %vm1603_vm2, %v2032_v14 }
 0x706   : > { %11679 = vmatprep.mubr.msk.f32.mxu1 %vm13476_vm0, %v13477_v1  ;;  %12153 = vmatpush3.bf16.msra.mxu1 %v12152_v29 }
 0x707   : > { %12154 = vmatprep.subr.bf16.mxu1 %v13475_v0 }
 0x708   : > { %v2064_v18 = vpop.trf.xlu0 }
 0x70a   : > { %v2000_v16 = vpop.trf.xlu1  ;;  %12156 = vmatpush3.bf16.msra.mxu1 %v12155_v62 }
 0x70b   : > { %11659 = vmatmul.mubr.msk.f32.vlgmr.msra.gmra.mrb[6].mxu0 %vm1603_vm2, %v2000_v16  ;;  %12163 = vmatprep.subr.bf16.mxu1 %v13475_v0 }
 0x70c   : > { %11667 = vmatpush3.xpose.msk.msra.mxu0 %vm1603_vm2, %v1939_v17  ;;  %11668 = vmatprep.mubr.msk.f32.mxu0 %vm13476_vm0, %v13477_v1 }
 0x70d   : > { %12157 = vmatprep.subr.bf16.mxu0 %v13475_v0 }
 0x70f   : > { %11669 = vmatmul.mubr.msk.f32.vlgmr.msra.gmra.mrb[8].mxu0 %vm1603_vm2, %v2064_v18 }
 0x710   : > { %11690 = vmatprep.mubr.msk.f32.mxu0 %vm13476_vm0, %v13477_v1 }
 0x7d4   : > { %v2152_v19 = vpop.f32.mrb[4].mxu1 }
 0x7d5   : > { %v11655_v20 = vpop.f32.mrb[5].mxu1  ;;  %2384 = vxpose.xlu1.b32.start.end [1/1] (short) (narrow) %v2152_v19, 8 }
 0x7d8   : > { %v2304_v21 = vpop.f32.mrb[6].mxu1 }
 0x7d9   : > { %v11665_v22 = vpop.f32.mrb[7].mxu1  ;;  %2448 = vxpose.xlu1.b32.start.end [1/1] (short) (narrow) %v2304_v21, 8 }
 0x7de   : > { %v2228_v23 = vpop.f32.mrb[6].mxu0 }
 0x7df   : > { %2416 = vxpose.xlu0.b32.start.end [1/1] (short) (narrow) %v2228_v23, 8  ;;  %v11660_v24 = vpop.f32.mrb[7].mxu0 }
 0x7e2   : > { %v2380_v25 = vpop.f32.mrb[8].mxu0 }
 0x7e3   : > { %2480 = vxpose.xlu0.b32.start.end [1/1] (short) (narrow) %v2380_v25, 8  ;;  %v11670_v26 = vpop.f32.mrb[9].mxu0 }
 0x855   : > { %v2400_v30 = vpop.trf.xlu1 }
 0x859   : > { %v2464_v38 = vpop.trf.xlu1 }
 0x85a   : > { %v2512_v42 = vcombine.low %v2400_v30, %v2464_v38  ;;  %v2513_v43 = vcombine.high %v2400_v30, %v2464_v38 }
 0x85c   : > { %v2520_v48 = vrot.slane %v2512_v42, %v14215_v41  ;;  %v2527_v49 = vrot.slane %v2513_v43, %v14215_v41  ;;  %v2783_v43 = vld [vmem:[%s15087_s11 + $0x18] sm:$0xff] }
 0x85f   : > { %v2432_v39 = vpop.trf.xlu0 }
 0x863   : > { %v2496_v44 = vpop.trf.xlu0 }
 0x864   : > { %v2528_v45 = vcombine.low %v2432_v39, %v2496_v44  ;;  %v2529_v46 = vcombine.high %v2432_v39, %v2496_v44  ;;  %v2780_v39 = vld [vmem:[%s15087_s11] sm:$0xff] }
 0x865   : > { %v12158_v42 = vpack.c.bf16 %v2781_v40, %v2780_v39 }
 0x866   : > { %v2536_v50 = vrot.slane %v2528_v45, %v14215_v41  ;;  %v2543_v51 = vrot.slane %v2529_v46, %v14215_v41 }
 0x867   : > { %12159 = vmatpush3.bf16.msra.mxu0 %v12158_v42 }
 0x868   : > { %v2544_v52 = vcombine.low %v2520_v48, %v2536_v50  ;;  %v2545_v53 = vcombine.high %v2520_v48, %v2536_v50  ;;  %v2560_v54 = vcombine.low %v2527_v49, %v2543_v51  ;;  %v2561_v55 = vcombine.high %v2527_v49, %v2543_v51  ;;  %12160 = vmatprep.subr.bf16.mxu0 %v13475_v0 }
 0x86a   : > { %v2552_v58 = vrot.slane %v2544_v52, %v14217_v47  ;;  %v2559_v59 = vrot.slane %v2545_v53, %v14217_v47  ;;  %v2568_v60 = vrot.slane %v2560_v54, %v14217_v47  ;;  %v2575_v61 = vrot.slane %v2561_v55, %v14217_v47 }
 0x86c   : > { %v2580_v63 = vcombine.low %v2552_v58, %v2559_v59  ;;  %v11214_v2 = vcombine.high %v2552_v58, %v2559_v59  ;;  %v2596_v3 = vcombine.low %v2568_v60, %v2575_v61  ;;  %v11215_v4 = vcombine.high %v2568_v60, %v2575_v61  ;;  %v11218_v59 = vld [vmem:[#allocation8] ss:$0 sm:$0xff]  ;;  %v11219_v61 = vld [vmem:[#allocation10] ss:$0 sm:$0xff] }
 0x86e   : > { %v2587_v5 = vrot.slane %v2580_v63, %v14215_v41  ;;  %v2595_v6 = vrot.slane %v11214_v2, %v14215_v41  ;;  %v2603_v7 = vrot.slane %v2596_v3, %v14215_v41  ;;  %v2611_v9 = vrot.slane %v11215_v4, %v14215_v41 }
 0x870   : > { %v2613_v10 = vcombine.high %v2587_v5, %v2595_v6  ;;  %v2629_v11 = vcombine.high %v2603_v7, %v2611_v9  ;;  %v2612_v12 = vcombine.low %v2587_v5, %v2595_v6  ;;  %v2628_v13 = vcombine.low %v2603_v7, %v2611_v9  ;;  %v11220_v5 = vld [vmem:[#allocation11] ss:$0 sm:$0xff] }
 0x872   : > { %v2627_v14 = vrot.slane %v2613_v10, %v14217_v47  ;;  %v2643_v15 = vrot.slane %v2629_v11, %v14217_v47  ;;  %v2620_v16 = vrot.slane %v2612_v12, %v14217_v47  ;;  %v2636_v17 = vrot.slane %v2628_v13, %v14217_v47  ;;  %v11222_v11 = vld [vmem:[#allocation13] ss:$0 sm:$0xff] }
 0x874   : > { %v2646_v18 = vcombine.low %v2627_v14, %v2643_v15  ;;  %v2645_v19 = vcombine.high %v2620_v16, %v2636_v17  ;;  %v2644_v20 = vcombine.low %v2620_v16, %v2636_v17  ;;  %v2647_v21 = vcombine.high %v2627_v14, %v2643_v15 }
 0x876   : > { %2653 = vrot.lane.b32.xlu0 %v2646_v18, %s14984_s10  ;;  %2649 = vrot.lane.b32.xlu1 %v2645_v19, %s14982_s13 }
 0x87a   : > { %2657 = vrot.lane.b32.xlu1 %v2647_v21, %s14978_s28  ;;  %s15088_s28 = sld [smem:[#allocation59_spill]] }
 0x880   : > { %v2865_v45 = vld [vmem:[%s15088_s28] sm:$0xff]  ;;  %v2866_v46 = vld [vmem:[%s15088_s28 + $0x8] sm:$0xff]  ;;  %v2867_v48 = vld [vmem:[%s15088_s28 + $0x10] sm:$0xff] }
 0x881   : > { %v12164_v49 = vpack.c.bf16 %v2866_v46, %v2865_v45  ;;  %v2868_v50 = vld [vmem:[%s15088_s28 + $0x18] sm:$0xff]  ;;  %v2869_v52 = vld [vmem:[%s15088_s28 + $0x20] sm:$0xff]  ;;  %v2870_v53 = vld [vmem:[%s15088_s28 + $0x28] sm:$0xff] }
 0x882   : > { %v12167_v51 = vpack.c.bf16 %v2868_v50, %v2867_v48  ;;  %v12170_v54 = vpack.c.bf16 %v2870_v53, %v2869_v52  ;;  %v2871_v2 = vld [vmem:[%s15088_s28 + $0x30] sm:$0xff]  ;;  %v2872_v3 = vld [vmem:[%s15088_s28 + $0x38] sm:$0xff] }
 0x883   : > { %v12173_v4 = vpack.c.bf16 %v2872_v3, %v2871_v2 }
 0x8e8   : > { %v2650_v22 = vpop.permute.xlu1 %2649  ;;  %v2654_v23 = vpop.permute.xlu0 %2653 }
 0x8e9   : > { %v2660_v24 = vsel %vm1603_vm2, %v2644_v20, %v2650_v22  ;;  %v11226_v22 = vld [vmem:[%s15084_s2 + $0x20] sm:$0xff] }
 0x8ea   : > { %v2662_v26 = vsel %vm2661_vm3, %v2660_v24, %v2654_v23  ;;  %v11227_v23 = vld [vmem:[%s15084_s2 + $0x28] sm:$0xff] }
 0x8eb   : > { %v12176_v24 = vpack.c.bf16 %v11227_v23, %v11226_v22 }
 0x8ec   : > { %v2658_v25 = vpop.permute.xlu1 %2657 }
 0x8ed   : > { %v2664_v27 = vsel %vm2663_vm4, %v2662_v26, %v2658_v25  ;;  %v11228_v25 = vld [vmem:[%s15084_s2 + $0x30] sm:$0xff]  ;;  %v11229_v26 = vld [vmem:[%s15084_s2 + $0x38] sm:$0xff]  ;;  %s15097_s2 = smov 112  }
 0x8ee   : > { %11680 = vmatmul.mubr.msk.f32.vlgmr.msra.gmra.mrb[8].mxu1 %vm1382_vm1, %v2664_v27  ;;  %v12179_v27 = vpack.c.bf16 %v11229_v26, %v11228_v25 }
 0x8ef   : > { %11709 = vmatprep.mubr.msk.f32.mxu1 %vm13476_vm0, %v13477_v1  ;;  %12165 = vmatpush3.bf16.msra.mxu1 %v12164_v49 }
 0x8f0   : > { %12166 = vmatprep.subr.bf16.mxu1 %v13475_v0 }
 0x8f3   : > { %12168 = vmatpush3.bf16.msra.mxu1 %v12167_v51 }
 0x8f4   : > { %12169 = vmatprep.subr.bf16.mxu1 %v13475_v0 }
 0x8f7   : > { %12171 = vmatpush3.bf16.msra.mxu1 %v12170_v54 }
 0x8f8   : > { %12172 = vmatprep.subr.bf16.mxu1 %v13475_v0 }
 0x8fb   : > { %12174 = vmatpush3.bf16.msra.mxu1 %v12173_v4 }
 0x8fc   : > { %11733 = vmatprep.subr.mxu1 %v13477_v1 }
 0x9c1   : > { %v2745_v29 = vpop.f32.mrb[8].mxu1 }
 0x9c2   : > { %v2746_v30 = vadd.f32 %v11216_v28, %v2745_v29  ;;  %v11681_v31 = vpop.f32.mrb[9].mxu1 }
 0x9c4   : > { %v2749_v32 = vadd.f32 %v2746_v30, %v14141_v8  ;;  %v2782_v8 = vld [vmem:[%s15087_s11 + $0x10] sm:$0xff] }
 0x9c5   : > { %v12161_v44 = vpack.c.bf16 %v2783_v43, %v2782_v8 }
 0x9c6   : > { %v2752_v33 = vsel %vm1382_vm1, %v2749_v32, 0.0 }
 0x9c7   : > { %2753 = vadd.xlane.f32.xlu1 %v2752_v33  ;;  %12162 = vmatpush3.bf16.msra.mxu0 %v12161_v44 }
 0x9c8   : > { %12175 = vmatprep.subr.bf16.mxu0 %v13475_v0 }
 0xa54   : > { %v2754_v34 = vpop.xlane.xlu1 %2753 }
 0xa55   : > { %v2756_v35 = vmul.f32 0.03125, %v2754_v34  ;;  %v11225_v34 = vld [vmem:[#allocation16] ss:$0 sm:$0xff] }
 0xa57   : > { %v2757_v36 = vsub.f32 %v2749_v32, %v2756_v35  ;;  %v11224_v32 = vld [vmem:[#allocation14] ss:$0 sm:$0xff] }
 0xa59   : > { %v2758_v37 = vmul.f32 %v2757_v36, %v2757_v36 }
 0xa5b   : > { %v2759_v38 = vsel %vm1382_vm1, %v2758_v37, 0.0  ;;  %v11231_v37 = vld [vmem:[%s15085_s4 + $0x1] ss:$0 sm:$0xff]  ;;  %s15099_s4 = smov 104  }
 0xa5c   : > { %2760 = vadd.xlane.f32.xlu0 %v2759_v38 }
 0xae9   : > { %v2761_v55 = vpop.xlane.xlu0 %2760 }
 0xaea   : > { %v2762_v56 = vmul.f32 0.03125, %v2761_v55 }
 0xaec   : > { %v2763_v57 = vadd.f32 1e-05, %v2762_v56 }
 0xaee   : > { %12616 = vrsqrt.f32 %v2763_v57 }
 0xaf8   : > { %v12617_v58 = vpop.eup %12616 }
 0xaf9   : > { %v2765_v60 = vmul.f32 %v12617_v58, %v2757_v36 }
 0xafb   : > { %v2772_v62 = vmul.f32 %v11218_v59, %v2765_v60 }
 0xafd   : > { %v2779_v63 = vadd.f32 %v11219_v61, %v2772_v62 }
 0xaff   : > { %11691 = vmatmul.mubr.msk.f32.vlgmr.msra.gmra.mrb[10].mxu0 %vm1382_vm1, %v2779_v63 }
 0xb00   : > { %11720 = vmatprep.mubr.msk.f32.mxu0 %vm13476_vm0, %v13477_v1  ;;  %12177 = vmatpush3.bf16.msra.mxu0 %v12176_v24 }
 0xb01   : > { %12178 = vmatprep.subr.bf16.mxu0 %v13475_v0 }
 0xb04   : > { %12180 = vmatpush3.bf16.msra.mxu0 %v12179_v27 }
 0xb05   : > { %11723 = vmatprep.subr.mxu0 %v13477_v1 }
 0xbd2   : > { %v2860_v6 = vpop.f32.mrb[10].mxu0 }
 0xbd3   : > { %v2861_v7 = vadd.f32 %v11220_v5, %v2860_v6  ;;  %v11692_v9 = vpop.f32.mrb[11].mxu0 }
 0xbd5   : > { %v2864_v10 = vmax.f32 %v2861_v7, 0.0 }
 0xbd7   : > { %11710 = vmatmul.mubr.msk.f32.vlgmr.msra.gmra.mrb[10].mxu1 %vm2880_vm5, %v2864_v10 }
 0xbd8   : > { %11735 = vmatprep.mubr.msk.f32.mxu1 %vm13476_vm0, %v13477_v1 }
 0xcaa   : > { %v2950_v12 = vpop.f32.mrb[10].mxu1 }
 0xcab   : > { %v2951_v13 = vadd.f32 %v11222_v11, %v2950_v12  ;;  %v11711_v14 = vpop.f32.mrb[11].mxu1 }
 0xcad   : > { %v2954_v15 = vadd.f32 %v2951_v13, %v2779_v63 }
 0xcaf   : > { %v2957_v16 = vsel %vm1382_vm1, %v2954_v15, 0.0 }
 0xcb0   : > { %2958 = vadd.xlane.f32.xlu1 %v2957_v16 }
 0xd3d   : > { %v2959_v17 = vpop.xlane.xlu1 %2958 }
 0xd3e   : > { %v2960_v18 = vmul.f32 0.03125, %v2959_v17 }
 0xd40   : > { %v2961_v19 = vsub.f32 %v2954_v15, %v2960_v18 }
 0xd42   : > { %v2962_v20 = vmul.f32 %v2961_v19, %v2961_v19 }
 0xd44   : > { %v2963_v21 = vsel %vm1382_vm1, %v2962_v20, 0.0 }
 0xd45   : > { %2964 = vadd.xlane.f32.xlu0 %v2963_v21 }
 0xdd2   : > { %v2965_v28 = vpop.xlane.xlu0 %2964 }
 0xdd3   : > { %v2966_v29 = vmul.f32 0.03125, %v2965_v28 }
 0xdd5   : > { %v2967_v30 = vadd.f32 1e-05, %v2966_v29 }
 0xdd7   : > { %12618 = vrsqrt.f32 %v2967_v30 }
 0xde1   : > { %v12619_v31 = vpop.eup %12618 }
 0xde2   : > { %v2969_v33 = vmul.f32 %v12619_v31, %v2961_v19 }
 0xde4   : > { %v2976_v35 = vmul.f32 %v11224_v32, %v2969_v33 }
 0xde6   : > { %v14282_v36 = vadd.f32 %v11225_v34, %v2976_v35 }
 0xde8   : > { %11721 = vmatmul.mubr.msk.f32.vlgmr.msra.gmra.mrb[12].mxu0 %vm1382_vm1, %v14282_v36 }
 0xde9   : > { %11725 = vmatprep.mubr.msk.f32.mxu0 %vm13476_vm0, %v13477_v1 }
 0xebb   : > { %v3066_v38 = vpop.f32.mrb[12].mxu0 }
 0xebc   : > { %v3067_v39 = vadd.f32 %v11231_v37, %v3066_v38  ;;  %v11722_v40 = vpop.f32.mrb[13].mxu0 }
 0xebe   : > { %3073 = vrot.lane.b32.xlu0 %v3067_v39, %s14992_s23  ;;  %3071 = vrot.lane.b32.xlu1 %v3067_v39, %s14990_s14 }
 0xec2   : > { %3075 = vrot.lane.b32.xlu1 %v3067_v39, %s14988_s8 }
 0xec6   : > { %3077 = vrot.lane.b32.xlu1 %v3067_v39, %s14986_s6 }
 0xf30   : > { %v3074_v42 = vpop.permute.xlu0 %3073  ;;  %v3072_v8 = vpop.permute.xlu1 %3071 }
 0xf31   : > { %3081 = vrot.lane.b32.xlu1 %v3074_v42, %s14986_s6  ;;  %3079 = vrot.lane.b32.xlu0 %v3072_v8, %s14986_s6 }
 0xf34   : > { %v3076_v43 = vpop.permute.xlu1 %3075 }
 0xf35   : > { %3083 = vrot.lane.b32.xlu0 %v3076_v43, %s14986_s6 }
 0xf38   : > { %v3078_v44 = vpop.permute.xlu1 %3077 }
 0xf5a   : > { %3089 = vxpose.xlu1.b32.start.end [1/1] (short) (narrow) %v3078_v44, 8 }
 0xfa3   : > { %v3080_v45 = vpop.permute.xlu0 %3079  ;;  %v3082_v46 = vpop.permute.xlu1 %3081 }
 0xfa4   : > { %3121 = vxpose.xlu0.b32.start.end [1/1] (short) (narrow) %v3080_v45, 8 }
 0xfa7   : > { %v3084_v48 = vpop.permute.xlu0 %3083 }
 0xfa8   : > { %3153 = vxpose.xlu0.b32.start.end [1/1] (short) (narrow) %v3082_v46, 8 }
 0xfac   : > { %3185 = vxpose.xlu0.b32.start.end [1/1] (short) (narrow) %v3084_v48, 8 }
 0xfda   : > { %v3105_v49 = vpop.trf.xlu1 }
 0xfdb   : > { %11724 = vmatpush3.msra.mxu0 %v3105_v49 }
 0xfdc   : > { %11726 = vmatmul.mubr.msk.f32.vlgmr.msra.gmra.mrb[14].mxu0 %vm1603_vm2, %v3067_v39  ;;  %11728 = vmatprep.subr.mxu0 %v13477_v1 }
 0xfdd   : > { %11730 = vmatprep.mubr.msk.f32.mxu0 %vm13476_vm0, %v13477_v1 }
0x1024   : > { %v3137_v50 = vpop.trf.xlu0 }
0x1025   : > { %11729 = vmatpush3.msra.mxu0 %v3137_v50 }
0x1026   : > { %11731 = vmatmul.mubr.msk.f32.vlgmr.msra.gmra.mrb[16].mxu0 %vm1603_vm2, %v3072_v8  ;;  %11738 = vmatprep.subr.mxu0 %v13477_v1 }
0x1027   : > { %11740 = vmatprep.mubr.msk.f32.mxu0 %vm13476_vm0, %v13477_v1 }
0x1028   : > { %v3169_v51 = vpop.trf.xlu0 }
0x1029   : > { %11734 = vmatpush3.msra.mxu1 %v3169_v51 }
0x102a   : > { %11736 = vmatmul.mubr.msk.f32.vlgmr.msra.gmra.mrb[12].mxu1 %vm1603_vm2, %v3074_v42  ;;  %11743 = vmatprep.subr.mxu1 %v13477_v1 }
0x102b   : > { %11745 = vmatprep.mubr.msk.f32.mxu1 %vm13476_vm0, %v13477_v1 }
0x102c   : > { %v3201_v52 = vpop.trf.xlu0 }
0x102d   : > { %11739 = vmatpush3.msra.mxu0 %v3201_v52 }
0x102e   : > { %11741 = vmatmul.mubr.msk.f32.vlgmr.msra.gmra.mrb[18].mxu0 %vm1603_vm2, %v3076_v43  ;;  %11748 = vmatprep.subr.mxu0 %v13477_v1 }
0x102f   : > { %11750 = vmatprep.mubr.msk.f32.mxu0 %vm13476_vm0, %v13477_v1 }
0x10af   : > { %v3285_v53 = vpop.f32.mrb[14].mxu0 }
0x10b0   : > { %v3505_v54 = vmul.f32 0.35355338, %v3285_v53  ;;  %v11727_v55 = vpop.f32.mrb[15].mxu0 }
0x10b2   : > { %v3509_v56 = vsel %vm1603_vm2, %v3505_v54, -inf }
0x10b3   : > { %3510 = vmax.xlane.f32.xlu1 %v3509_v56 }
0x10f9   : > { %v3357_v57 = vpop.f32.mrb[16].mxu0 }
0x10fa   : > { %v3506_v58 = vmul.f32 0.35355338, %v3357_v57  ;;  %v11732_v59 = vpop.f32.mrb[17].mxu0 }
0x10fb   : > { %v11248_v59 = vld [vmem:[%s15086_s3 + $0x28] sm:$0xff] }
0x10fc   : > { %v3512_v60 = vsel %vm1603_vm2, %v3506_v58, -inf }
0x10fd   : > { %v3429_v61 = vpop.f32.mrb[12].mxu1  ;;  %3513 = vmax.xlane.f32.xlu0 %v3512_v60 }
0x10fe   : > { %v3507_v62 = vmul.f32 0.35355338, %v3429_v61  ;;  %v11737_v63 = vpop.f32.mrb[13].mxu1 }
0x1100   : > { %v3515_v2 = vsel %vm1603_vm2, %v3507_v62, -inf }
0x1101   : > { %3516 = vmax.xlane.f32.xlu1 %v3515_v2  ;;  %v3501_v3 = vpop.f32.mrb[18].mxu0 }
0x1102   : > { %v3508_v4 = vmul.f32 0.35355338, %v3501_v3  ;;  %v11742_v5 = vpop.f32.mrb[19].mxu0 }
0x1104   : > { %v3518_v6 = vsel %vm1603_vm2, %v3508_v4, -inf }
0x1105   : > { %3519 = vmax.xlane.f32.xlu1 %v3518_v6 }
0x1113   : > { %3553 = vrot.lane.b32.xlu0 %v3067_v39, %s14980_s9 }
0x1116   : > { %3555 = vrot.lane.b32.xlu1 %v3072_v8, %s14980_s9 }
0x1117   : > { %3559 = vrot.lane.b32.xlu0 %v3076_v43, %s14980_s9 }
0x111a   : > { %3557 = vrot.lane.b32.xlu1 %v3074_v42, %s14980_s9  ;;  %s15089_s9 = smov 24  }
0x1140   : > { %v3511_v7 = vpop.xlane.xlu1 %3510 }
0x1141   : > { %v3521_v9 = vsub.f32 %v3505_v54, %v3511_v7 }
0x1143   : > { %v3525_v10 = vmul.f32 1.442695, %v3521_v9 }
0x1145   : > { %12620 = vpow2.f32 %v3525_v10 }
0x114f   : > { %v12621_v11 = vpop.eup %12620 }
0x1150   : > { %v3533_v12 = vsel %vm1603_vm2, %v12621_v11, 0.0 }
0x1151   : > { %3534 = vadd.xlane.f32.xlu1 %v3533_v12 }
0x118a   : > { %v3514_v13 = vpop.xlane.xlu0 %3513 }
0x118b   : > { %v3522_v14 = vsub.f32 %v3506_v58, %v3514_v13  ;;  %v11247_v58 = vld [vmem:[%s15086_s3 + $0x20] sm:$0xff] }
0x118c   : > { %v12182_v60 = vpack.c.bf16 %v11248_v59, %v11247_v58 }
0x118d   : > { %v3527_v15 = vmul.f32 1.442695, %v3522_v14 }
0x118e   : > { %v3517_v16 = vpop.xlane.xlu1 %3516  ;;  %v3554_v29 = vpop.permute.xlu0 %3553 }
0x118f   : > { %12622 = vpow2.f32 %v3527_v15  ;;  %v3523_v17 = vsub.f32 %v3507_v62, %v3517_v16  ;;  %v11249_v16 = vld [vmem:[%s15086_s3 + $0x30] sm:$0xff] }
0x1191   : > { %v3529_v18 = vmul.f32 1.442695, %v3523_v17  ;;  %v11250_v17 = vld [vmem:[%s15086_s3 + $0x38] sm:$0xff]  ;;  %s15098_s3 = smov 120  }
0x1192   : > { %v3520_v19 = vpop.xlane.xlu1 %3519  ;;  %v3560_v31 = vpop.permute.xlu0 %3559 }
0x1193   : > { %12624 = vpow2.f32 %v3529_v18  ;;  %v3524_v20 = vsub.f32 %v3508_v4, %v3520_v19 }
0x1195   : > { %v3531_v21 = vmul.f32 1.442695, %v3524_v20 }
0x1196   : > { %v3556_v28 = vpop.permute.xlu1 %3555 }
0x1197   : > { %12626 = vpow2.f32 %v3531_v21 }
0x1199   : > { %v12623_v22 = vpop.eup %12622 }
0x119a   : > { %v3536_v23 = vsel %vm1603_vm2, %v12623_v22, 0.0  ;;  %v3558_v30 = vpop.permute.xlu1 %3557 }
0x119b   : > { %3537 = vadd.xlane.f32.xlu0 %v3536_v23 }
0x119d   : > { %v12625_v24 = vpop.eup %12624 }
0x119e   : > { %v3539_v25 = vsel %vm1603_vm2, %v12625_v24, 0.0 }
0x119f   : > { %3540 = vadd.xlane.f32.xlu0 %v3539_v25 }
0x11a1   : > { %v12627_v26 = vpop.eup %12626 }
0x11a2   : > { %v3542_v27 = vsel %vm1603_vm2, %v12627_v26, 0.0 }
0x11a3   : > { %3543 = vadd.xlane.f32.xlu1 %v3542_v27 }
0x11cc   : > { %3565 = vxpose.xlu0.b32.start.end [1/1] (short) (narrow) %v3554_v29, 8 }
0x11d0   : > { %3629 = vxpose.xlu0.b32.start.end [1/1] (short) (narrow) %v3558_v30, 8 }
0x11d4   : > { %3661 = vxpose.xlu0.b32.start.end [1/1] (short) (narrow) %v3560_v31, 8 }
0x11d6   : > { %3597 = vxpose.xlu1.b32.start.end [1/1] (short) (narrow) %v3556_v28, 8 }
0x11de   : > { %v3535_v32 = vpop.xlane.xlu1 %3534 }
0x11df   : > { %12628 = vrcp.f32 %v3535_v32 }
0x11e9   : > { %v12629_v33 = vpop.eup %12628 }
0x11ea   : > { %v3546_v34 = vmul.f32 %v12629_v33, %v12621_v11 }
0x11ec   : > { %11744 = vmatpush3.xpose.msk.msra.mxu1 %vm1603_vm2, %v3546_v34 }
0x11ed   : > { %11753 = vmatprep.subr.mxu1 %v13477_v1 }
0x1228   : > { %v3538_v35 = vpop.xlane.xlu0 %3537 }
0x1229   : > { %12630 = vrcp.f32 %v3538_v35 }
0x122c   : > { %v3541_v39 = vpop.xlane.xlu0 %3540 }
0x122d   : > { %12632 = vrcp.f32 %v3541_v39 }
0x1230   : > { %v3544_v40 = vpop.xlane.xlu1 %3543 }
0x1231   : > { %12634 = vrcp.f32 %v3544_v40 }
0x1233   : > { %v12631_v37 = vpop.eup %12630 }
0x1234   : > { %v3548_v38 = vmul.f32 %v12631_v37, %v12623_v22  ;;  %v12185_v22 = vpack.c.bf16 %v11250_v17, %v11249_v16 }
0x1236   : > { %11749 = vmatpush3.xpose.msk.msra.mxu0 %vm1603_vm2, %v3548_v38 }
0x1237   : > { %11758 = vmatprep.subr.mxu0 %v13477_v1  ;;  %v12633_v42 = vpop.eup %12632 }
0x1238   : > { %v3550_v43 = vmul.f32 %v12633_v42, %v12625_v24 }
0x123b   : > { %v12635_v45 = vpop.eup %12634 }
0x123c   : > { %v3552_v48 = vmul.f32 %v12635_v45, %v12627_v26 }
0x124c   : > { %v3581_v8 = vpop.trf.xlu0 }
0x124d   : > { %11746 = vmatmul.mubr.msk.f32.vlgmr.msra.gmra.mrb[14].mxu1 %vm1603_vm2, %v3581_v8 }
0x124e   : > { %11754 = vmatpush3.xpose.msk.msra.mxu1 %vm1603_vm2, %v3550_v43  ;;  %11755 = vmatprep.mubr.msk.f32.mxu1 %vm13476_vm0, %v13477_v1 }
0x124f   : > { %12181 = vmatprep.subr.bf16.mxu1 %v13475_v0 }
0x1250   : > { %v3645_v44 = vpop.trf.xlu0 }
0x1251   : > { %11756 = vmatmul.mubr.msk.f32.vlgmr.msra.gmra.mrb[16].mxu1 %vm1603_vm2, %v3645_v44 }
0x1252   : > { %11771 = vmatprep.mubr.msk.f32.mxu1 %vm13476_vm0, %v13477_v1  ;;  %12183 = vmatpush3.bf16.msra.mxu1 %v12182_v60 }
0x1253   : > { %12184 = vmatprep.subr.bf16.mxu1 %v13475_v0 }
0x1254   : > { %v3677_v49 = vpop.trf.xlu0 }
0x1256   : > { %v3613_v46 = vpop.trf.xlu1  ;;  %12186 = vmatpush3.bf16.msra.mxu1 %v12185_v22 }
0x1257   : > { %11751 = vmatmul.mubr.msk.f32.vlgmr.msra.gmra.mrb[20].mxu0 %vm1603_vm2, %v3613_v46  ;;  %12193 = vmatprep.subr.bf16.mxu1 %v13475_v0 }
0x1258   : > { %11759 = vmatpush3.xpose.msk.msra.mxu0 %vm1603_vm2, %v3552_v48  ;;  %11760 = vmatprep.mubr.msk.f32.mxu0 %vm13476_vm0, %v13477_v1 }
0x1259   : > { %12187 = vmatprep.subr.bf16.mxu0 %v13475_v0 }
0x125b   : > { %11761 = vmatmul.mubr.msk.f32.vlgmr.msra.gmra.mrb[22].mxu0 %vm1603_vm2, %v3677_v49 }
0x125c   : > { %11782 = vmatprep.mubr.msk.f32.mxu0 %vm13476_vm0, %v13477_v1 }
0x1320   : > { %v3765_v50 = vpop.f32.mrb[14].mxu1 }
0x1321   : > { %v11747_v51 = vpop.f32.mrb[15].mxu1  ;;  %3997 = vxpose.xlu1.b32.start.end [1/1] (short) (narrow) %v3765_v50, 8 }
0x1322   : > { %v11251_v51 = vld [vmem:[#allocation7 + $0x1] ss:$0 sm:$0xff] }
0x1324   : > { %v3917_v52 = vpop.f32.mrb[16].mxu1 }
0x1325   : > { %v11757_v53 = vpop.f32.mrb[17].mxu1  ;;  %4061 = vxpose.xlu1.b32.start.end [1/1] (short) (narrow) %v3917_v52, 8 }
0x132a   : > { %v3841_v54 = vpop.f32.mrb[20].mxu0 }
0x132b   : > { %4029 = vxpose.xlu0.b32.start.end [1/1] (short) (narrow) %v3841_v54, 8  ;;  %v11752_v55 = vpop.f32.mrb[21].mxu0 }
0x132e   : > { %v3993_v56 = vpop.f32.mrb[22].mxu0 }
0x132f   : > { %4093 = vxpose.xlu0.b32.start.end [1/1] (short) (narrow) %v3993_v56, 8  ;;  %v11762_v57 = vpop.f32.mrb[23].mxu0 }
0x13a1   : > { %v4013_v61 = vpop.trf.xlu1 }
0x13a5   : > { %v4077_v62 = vpop.trf.xlu1 }
0x13a6   : > { %v4125_v2 = vcombine.low %v4013_v61, %v4077_v62  ;;  %v4126_v3 = vcombine.high %v4013_v61, %v4077_v62  ;;  %v11255_v62 = vld [vmem:[%s15087_s11 + $0x20] sm:$0xff] }
0x13a8   : > { %v4133_v7 = vrot.slane %v4125_v2, %v14215_v41  ;;  %v4140_v9 = vrot.slane %v4126_v3, %v14215_v41  ;;  %v11258_v3 = vld [vmem:[%s15087_s11 + $0x38] sm:$0xff] }
0x13ab   : > { %v4045_v63 = vpop.trf.xlu0 }
0x13af   : > { %v4109_v4 = vpop.trf.xlu0 }
0x13b0   : > { %v4141_v5 = vcombine.low %v4045_v63, %v4109_v4  ;;  %v4142_v6 = vcombine.high %v4045_v63, %v4109_v4  ;;  %v11256_v63 = vld [vmem:[%s15087_s11 + $0x28] sm:$0xff] }
0x13b1   : > { %v12188_v2 = vpack.c.bf16 %v11256_v63, %v11255_v62 }
0x13b2   : > { %v4149_v10 = vrot.slane %v4141_v5, %v14215_v41  ;;  %v4156_v11 = vrot.slane %v4142_v6, %v14215_v41  ;;  %v11261_v5 = vld [vmem:[%s15088_s28 + $0x40] sm:$0xff]  ;;  %v11262_v6 = vld [vmem:[%s15088_s28 + $0x48] sm:$0xff] }
0x13b3   : > { %12189 = vmatpush3.bf16.msra.mxu0 %v12188_v2 }
0x13b4   : > { %v4157_v12 = vcombine.low %v4133_v7, %v4149_v10  ;;  %v4158_v13 = vcombine.high %v4133_v7, %v4149_v10  ;;  %v4173_v14 = vcombine.low %v4140_v9, %v4156_v11  ;;  %v4174_v15 = vcombine.high %v4140_v9, %v4156_v11  ;;  %12190 = vmatprep.subr.bf16.mxu0 %v13475_v0  ;;  %v11263_v7 = vld [vmem:[%s15088_s28 + $0x50] sm:$0xff]  ;;  %v11264_v10 = vld [vmem:[%s15088_s28 + $0x58] sm:$0xff] }
0x13b5   : > { %v12194_v9 = vpack.c.bf16 %v11262_v6, %v11261_v5  ;;  %v12197_v11 = vpack.c.bf16 %v11264_v10, %v11263_v7 }
0x13b6   : > { %v4165_v18 = vrot.slane %v4157_v12, %v14217_v47  ;;  %v4172_v19 = vrot.slane %v4158_v13, %v14217_v47  ;;  %v4181_v20 = vrot.slane %v4173_v14, %v14217_v47  ;;  %v4188_v21 = vrot.slane %v4174_v15, %v14217_v47  ;;  %v11265_v12 = vld [vmem:[%s15088_s28 + $0x60] sm:$0xff]  ;;  %v11266_v13 = vld [vmem:[%s15088_s28 + $0x68] sm:$0xff] }
0x13b7   : > { %v12200_v14 = vpack.c.bf16 %v11266_v13, %v11265_v12 }
0x13b8   : > { %v4193_v23 = vcombine.low %v4165_v18, %v4172_v19  ;;  %v11245_v24 = vcombine.high %v4165_v18, %v4172_v19  ;;  %v4209_v25 = vcombine.low %v4181_v20, %v4188_v21  ;;  %v11246_v26 = vcombine.high %v4181_v20, %v4188_v21  ;;  %v11253_v19 = vld [vmem:[#allocation8 + $0x1] ss:$0 sm:$0xff] }
0x13ba   : > { %v4200_v27 = vrot.slane %v4193_v23, %v14215_v41  ;;  %v4208_v28 = vrot.slane %v11245_v24, %v14215_v41  ;;  %v4216_v29 = vrot.slane %v4209_v25, %v14215_v41  ;;  %v4224_v30 = vrot.slane %v11246_v26, %v14215_v41  ;;  %v11254_v23 = vld [vmem:[#allocation10 + $0x1] ss:$0 sm:$0xff] }
0x13bc   : > { %v4226_v31 = vcombine.high %v4200_v27, %v4208_v28  ;;  %v4242_v32 = vcombine.high %v4216_v29, %v4224_v30  ;;  %v4225_v33 = vcombine.low %v4200_v27, %v4208_v28  ;;  %v4241_v34 = vcombine.low %v4216_v29, %v4224_v30 }
0x13be   : > { %v4240_v35 = vrot.slane %v4226_v31, %v14217_v47  ;;  %v4256_v37 = vrot.slane %v4242_v32, %v14217_v47  ;;  %v4233_v38 = vrot.slane %v4225_v33, %v14217_v47  ;;  %v4249_v39 = vrot.slane %v4241_v34, %v14217_v47  ;;  %v11267_v31 = vld [vmem:[%s15088_s28 + $0x70] sm:$0xff]  ;;  %v11268_v32 = vld [vmem:[%s15088_s28 + $0x78] sm:$0xff]  ;;  %v11259_v34 = vld [vmem:[#allocation11 + $0x1] ss:$0 sm:$0xff] }
0x13bf   : > { %v12203_v33 = vpack.c.bf16 %v11268_v32, %v11267_v31 }
0x13c0   : > { %v4259_v40 = vcombine.low %v4240_v35, %v4256_v37  ;;  %v4258_v42 = vcombine.high %v4233_v38, %v4249_v39  ;;  %v4257_v8 = vcombine.low %v4233_v38, %v4249_v39  ;;  %v4260_v43 = vcombine.high %v4240_v35, %v4256_v37 }
0x13c2   : > { %4266 = vrot.lane.b32.xlu0 %v4259_v40, %s14984_s10  ;;  %4262 = vrot.lane.b32.xlu1 %v4258_v42, %s14982_s13  ;;  %s15090_s13 = sld [smem:[#allocation61_spill]]  ;;  %s15091_s10 = scalar_lea.vmem [#allocation5], %s14074_s20  ;;  %v11273_v40 = vld [vmem:[#allocation17] ss:$0 sm:$0xff] }
0x13c3   : > { %v14406_v30 = vld [vmem:[%s15091_s10] sm:$0xff]  ;;  %s15092_s10 = smov 64  }
0x13c6   : > { %4270 = vrot.lane.b32.xlu1 %v4260_v43, %s15089_s9 }
0x13c8   : > { %v4604_v21 = vld [vmem:[%s15090_s13] sm:$0xff]  ;;  %v4605_v22 = vld [vmem:[%s15090_s13 + $0x8] sm:$0xff]  ;;  %v4606_v27 = vld [vmem:[%s15090_s13 + $0x10] sm:$0xff] }
0x13c9   : > { %v12206_v25 = vpack.c.bf16 %v4605_v22, %v4604_v21  ;;  %v4607_v28 = vld [vmem:[%s15090_s13 + $0x18] sm:$0xff] }
0x13ca   : > { %v12209_v29 = vpack.c.bf16 %v4607_v28, %v4606_v27 }
0x1434   : > { %v4263_v44 = vpop.permute.xlu1 %4262  ;;  %v4267_v45 = vpop.permute.xlu0 %4266 }
0x1435   : > { %v4273_v46 = vsel %vm1603_vm2, %v4257_v8, %v4263_v44 }
0x1436   : > { %v4274_v49 = vsel %vm2661_vm3, %v4273_v46, %v4267_v45 }
0x1438   : > { %v4271_v48 = vpop.permute.xlu1 %4270 }
0x1439   : > { %v4275_v50 = vsel %vm2663_vm4, %v4274_v49, %v4271_v48 }
0x143a   : > { %11772 = vmatmul.mubr.msk.f32.vlgmr.msra.gmra.mrb[18].mxu1 %vm1382_vm1, %v4275_v50 }
0x143b   : > { %11801 = vmatprep.mubr.msk.f32.mxu1 %vm13476_vm0, %v13477_v1  ;;  %12195 = vmatpush3.bf16.msra.mxu1 %v12194_v9 }
0x143c   : > { %12196 = vmatprep.subr.bf16.mxu1 %v13475_v0 }
0x143f   : > { %12198 = vmatpush3.bf16.msra.mxu1 %v12197_v11 }
0x1440   : > { %12199 = vmatprep.subr.bf16.mxu1 %v13475_v0 }
0x1443   : > { %12201 = vmatpush3.bf16.msra.mxu1 %v12200_v14 }
0x1444   : > { %12202 = vmatprep.subr.bf16.mxu1 %v13475_v0 }
0x1447   : > { %12204 = vmatpush3.bf16.msra.mxu1 %v12203_v33 }
0x1448   : > { %11825 = vmatprep.subr.mxu1 %v13477_v1 }
0x150d   : > { %v4358_v52 = vpop.f32.mrb[18].mxu1 }
0x150e   : > { %v4359_v53 = vadd.f32 %v11251_v51, %v4358_v52  ;;  %v11773_v54 = vpop.f32.mrb[19].mxu1 }
0x1510   : > { %v4362_v55 = vadd.f32 %v4359_v53, %v14282_v36  ;;  %v11257_v36 = vld [vmem:[%s15087_s11 + $0x30] sm:$0xff]  ;;  %s15100_s11 = smov 96  }
0x1511   : > { %v12191_v4 = vpack.c.bf16 %v11258_v3, %v11257_v36 }
0x1512   : > { %v4367_v56 = vsel %vm1382_vm1, %v4362_v55, 0.0 }
0x1513   : > { %4368 = vadd.xlane.f32.xlu1 %v4367_v56  ;;  %12192 = vmatpush3.bf16.msra.mxu0 %v12191_v4 }
0x1514   : > { %12205 = vmatprep.subr.bf16.mxu0 %v13475_v0 }
0x15a0   : > { %v4369_v57 = vpop.xlane.xlu1 %4368 }
0x15a1   : > { %v4370_v58 = vmul.f32 0.03125, %v4369_v57 }
0x15a3   : > { %v4371_v59 = vsub.f32 %v4362_v55, %v4370_v58 }
0x15a5   : > { %v4372_v60 = vmul.f32 %v4371_v59, %v4371_v59 }
0x15a7   : > { %v4373_v61 = vsel %vm1382_vm1, %v4372_v60, 0.0 }
0x15a8   : > { %4374 = vadd.xlane.f32.xlu0 %v4373_v61 }
0x1635   : > { %v4375_v15 = vpop.xlane.xlu0 %4374 }
0x1636   : > { %v4376_v16 = vmul.f32 0.03125, %v4375_v15 }
0x1638   : > { %v4377_v17 = vadd.f32 1e-05, %v4376_v16 }
0x163a   : > { %12636 = vrsqrt.f32 %v4377_v17 }
0x1644   : > { %v12637_v18 = vpop.eup %12636 }
0x1645   : > { %v4379_v20 = vmul.f32 %v12637_v18, %v4371_v59 }
0x1647   : > { %v4386_v24 = vmul.f32 %v11253_v19, %v4379_v20 }
0x1649   : > { %v14395_v26 = vadd.f32 %v11254_v23, %v4386_v24 }
0x164b   : > { %11783 = vmatmul.mubr.msk.f32.vlgmr.msra.gmra.mrb[24].mxu0 %vm1382_vm1, %v14395_v26 }
0x164c   : > { %12207 = vmatpush3.bf16.msra.mxu0 %v12206_v25  ;;  %11812 = vmatprep.mubr.msk.f32.mxu0 %vm13476_vm0, %v13477_v1 }
0x164d   : > { %12208 = vmatprep.subr.bf16.mxu0 %v13475_v0 }
0x1650   : > { %12210 = vmatpush3.bf16.msra.mxu0 %v12209_v29 }
0x1651   : > { %11815 = vmatprep.subr.mxu0 %v13477_v1 }
0x1653   : > { %11813 = vmatmul.mubr.msk.f32.vlgmr.msra.gmra.mrb[26].mxu0 %vm1382_vm1, %v14406_v30 }
0x1654   : > { %11817 = vmatprep.mubr.msk.f32.mxu0 %vm13476_vm0, %v13477_v1 }
0x171e   : > { %v4476_v35 = vpop.f32.mrb[24].mxu0 }
0x171f   : > { %v4477_v37 = vadd.f32 %v11259_v34, %v4476_v35  ;;  %v11784_v38 = vpop.f32.mrb[25].mxu0 }
0x1721   : > { %v4480_v39 = vmax.f32 %v4477_v37, 0.0 }
0x1723   : > { %11802 = vmatmul.mubr.msk.f32.vlgmr.msra.gmra.mrb[20].mxu1 %vm2880_vm5, %v4480_v39 }
0x1724   : > { %11827 = vmatprep.mubr.msk.f32.mxu1 %vm13476_vm0, %v13477_v1 }
0x1726   : > { %v4684_v42 = vpop.f32.mrb[26].mxu0 }
0x1727   : > { %v4685_v8 = vadd.f32 %v11273_v40, %v4684_v42  ;;  %v11814_v43 = vpop.f32.mrb[27].mxu0 }
0x1729   : > { %4691 = vrot.lane.b32.xlu0 %v4685_v8, %s14992_s23  ;;  %4689 = vrot.lane.b32.xlu1 %v4685_v8, %s14990_s14  ;;  %s15095_s14 = smov 8   ;;  %s15096_s23 = sld [smem:[#allocation65_spill]] }
0x172d   : > { %4693 = vrot.lane.b32.xlu1 %v4685_v8, %s14988_s8  ;;  %s15094_s8 = smov 16  }
0x1731   : > { %4695 = vrot.lane.b32.xlu1 %v4685_v8, %s14986_s6 }
0x179b   : > { %v4692_v44 = vpop.permute.xlu0 %4691  ;;  %v4690_v45 = vpop.permute.xlu1 %4689 }
0x179c   : > { %4699 = vrot.lane.b32.xlu1 %v4692_v44, %s14986_s6  ;;  %4697 = vrot.lane.b32.xlu0 %v4690_v45, %s14986_s6 }
0x179f   : > { %v4694_v46 = vpop.permute.xlu1 %4693 }
0x17a0   : > { %4701 = vrot.lane.b32.xlu0 %v4694_v46, %s14986_s6  ;;  %s15093_s6 = sld [smem:[#allocation63_spill]] }
0x17a3   : > { %v4696_v48 = vpop.permute.xlu1 %4695 }
0x17c5   : > { %4707 = vxpose.xlu1.b32.start.end [1/1] (short) (narrow) %v4696_v48, 8 }
0x17f6   : > { %v14426_v49 = vpop.f32.mrb[20].mxu1 }
0x17f7   : > { %v11803_v50 = vpop.f32.mrb[21].mxu1 }
0x180e   : > { %v4698_v51 = vpop.permute.xlu0 %4697  ;;  %v4700_v52 = vpop.permute.xlu1 %4699 }
0x180f   : > { %4739 = vxpose.xlu0.b32.start.end [1/1] (short) (narrow) %v4698_v51, 8 }
0x1812   : > { %v4702_v53 = vpop.permute.xlu0 %4701 }
0x1813   : > { %4771 = vxpose.xlu0.b32.start.end [1/1] (short) (narrow) %v4700_v52, 8 }
0x1817   : > { %4803 = vxpose.xlu0.b32.start.end [1/1] (short) (narrow) %v4702_v53, 8 }
0x1845   : > { %v4723_v54 = vpop.trf.xlu1 }
0x1846   : > { %11816 = vmatpush3.msra.mxu0 %v4723_v54 }
0x1847   : > { %11818 = vmatmul.mubr.msk.f32.vlgmr.msra.gmra.mrb[28].mxu0 %vm1603_vm2, %v4685_v8  ;;  %11820 = vmatprep.subr.mxu0 %v13477_v1 }
0x1848   : > { %11822 = vmatprep.mubr.msk.f32.mxu0 %vm13476_vm0, %v13477_v1 }
0x188f   : > { %v4755_v55 = vpop.trf.xlu0 }
0x1890   : > { %11821 = vmatpush3.msra.mxu0 %v4755_v55 }
0x1891   : > { %11823 = vmatmul.mubr.msk.f32.vlgmr.msra.gmra.mrb[30].mxu0 %vm1603_vm2, %v4690_v45  ;;  %11830 = vmatprep.subr.mxu0 %v13477_v1 }
0x1892   : > { %11832 = vmatprep.mubr.msk.f32.mxu0 %vm13476_vm0, %v13477_v1 }
0x1893   : > { %v4787_v56 = vpop.trf.xlu0 }
0x1894   : > { %11826 = vmatpush3.msra.mxu1 %v4787_v56 }
0x1895   : > { %11828 = vmatmul.mubr.msk.f32.vlgmr.msra.gmra.mrb[22].mxu1 %vm1603_vm2, %v4692_v44  ;;  %11835 = vmatprep.subr.mxu1 %v13477_v1 }
0x1896   : > { %11837 = vmatprep.mubr.msk.f32.mxu1 %vm13476_vm0, %v13477_v1 }
0x1897   : > { %v4819_v57 = vpop.trf.xlu0 }
0x1898   : > { %11831 = vmatpush3.msra.mxu0 %v4819_v57 }
0x1899   : > { %11833 = vmatmul.mubr.msk.f32.vlgmr.msra.gmra.mrb[32].mxu0 %vm1603_vm2, %v4694_v46  ;;  %11840 = vmatprep.subr.mxu0 %v13477_v1 }
0x189a   : > { %11842 = vmatprep.mubr.msk.f32.mxu0 %vm13476_vm0, %v13477_v1 }
0x191a   : > { %v4903_v58 = vpop.f32.mrb[28].mxu0 }
0x191b   : > { %v5123_v59 = vmul.f32 0.35355338, %v4903_v58  ;;  %v11819_v60 = vpop.f32.mrb[29].mxu0 }
0x191d   : > { %v5127_v61 = vsel %vm1603_vm2, %v5123_v59, -inf }
0x191e   : > { %5128 = vmax.xlane.f32.xlu1 %v5127_v61 }
0x1964   : > { %v4975_v62 = vpop.f32.mrb[30].mxu0 }
0x1965   : > { %v5124_v63 = vmul.f32 0.35355338, %v4975_v62  ;;  %v11824_v2 = vpop.f32.mrb[31].mxu0 }
0x1967   : > { %v5130_v36 = vsel %vm1603_vm2, %v5124_v63, -inf }
0x1968   : > { %v5047_v3 = vpop.f32.mrb[22].mxu1  ;;  %5131 = vmax.xlane.f32.xlu0 %v5130_v36  ;;  %v5894_v36 = vld [vmem:[%s15093_s6] sm:$0xff] }
0x1969   : > { %v5125_v4 = vmul.f32 0.35355338, %v5047_v3  ;;  %v11829_v5 = vpop.f32.mrb[23].mxu1  ;;  %v5895_v3 = vld [vmem:[%s15093_s6 + $0x8] sm:$0xff] }
0x196b   : > { %v5133_v6 = vsel %vm1603_vm2, %v5125_v4, -inf }
0x196c   : > { %5134 = vmax.xlane.f32.xlu1 %v5133_v6  ;;  %v5119_v7 = vpop.f32.mrb[32].mxu0 }
0x196d   : > { %v5126_v9 = vmul.f32 0.35355338, %v5119_v7  ;;  %v11834_v10 = vpop.f32.mrb[33].mxu0 }
0x196f   : > { %v5136_v11 = vsel %vm1603_vm2, %v5126_v9, -inf }
0x1970   : > { %5137 = vmax.xlane.f32.xlu1 %v5136_v11 }
0x197e   : > { %5171 = vrot.lane.b32.xlu0 %v4685_v8, %s15092_s10 }
0x1981   : > { %5173 = vrot.lane.b32.xlu1 %v4690_v45, %s15092_s10 }
0x1982   : > { %5177 = vrot.lane.b32.xlu0 %v4694_v46, %s15092_s10 }
0x1985   : > { %5175 = vrot.lane.b32.xlu1 %v4692_v44, %s15092_s10 }
0x19ab   : > { %v5129_v12 = vpop.xlane.xlu1 %5128 }
0x19ac   : > { %v5139_v13 = vsub.f32 %v5123_v59, %v5129_v12 }
0x19ae   : > { %v5143_v14 = vmul.f32 1.442695, %v5139_v13 }
0x19b0   : > { %12638 = vpow2.f32 %v5143_v14 }
0x19ba   : > { %v12639_v15 = vpop.eup %12638 }
0x19bb   : > { %v5151_v16 = vsel %vm1603_vm2, %v12639_v15, 0.0 }
0x19bc   : > { %5152 = vadd.xlane.f32.xlu1 %v5151_v16 }
0x19f5   : > { %v5132_v17 = vpop.xlane.xlu0 %5131 }
0x19f6   : > { %v5140_v18 = vsub.f32 %v5124_v63, %v5132_v17 }
0x19f8   : > { %v5145_v19 = vmul.f32 1.442695, %v5140_v18 }
0x19f9   : > { %v5135_v20 = vpop.xlane.xlu1 %5134  ;;  %v5172_v35 = vpop.permute.xlu0 %5171 }
0x19fa   : > { %12640 = vpow2.f32 %v5145_v19  ;;  %v5141_v21 = vsub.f32 %v5125_v4, %v5135_v20  ;;  %v12212_v4 = vpack.c.bf16 %v5895_v3, %v5894_v36 }
0x19fc   : > { %v5147_v22 = vmul.f32 1.442695, %v5141_v21 }
0x19fd   : > { %v5138_v23 = vpop.xlane.xlu1 %5137  ;;  %v5178_v38 = vpop.permute.xlu0 %5177 }
0x19fe   : > { %12642 = vpow2.f32 %v5147_v22  ;;  %v5142_v24 = vsub.f32 %v5126_v9, %v5138_v23  ;;  %v5896_v22 = vld [vmem:[%s15093_s6 + $0x10] sm:$0xff]  ;;  %v5897_v23 = vld [vmem:[%s15093_s6 + $0x18] sm:$0xff] }
0x1a00   : > { %v5149_v25 = vmul.f32 1.442695, %v5142_v24 }
0x1a01   : > { %v5174_v34 = vpop.permute.xlu1 %5173 }
0x1a02   : > { %12644 = vpow2.f32 %v5149_v25 }
0x1a04   : > { %v12641_v27 = vpop.eup %12640 }
0x1a05   : > { %v5154_v28 = vsel %vm1603_vm2, %v12641_v27, 0.0  ;;  %v5176_v37 = vpop.permute.xlu1 %5175 }
0x1a06   : > { %5155 = vadd.xlane.f32.xlu0 %v5154_v28 }
0x1a08   : > { %v12643_v29 = vpop.eup %12642 }
0x1a09   : > { %v5157_v31 = vsel %vm1603_vm2, %v12643_v29, 0.0 }
0x1a0a   : > { %5158 = vadd.xlane.f32.xlu0 %v5157_v31 }
0x1a0c   : > { %v12645_v32 = vpop.eup %12644 }
0x1a0d   : > { %v5160_v33 = vsel %vm1603_vm2, %v12645_v32, 0.0 }
0x1a0e   : > { %5161 = vadd.xlane.f32.xlu1 %v5160_v33 }
0x1a37   : > { %5183 = vxpose.xlu0.b32.start.end [1/1] (short) (narrow) %v5172_v35, 8 }
0x1a3b   : > { %5247 = vxpose.xlu0.b32.start.end [1/1] (short) (narrow) %v5176_v37, 8 }
0x1a3f   : > { %5279 = vxpose.xlu0.b32.start.end [1/1] (short) (narrow) %v5178_v38, 8 }
0x1a41   : > { %5215 = vxpose.xlu1.b32.start.end [1/1] (short) (narrow) %v5174_v34, 8 }
0x1a49   : > { %v5153_v39 = vpop.xlane.xlu1 %5152 }
0x1a4a   : > { %12646 = vrcp.f32 %v5153_v39 }
0x1a54   : > { %v12647_v40 = vpop.eup %12646 }
0x1a55   : > { %v5164_v42 = vmul.f32 %v12647_v40, %v12639_v15 }
0x1a57   : > { %11836 = vmatpush3.xpose.msk.msra.mxu1 %vm1603_vm2, %v5164_v42 }
0x1a58   : > { %11845 = vmatprep.subr.mxu1 %v13477_v1 }
0x1a93   : > { %v5156_v8 = vpop.xlane.xlu0 %5155 }
0x1a94   : > { %12648 = vrcp.f32 %v5156_v8 }
0x1a97   : > { %v5159_v45 = vpop.xlane.xlu0 %5158 }
0x1a98   : > { %12650 = vrcp.f32 %v5159_v45 }
0x1a9b   : > { %v5162_v46 = vpop.xlane.xlu1 %5161 }
0x1a9c   : > { %12652 = vrcp.f32 %v5162_v46 }
0x1a9e   : > { %v12649_v43 = vpop.eup %12648 }
0x1a9f   : > { %v5166_v44 = vmul.f32 %v12649_v43, %v12641_v27 }
0x1aa1   : > { %11841 = vmatpush3.xpose.msk.msra.mxu0 %vm1603_vm2, %v5166_v44 }
0x1aa2   : > { %11850 = vmatprep.subr.mxu0 %v13477_v1  ;;  %v12651_v48 = vpop.eup %12650 }
0x1aa3   : > { %v5168_v51 = vmul.f32 %v12651_v48, %v12643_v29  ;;  %v12215_v29 = vpack.c.bf16 %v5897_v23, %v5896_v22  ;;  %v11272_v22 = vld [vmem:[#allocation16 + $0x1] ss:$0 sm:$0xff] }
0x1aa6   : > { %v12653_v53 = vpop.eup %12652 }
0x1aa7   : > { %v5170_v55 = vmul.f32 %v12653_v53, %v12645_v32 }
0x1ab7   : > { %v5199_v50 = vpop.trf.xlu0 }
0x1ab8   : > { %11838 = vmatmul.mubr.msk.f32.vlgmr.msra.gmra.mrb[24].mxu1 %vm1603_vm2, %v5199_v50 }
0x1ab9   : > { %11846 = vmatpush3.xpose.msk.msra.mxu1 %vm1603_vm2, %v5168_v51  ;;  %11847 = vmatprep.mubr.msk.f32.mxu1 %vm13476_vm0, %v13477_v1 }
0x1aba   : > { %12211 = vmatprep.subr.bf16.mxu1 %v13475_v0 }
0x1abb   : > { %v5263_v52 = vpop.trf.xlu0 }
0x1abc   : > { %11848 = vmatmul.mubr.msk.f32.vlgmr.msra.gmra.mrb[26].mxu1 %vm1603_vm2, %v5263_v52 }
0x1abd   : > { %11863 = vmatprep.mubr.msk.f32.mxu1 %vm13476_vm0, %v13477_v1  ;;  %12213 = vmatpush3.bf16.msra.mxu1 %v12212_v4  ;;  %v6092_v4 = vld [vmem:[#allocation22] sm:$0xff] }
0x1abe   : > { %12214 = vmatprep.subr.bf16.mxu1 %v13475_v0 }
0x1abf   : > { %v5295_v56 = vpop.trf.xlu0 }
0x1ac1   : > { %v5231_v54 = vpop.trf.xlu1  ;;  %12216 = vmatpush3.bf16.msra.mxu1 %v12215_v29 }
0x1ac2   : > { %11843 = vmatmul.mubr.msk.f32.vlgmr.msra.gmra.mrb[34].mxu0 %vm1603_vm2, %v5231_v54  ;;  %12223 = vmatprep.subr.bf16.mxu1 %v13475_v0  ;;  %v11269_v54 = vld [vmem:[#allocation13 + $0x1] ss:$0 sm:$0xff] }
0x1ac3   : > { %11851 = vmatpush3.xpose.msk.msra.mxu0 %vm1603_vm2, %v5170_v55  ;;  %11852 = vmatprep.mubr.msk.f32.mxu0 %vm13476_vm0, %v13477_v1  ;;  %v4568_v55 = vadd.f32 %v11269_v54, %v14426_v49 }
0x1ac4   : > { %12217 = vmatprep.subr.bf16.mxu0 %v13475_v0 }
0x1ac6   : > { %11853 = vmatmul.mubr.msk.f32.vlgmr.msra.gmra.mrb[36].mxu0 %vm1603_vm2, %v5295_v56  ;;  %v4571_v56 = vadd.f32 %v4568_v55, %v14395_v26 }
0x1ac7   : > { %11874 = vmatprep.mubr.msk.f32.mxu0 %vm13476_vm0, %v13477_v1 }
0x1b8b   : > { %v5383_v57 = vpop.f32.mrb[24].mxu1 }
0x1b8c   : > { %v11839_v58 = vpop.f32.mrb[25].mxu1  ;;  %5615 = vxpose.xlu1.b32.start.end [1/1] (short) (narrow) %v5383_v57, 8  ;;  %v4576_v57 = vsel %vm1382_vm1, %v4571_v56, 0.0 }
0x1b8f   : > { %v5535_v59 = vpop.f32.mrb[26].mxu1 }
0x1b90   : > { %v11849_v60 = vpop.f32.mrb[27].mxu1  ;;  %5679 = vxpose.xlu1.b32.start.end [1/1] (short) (narrow) %v5535_v59, 8 }
0x1b95   : > { %v5459_v61 = vpop.f32.mrb[34].mxu0 }
0x1b96   : > { %5647 = vxpose.xlu0.b32.start.end [1/1] (short) (narrow) %v5459_v61, 8  ;;  %v11844_v62 = vpop.f32.mrb[35].mxu0 }
0x1b99   : > { %v5611_v63 = vpop.f32.mrb[36].mxu0 }
0x1b9a   : > { %5711 = vxpose.xlu0.b32.start.end [1/1] (short) (narrow) %v5611_v63, 8  ;;  %v11854_v2 = vpop.f32.mrb[37].mxu0 }
0x1c0c   : > { %v5631_v5 = vpop.trf.xlu1 }
0x1c10   : > { %v5695_v6 = vpop.trf.xlu1 }
0x1c11   : > { %v5743_v9 = vcombine.low %v5631_v5, %v5695_v6  ;;  %v5744_v10 = vcombine.high %v5631_v5, %v5695_v6  ;;  %v6093_v5 = vld [vmem:[#allocation22 + $0x8] sm:$0xff] }
0x1c12   : > { %v12224_v6 = vpack.c.bf16 %v6093_v5, %v6092_v4 }
0x1c13   : > { %v5751_v14 = vrot.slane %v5743_v9, %v14215_v41  ;;  %v5758_v15 = vrot.slane %v5744_v10, %v14215_v41  ;;  %v6095_v9 = vld [vmem:[#allocation22 + $0x18] sm:$0xff] }
0x1c16   : > { %v5663_v7 = vpop.trf.xlu0 }
0x1c1a   : > { %v5727_v11 = vpop.trf.xlu0 }
0x1c1b   : > { %v5759_v12 = vcombine.low %v5663_v7, %v5727_v11  ;;  %v5760_v13 = vcombine.high %v5663_v7, %v5727_v11  ;;  %v6094_v7 = vld [vmem:[#allocation22 + $0x10] sm:$0xff]  ;;  %v11289_v11 = vld [vmem:[#allocation19] ss:$0 sm:$0xff] }
0x1c1c   : > { %v12227_v10 = vpack.c.bf16 %v6095_v9, %v6094_v7 }
0x1c1d   : > { %v5767_v16 = vrot.slane %v5759_v12, %v14215_v41  ;;  %v5774_v17 = vrot.slane %v5760_v13, %v14215_v41 }
0x1c1f   : > { %v5775_v18 = vcombine.low %v5751_v14, %v5767_v16  ;;  %v5776_v19 = vcombine.high %v5751_v14, %v5767_v16  ;;  %v5791_v20 = vcombine.low %v5758_v15, %v5774_v17  ;;  %v5792_v21 = vcombine.high %v5758_v15, %v5774_v17 }
0x1c21   : > { %v5783_v24 = vrot.slane %v5775_v18, %v14217_v47  ;;  %v5790_v25 = vrot.slane %v5776_v19, %v14217_v47  ;;  %v5799_v27 = vrot.slane %v5791_v20, %v14217_v47  ;;  %v5806_v28 = vrot.slane %v5792_v21, %v14217_v47  ;;  %v11271_v20 = vld [vmem:[#allocation14 + $0x1] ss:$0 sm:$0xff] }
0x1c23   : > { %v5811_v31 = vcombine.low %v5783_v24, %v5790_v25  ;;  %v11287_v32 = vcombine.high %v5783_v24, %v5790_v25  ;;  %v5827_v33 = vcombine.low %v5799_v27, %v5806_v28  ;;  %v11288_v34 = vcombine.high %v5799_v27, %v5806_v28 }
0x1c25   : > { %v5818_v35 = vrot.slane %v5811_v31, %v14215_v41  ;;  %v5826_v37 = vrot.slane %v11287_v32, %v14215_v41  ;;  %v5834_v38 = vrot.slane %v5827_v33, %v14215_v41  ;;  %v5842_v39 = vrot.slane %v11288_v34, %v14215_v41  ;;  %v6008_v32 = vld [vmem:[%s15096_s23] sm:$0xff]  ;;  %v6009_v33 = vld [vmem:[%s15096_s23 + $0x8] sm:$0xff] }
0x1c26   : > { %v12218_v34 = vpack.c.bf16 %v6009_v33, %v6008_v32 }
0x1c27   : > { %v5844_v40 = vcombine.high %v5818_v35, %v5826_v37  ;;  %v5860_v42 = vcombine.high %v5834_v38, %v5842_v39  ;;  %v5843_v8 = vcombine.low %v5818_v35, %v5826_v37  ;;  %v5859_v43 = vcombine.low %v5834_v38, %v5842_v39  ;;  %v6010_v35 = vld [vmem:[%s15096_s23 + $0x10] sm:$0xff]  ;;  %v6011_v37 = vld [vmem:[%s15096_s23 + $0x18] sm:$0xff] }
0x1c28   : > { %12219 = vmatpush3.bf16.msra.mxu0 %v12218_v34  ;;  %v12221_v38 = vpack.c.bf16 %v6011_v37, %v6010_v35  ;;  %v11295_v39 = vld [vmem:[#allocation23] ss:$0 sm:$0xff] }
0x1c29   : > { %v5858_v44 = vrot.slane %v5844_v40, %v14217_v47  ;;  %v5874_v45 = vrot.slane %v5860_v42, %v14217_v47  ;;  %v5851_v46 = vrot.slane %v5843_v8, %v14217_v47  ;;  %v5867_v48 = vrot.slane %v5859_v43, %v14217_v47  ;;  %12220 = vmatprep.subr.bf16.mxu0 %v13475_v0 }
0x1c2b   : > { %v5877_v50 = vcombine.low %v5858_v44, %v5874_v45  ;;  %v5876_v51 = vcombine.high %v5851_v46, %v5867_v48  ;;  %v5875_v52 = vcombine.low %v5851_v46, %v5867_v48  ;;  %v5878_v53 = vcombine.high %v5858_v44, %v5874_v45  ;;  %v11291_v48 = vld [vmem:[#allocation28] ss:$0 sm:$0xff] }
0x1c2c   : > { %12222 = vmatpush3.bf16.msra.mxu0 %v12221_v38 }
0x1c2d   : > { %5884 = vrot.lane.b32.xlu0 %v5877_v50, %s15094_s8  ;;  %5880 = vrot.lane.b32.xlu1 %v5876_v51, %s15095_s14  ;;  %v11292_v51 = vld [vmem:[#allocation29] ss:$0 sm:$0xff] }
0x1c2e   : > { %11888 = vmatprep.subr.mxu0 %v13477_v1 }
0x1c31   : > { %5888 = vrot.lane.b32.xlu1 %v5878_v53, %s15089_s9 }
0x1c55   : > { %4577 = vadd.xlane.f32.xlu1 %v4576_v57  ;;  %v11293_v57 = vld [vmem:[#allocation20] ss:$0 sm:$0xff] }
0x1c9f   : > { %v5881_v58 = vpop.permute.xlu1 %5880  ;;  %v5885_v59 = vpop.permute.xlu0 %5884 }
0x1ca0   : > { %v5891_v60 = vsel %vm1603_vm2, %v5875_v52, %v5881_v58 }
0x1ca1   : > { %v5892_v62 = vsel %vm2661_vm3, %v5891_v60, %v5885_v59 }
0x1ca3   : > { %v5889_v61 = vpop.permute.xlu1 %5888 }
0x1ca4   : > { %v5893_v63 = vsel %vm2663_vm4, %v5892_v62, %v5889_v61 }
0x1ca5   : > { %11864 = vmatmul.mubr.msk.f32.vlgmr.msra.gmra.mrb[28].mxu1 %vm1382_vm1, %v5893_v63 }
0x1ca6   : > { %11885 = vmatprep.mubr.msk.f32.mxu1 %vm13476_vm0, %v13477_v1  ;;  %12225 = vmatpush3.bf16.msra.mxu1 %v12224_v6 }
0x1ca7   : > { %12226 = vmatprep.subr.bf16.mxu1 %v13475_v0 }
0x1caa   : > { %12228 = vmatpush3.bf16.msra.mxu1 %v12227_v10 }
0x1cab   : > { %11898 = vmatprep.subr.mxu1 %v13477_v1 }
0x1ce2   : > { %v4578_v49 = vpop.xlane.xlu1 %4577 }
0x1ce3   : > { %v4579_v2 = vmul.f32 0.03125, %v4578_v49 }
0x1ce5   : > { %v4580_v26 = vsub.f32 %v4571_v56, %v4579_v2 }
0x1ce7   : > { %v4581_v36 = vmul.f32 %v4580_v26, %v4580_v26 }
0x1ce9   : > { %v4582_v3 = vsel %vm1382_vm1, %v4581_v36, 0.0 }
0x1cea   : > { %4583 = vadd.xlane.f32.xlu1 %v4582_v3 }
0x1d77   : > { %v4584_v12 = vpop.xlane.xlu1 %4583 }
0x1d78   : > { %v4585_v13 = vmul.f32 0.03125, %v4584_v12  ;;  %v5974_v14 = vpop.f32.mrb[28].mxu1 }
0x1d79   : > { %v5975_v15 = vadd.f32 %v11289_v11, %v5974_v14  ;;  %v11865_v16 = vpop.f32.mrb[29].mxu1 }
0x1d7a   : > { %v4586_v17 = vadd.f32 1e-05, %v4585_v13 }
0x1d7b   : > { %v5980_v18 = vsel %vm1382_vm1, %v5975_v15, 0.0 }
0x1d7c   : > { %12654 = vrsqrt.f32 %v4586_v17  ;;  %5981 = vadd.xlane.f32.xlu0 %v5980_v18 }
0x1d86   : > { %v12655_v19 = vpop.eup %12654 }
0x1d87   : > { %v4588_v21 = vmul.f32 %v12655_v19, %v4580_v26 }
0x1d89   : > { %v4595_v23 = vmul.f32 %v11271_v20, %v4588_v21 }
0x1d8b   : > { %v14514_v24 = vadd.f32 %v11272_v22, %v4595_v23 }
0x1d8d   : > { %11886 = vmatmul.mubr.msk.f32.vlgmr.msra.gmra.mrb[30].mxu1 %vm1382_vm1, %v14514_v24 }
0x1d8e   : > { %11900 = vmatprep.mubr.msk.f32.mxu1 %vm13476_vm0, %v13477_v1 }
0x1e09   : > { %v5982_v25 = vpop.xlane.xlu0 %5981 }
0x1e0a   : > { %v5983_v27 = vmul.f32 0.03125, %v5982_v25 }
0x1e0c   : > { %v5984_v28 = vsub.f32 %v5975_v15, %v5983_v27 }
0x1e0e   : > { %v5985_v29 = vmul.f32 %v5984_v28, %v5984_v28 }
0x1e10   : > { %v5986_v31 = vsel %vm1382_vm1, %v5985_v29, 0.0 }
0x1e11   : > { %5987 = vadd.xlane.f32.xlu0 %v5986_v31 }
0x1e60   : > { %v6172_v40 = vpop.f32.mrb[30].mxu1 }
0x1e61   : > { %v14527_v42 = vadd.f32 %v11295_v39, %v6172_v40  ;;  %v11887_v8 = vpop.f32.mrb[31].mxu1 }
0x1e63   : > { %6187 = vrot.lane.b32.xlu0 %v14527_v42, %s15097_s2  ;;  %6184 = vrot.lane.b32.xlu1 %v14527_v42, %s15098_s3 }
0x1e67   : > { %6190 = vrot.lane.b32.xlu1 %v14527_v42, %s15099_s4 }
0x1e81   : > { %6193 = vxpose.xlu0.b32.start.end [1/1] (short) (narrow) %v14527_v42, 8 }
0x1e9e   : > { %v5988_v43 = vpop.xlane.xlu0 %5987 }
0x1e9f   : > { %v5989_v44 = vmul.f32 0.03125, %v5988_v43 }
0x1ea1   : > { %v5990_v45 = vadd.f32 1e-05, %v5989_v44 }
0x1ea3   : > { %12656 = vrsqrt.f32 %v5990_v45 }
0x1ead   : > { %v12657_v46 = vpop.eup %12656 }
0x1eae   : > { %v5992_v50 = vmul.f32 %v12657_v46, %v5984_v28 }
0x1eb0   : > { %v5999_v52 = vmul.f32 %v11291_v48, %v5992_v50 }
0x1eb2   : > { %v6006_v53 = vadd.f32 %v11292_v51, %v5999_v52 }
0x1eb4   : > { %v14537_v54 = vadd.f32 %v6006_v53, %v14406_v30 }
0x1eb6   : > { %11875 = vmatmul.mubr.msk.f32.vlgmr.msra.gmra.mrb[38].mxu0 %vm1382_vm1, %v14537_v54 }
0x1eb7   : > { %11890 = vmatprep.mubr.msk.f32.mxu0 %vm13476_vm0, %v13477_v1 }
0x1ed5   : > { %v6188_v55 = vpop.permute.xlu0 %6187  ;;  %v6185_v30 = vpop.permute.xlu1 %6184 }
0x1ed9   : > { %v6191_v61 = vpop.permute.xlu1 %6190 }
0x1f01   : > { %v6209_v56 = vpop.trf.xlu0 }
0x1f02   : > { %11889 = vmatpush3.msra.mxu0 %v6209_v56 }
0x1f03   : > { %11893 = vmatprep.subr.mxu0 %v13477_v1 }
0x1f89   : > { %v6088_v58 = vpop.f32.mrb[38].mxu0 }
0x1f8a   : > { %v6089_v59 = vadd.f32 %v11293_v57, %v6088_v58  ;;  %v11876_v60 = vpop.f32.mrb[39].mxu0 }
0x1f8c   : > { %6179 = vrot.lane.b32.xlu0 %v6089_v59, %s15097_s2  ;;  %6177 = vrot.lane.b32.xlu1 %v6089_v59, %s15098_s3 }
0x1f8d   : > { %11891 = vmatmul.mubr.msk.f32.vlgmr.msra.gmra.mrb[40].mxu0 %vm1603_vm2, %v6089_v59 }
0x1f8e   : > { %11895 = vmatprep.mubr.msk.f32.mxu0 %vm13476_vm0, %v13477_v1 }
0x1f90   : > { %6181 = vrot.lane.b32.xlu1 %v6089_v59, %s15099_s4 }
0x1faa   : > { %6257 = vxpose.xlu0.b32.start.end [1/1] (short) (narrow) %v6188_v55, 8 }
0x1fae   : > { %6289 = vxpose.xlu0.b32.start.end [1/1] (short) (narrow) %v6191_v61, 8 }
0x1fb9   : > { %6225 = vxpose.xlu1.b32.start.end [1/1] (short) (narrow) %v6185_v30, 8 }
0x1ffe   : > { %v6180_v62 = vpop.permute.xlu0 %6179  ;;  %v6178_v49 = vpop.permute.xlu1 %6177 }
0x2002   : > { %v6182_v2 = vpop.permute.xlu1 %6181 }
0x202a   : > { %v6273_v63 = vpop.trf.xlu0 }
0x202b   : > { %11899 = vmatpush3.msra.mxu1 %v6273_v63 }
0x202c   : > { %11901 = vmatmul.mubr.msk.f32.vlgmr.msra.gmra.mrb[32].mxu1 %vm1603_vm2, %v6180_v62  ;;  %11908 = vmatprep.subr.mxu1 %v13477_v1 }
0x202d   : > { %11910 = vmatprep.mubr.msk.f32.mxu1 %vm13476_vm0, %v13477_v1 }
0x202e   : > { %v6305_v36 = vpop.trf.xlu0 }
0x2039   : > { %v6241_v26 = vpop.trf.xlu1 }
0x203a   : > { %11894 = vmatpush3.msra.mxu0 %v6241_v26 }
0x203b   : > { %11896 = vmatmul.mubr.msk.f32.vlgmr.msra.gmra.mrb[42].mxu0 %vm1603_vm2, %v6178_v49  ;;  %11903 = vmatprep.subr.mxu0 %v13477_v1 }
0x203c   : > { %11904 = vmatpush3.msra.mxu0 %v6305_v36  ;;  %11905 = vmatprep.mubr.msk.f32.mxu0 %vm13476_vm0, %v13477_v1 }
0x203d   : > { %11913 = vmatprep.subr.mxu0 %v13477_v1 }
0x203f   : > { %11906 = vmatmul.mubr.msk.f32.vlgmr.msra.gmra.mrb[44].mxu0 %vm1603_vm2, %v6182_v2 }
0x2040   : > { %11915 = vmatprep.mubr.msk.f32.mxu0 %vm13476_vm0, %v13477_v1 }
0x2060   : > { %v6389_v3 = vpop.f32.mrb[40].mxu0 }
0x2061   : > { %v6609_v4 = vmul.f32 0.35355338, %v6389_v3  ;;  %v11892_v5 = vpop.f32.mrb[41].mxu0 }
0x2063   : > { %v6613_v6 = vsel %vm1603_vm2, %v6609_v4, -inf }
0x2064   : > { %6614 = vmax.xlane.f32.xlu0 %v6613_v6 }
0x20f1   : > { %v6615_v20 = vpop.xlane.xlu0 %6614 }
0x20f2   : > { %v6625_v21 = vsub.f32 %v6609_v4, %v6615_v20 }
0x20f4   : > { %v6629_v22 = vmul.f32 1.442695, %v6625_v21 }
0x20f6   : > { %12658 = vpow2.f32 %v6629_v22 }
0x20ff   : > { %v6533_v7 = vpop.f32.mrb[32].mxu1 }
0x2100   : > { %v11902_v9 = vpop.f32.mrb[33].mxu1  ;;  %v6611_v13 = vmul.f32 0.35355338, %v6533_v7  ;;  %v12659_v23 = vpop.eup %12658 }
0x2101   : > { %v6637_v25 = vsel %vm1603_vm2, %v12659_v23, 0.0 }
0x2102   : > { %v6619_v18 = vsel %vm1603_vm2, %v6611_v13, -inf }
0x210e   : > { %v6461_v10 = vpop.f32.mrb[42].mxu0 }
0x210f   : > { %v6610_v11 = vmul.f32 0.35355338, %v6461_v10  ;;  %v11897_v12 = vpop.f32.mrb[43].mxu0  ;;  %v7380_v10 = vld [vmem:[#allocation25] sm:$0xff] }
0x2111   : > { %v6616_v14 = vsel %vm1603_vm2, %v6610_v11, -inf }
0x2112   : > { %6617 = vmax.xlane.f32.xlu1 %v6616_v14  ;;  %v6605_v15 = vpop.f32.mrb[44].mxu0 }
0x2113   : > { %v6612_v16 = vmul.f32 0.35355338, %v6605_v15  ;;  %v11907_v17 = vpop.f32.mrb[45].mxu0 }
0x2115   : > { %v6622_v19 = vsel %vm1603_vm2, %v6612_v16, -inf }
0x2116   : > { %6620 = vmax.xlane.f32.xlu1 %v6619_v18  ;;  %6623 = vmax.xlane.f32.xlu0 %v6622_v19 }
0x2127   : > { %6657 = vrot.lane.b32.xlu1 %v14527_v42, %s15100_s11 }
0x212b   : > { %6661 = vrot.lane.b32.xlu1 %v6188_v55, %s15100_s11 }
0x212c   : > { %6659 = vrot.lane.b32.xlu0 %v6185_v30, %s15100_s11 }
0x212f   : > { %6663 = vrot.lane.b32.xlu1 %v6191_v61, %s15100_s11 }
0x214b   : > { %6638 = vadd.xlane.f32.xlu0 %v6637_v25 }
0x219f   : > { %v6618_v27 = vpop.xlane.xlu1 %6617 }
0x21a0   : > { %v6626_v28 = vsub.f32 %v6610_v11, %v6618_v27  ;;  %v7381_v11 = vld [vmem:[#allocation25 + $0x8] sm:$0xff] }
0x21a1   : > { %v12230_v12 = vpack.c.bf16 %v7381_v11, %v7380_v10 }
0x21a2   : > { %v6631_v29 = vmul.f32 1.442695, %v6626_v28 }
0x21a3   : > { %v6621_v31 = vpop.xlane.xlu1 %6620  ;;  %v6624_v32 = vpop.xlane.xlu0 %6623 }
0x21a4   : > { %12660 = vpow2.f32 %v6631_v29  ;;  %v6627_v33 = vsub.f32 %v6611_v13, %v6621_v31  ;;  %v6628_v34 = vsub.f32 %v6612_v16, %v6624_v32  ;;  %v7382_v32 = vld [vmem:[#allocation25 + $0x10] sm:$0xff] }
0x21a6   : > { %v6633_v35 = vmul.f32 1.442695, %v6627_v33  ;;  %v6635_v37 = vmul.f32 1.442695, %v6628_v34  ;;  %v7383_v33 = vld [vmem:[#allocation25 + $0x18] sm:$0xff] }
0x21a7   : > { %v6660_v44 = vpop.permute.xlu0 %6659  ;;  %v6658_v46 = vpop.permute.xlu1 %6657 }
0x21a8   : > { %12662 = vpow2.f32 %v6633_v35 }
0x21a9   : > { %12664 = vpow2.f32 %v6635_v37 }
0x21ab   : > { %v6662_v48 = vpop.permute.xlu1 %6661 }
0x21ae   : > { %v12661_v38 = vpop.eup %12660 }
0x21af   : > { %v6640_v39 = vsel %vm1603_vm2, %v12661_v38, 0.0  ;;  %v6664_v52 = vpop.permute.xlu1 %6663 }
0x21b0   : > { %6641 = vadd.xlane.f32.xlu1 %v6640_v39  ;;  %v12233_v39 = vpack.c.bf16 %v7383_v33, %v7382_v32 }
0x21b2   : > { %v12663_v40 = vpop.eup %12662 }
0x21b3   : > { %v6643_v42 = vsel %vm1603_vm2, %v12663_v40, 0.0  ;;  %v12665_v8 = vpop.eup %12664 }
0x21b4   : > { %6644 = vadd.xlane.f32.xlu0 %v6643_v42  ;;  %v6646_v43 = vsel %vm1603_vm2, %v12665_v8, 0.0 }
0x21b8   : > { %6647 = vadd.xlane.f32.xlu0 %v6646_v43 }
0x21d8   : > { %v6639_v45 = vpop.xlane.xlu0 %6638 }
0x21d9   : > { %12666 = vrcp.f32 %v6639_v45 }
0x21e3   : > { %v12667_v50 = vpop.eup %12666  ;;  %6669 = vxpose.xlu1.b32.start.end [1/1] (short) (narrow) %v6658_v46, 8 }
0x21e4   : > { %v6650_v51 = vmul.f32 %v12667_v50, %v12659_v23 }
0x21e5   : > { %6701 = vxpose.xlu0.b32.start.end [1/1] (short) (narrow) %v6660_v44, 8 }
0x21e6   : > { %11909 = vmatpush3.xpose.msk.msra.mxu1 %vm1603_vm2, %v6650_v51 }
0x21e7   : > { %6765 = vxpose.xlu1.b32.start.end [1/1] (short) (narrow) %v6664_v52, 8  ;;  %11918 = vmatprep.subr.mxu1 %v13477_v1 }
0x21e9   : > { %6733 = vxpose.xlu0.b32.start.end [1/1] (short) (narrow) %v6662_v48, 8 }
0x223d   : > { %v6642_v53 = vpop.xlane.xlu1 %6641 }
0x223e   : > { %12668 = vrcp.f32 %v6642_v53 }
0x2241   : > { %v6645_v57 = vpop.xlane.xlu0 %6644 }
0x2242   : > { %12670 = vrcp.f32 %v6645_v57 }
0x2245   : > { %v6648_v58 = vpop.xlane.xlu0 %6647 }
0x2246   : > { %12672 = vrcp.f32 %v6648_v58 }
0x2248   : > { %v12669_v55 = vpop.eup %12668 }
0x2249   : > { %v6652_v56 = vmul.f32 %v12669_v55, %v12661_v38 }
0x224b   : > { %11914 = vmatpush3.xpose.msk.msra.mxu0 %vm1603_vm2, %v6652_v56 }
0x224c   : > { %11923 = vmatprep.subr.mxu0 %v13477_v1  ;;  %v12671_v59 = vpop.eup %12670 }
0x224d   : > { %v6654_v30 = vmul.f32 %v12671_v59, %v12663_v40 }
0x2250   : > { %v12673_v60 = vpop.eup %12672 }
0x2251   : > { %v6656_v62 = vmul.f32 %v12673_v60, %v12665_v8 }
0x2263   : > { %v6685_v61 = vpop.trf.xlu1 }
0x2264   : > { %11911 = vmatmul.mubr.msk.f32.vlgmr.msra.gmra.mrb[34].mxu1 %vm1603_vm2, %v6685_v61 }
0x2265   : > { %11919 = vmatpush3.xpose.msk.msra.mxu1 %vm1603_vm2, %v6654_v30  ;;  %v6717_v63 = vpop.trf.xlu0  ;;  %11920 = vmatprep.mubr.msk.f32.mxu1 %vm13476_vm0, %v13477_v1 }
0x2266   : > { %11916 = vmatmul.mubr.msk.f32.vlgmr.msra.gmra.mrb[46].mxu0 %vm1603_vm2, %v6717_v63  ;;  %12229 = vmatprep.subr.bf16.mxu1 %v13475_v0 }
0x2267   : > { %11924 = vmatpush3.xpose.msk.msra.mxu0 %vm1603_vm2, %v6656_v62  ;;  %v6781_v49 = vpop.trf.xlu1  ;;  %11925 = vmatprep.mubr.msk.f32.mxu0 %vm13476_vm0, %v13477_v1 }
0x2268   : > { %12235 = vmatprep.subr.bf16.mxu0 %v13475_v0 }
0x2269   : > { %v6749_v2 = vpop.trf.xlu0 }
0x226a   : > { %11921 = vmatmul.mubr.msk.f32.vlgmr.msra.gmra.mrb[36].mxu1 %vm1603_vm2, %v6749_v2  ;;  %11926 = vmatmul.mubr.msk.f32.vlgmr.msra.gmra.mrb[48].mxu0 %vm1603_vm2, %v6781_v49 }
0x226b   : > { %11936 = vmatprep.mubr.msk.f32.mxu1 %vm13476_vm0, %v13477_v1  ;;  %11947 = vmatprep.mubr.msk.f32.mxu0 %vm13476_vm0, %v13477_v1 }
0x226c   : > { %12231 = vmatpush3.bf16.msra.mxu1 %v12230_v12 }
0x226d   : > { %12232 = vmatprep.subr.bf16.mxu1 %v13475_v0 }
0x2270   : > { %12234 = vmatpush3.bf16.msra.mxu1 %v12233_v39  ;;  %v11314_v39 = vld [vmem:[#allocation32] ss:$0 sm:$0xff] }
0x2271   : > { %12241 = vmatprep.subr.bf16.mxu1 %v13475_v0 }
0x2337   : > { %v6869_v26 = vpop.f32.mrb[34].mxu1 }
0x2338   : > { %v11912_v36 = vpop.f32.mrb[35].mxu1  ;;  %7101 = vxpose.xlu0.b32.start.end [1/1] (short) (narrow) %v6869_v26, 8 }
0x2339   : > { %v6945_v3 = vpop.f32.mrb[46].mxu0 }
0x233a   : > { %7133 = vxpose.xlu1.b32.start.end [1/1] (short) (narrow) %v6945_v3, 8  ;;  %v11917_v4 = vpop.f32.mrb[47].mxu0  ;;  %v11311_v3 = vld [vmem:[#allocation26] ss:$0 sm:$0xff] }
0x233d   : > { %v7021_v5 = vpop.f32.mrb[36].mxu1  ;;  %v7097_v6 = vpop.f32.mrb[48].mxu0 }
0x233e   : > { %7165 = vxpose.xlu0.b32.start.end [1/1] (short) (narrow) %v7021_v5, 8  ;;  %v11922_v7 = vpop.f32.mrb[37].mxu1  ;;  %7197 = vxpose.xlu1.b32.start.end [1/1] (short) (narrow) %v7097_v6, 8  ;;  %v11927_v9 = vpop.f32.mrb[49].mxu0 }
0x23b8   : > { %v7117_v13 = vpop.trf.xlu0 }
0x23ba   : > { %v7149_v14 = vpop.trf.xlu1 }
0x23be   : > { %v7181_v15 = vpop.trf.xlu0  ;;  %v7213_v16 = vpop.trf.xlu1 }
0x23bf   : > { %v7229_v17 = vcombine.low %v7117_v13, %v7181_v15  ;;  %v7230_v18 = vcombine.high %v7117_v13, %v7181_v15  ;;  %v7245_v19 = vcombine.low %v7149_v14, %v7213_v16  ;;  %v7246_v20 = vcombine.high %v7149_v14, %v7213_v16  ;;  %v7494_v14 = vld [vmem:[#allocation34] sm:$0xff]  ;;  %v7495_v15 = vld [vmem:[#allocation34 + $0x8] sm:$0xff] }
0x23c0   : > { %v12236_v16 = vpack.c.bf16 %v7495_v15, %v7494_v14 }
0x23c1   : > { %v7237_v21 = vrot.slane %v7229_v17, %v14215_v41  ;;  %v7244_v22 = vrot.slane %v7230_v18, %v14215_v41  ;;  %v7253_v23 = vrot.slane %v7245_v19, %v14215_v41  ;;  %v7260_v25 = vrot.slane %v7246_v20, %v14215_v41  ;;  %v7496_v17 = vld [vmem:[#allocation34 + $0x10] sm:$0xff]  ;;  %v7497_v18 = vld [vmem:[#allocation34 + $0x18] sm:$0xff]  ;;  %v7579_v20 = vld [vmem:[%s15101_s21] sm:$0xff] }
0x23c2   : > { %12237 = vmatpush3.bf16.msra.mxu0 %v12236_v16  ;;  %v12239_v19 = vpack.c.bf16 %v7497_v18, %v7496_v17 }
0x23c3   : > { %v7261_v27 = vcombine.low %v7237_v21, %v7253_v23  ;;  %v7262_v28 = vcombine.high %v7237_v21, %v7253_v23  ;;  %v7277_v29 = vcombine.low %v7244_v22, %v7260_v25  ;;  %v7278_v31 = vcombine.high %v7244_v22, %v7260_v25  ;;  %12238 = vmatprep.subr.bf16.mxu0 %v13475_v0  ;;  %v7580_v21 = vld [vmem:[%s15101_s21 + $0x8] sm:$0xff]  ;;  %v7581_v22 = vld [vmem:[%s15101_s21 + $0x10] sm:$0xff]  ;;  %v7582_v25 = vld [vmem:[%s15101_s21 + $0x18] sm:$0xff] }
0x23c4   : > { %v12242_v23 = vpack.c.bf16 %v7580_v21, %v7579_v20 }
0x23c5   : > { %v7269_v34 = vrot.slane %v7261_v27, %v14217_v47  ;;  %v7276_v35 = vrot.slane %v7262_v28, %v14217_v47  ;;  %v7285_v37 = vrot.slane %v7277_v29, %v14217_v47  ;;  %v7292_v38 = vrot.slane %v7278_v31, %v14217_v47  ;;  %v7583_v28 = vld [vmem:[%s15101_s21 + $0x20] sm:$0xff]  ;;  %v7584_v29 = vld [vmem:[%s15101_s21 + $0x28] sm:$0xff] }
0x23c6   : > { %12240 = vmatpush3.bf16.msra.mxu0 %v12239_v19  ;;  %v12245_v27 = vpack.c.bf16 %v7582_v25, %v7581_v22  ;;  %v12248_v31 = vpack.c.bf16 %v7584_v29, %v7583_v28 }
0x23c7   : > { %v7297_v40 = vcombine.low %v7269_v34, %v7276_v35  ;;  %v11309_v42 = vcombine.high %v7269_v34, %v7276_v35  ;;  %v7313_v8 = vcombine.low %v7285_v37, %v7292_v38  ;;  %v11310_v43 = vcombine.high %v7285_v37, %v7292_v38  ;;  %12253 = vmatprep.subr.bf16.mxu0 %v13475_v0  ;;  %v11313_v37 = vld [vmem:[#allocation31] ss:$0 sm:$0xff] }
0x23c9   : > { %v7304_v44 = vrot.slane %v7297_v40, %v14215_v41  ;;  %v7312_v45 = vrot.slane %v11309_v42, %v14215_v41  ;;  %v7320_v46 = vrot.slane %v7313_v8, %v14215_v41  ;;  %v7328_v48 = vrot.slane %v11310_v43, %v14215_v41  ;;  %v7585_v43 = vld [vmem:[%s15101_s21 + $0x30] sm:$0xff] }
0x23cb   : > { %v7330_v50 = vcombine.high %v7304_v44, %v7312_v45  ;;  %v7346_v51 = vcombine.high %v7320_v46, %v7328_v48  ;;  %v7329_v52 = vcombine.low %v7304_v44, %v7312_v45  ;;  %v7345_v53 = vcombine.low %v7320_v46, %v7328_v48  ;;  %v7586_v44 = vld [vmem:[%s15101_s21 + $0x38] sm:$0xff]  ;;  %v11319_v46 = vld [vmem:[%s15090_s13 + $0x20] sm:$0xff]  ;;  %v11320_v48 = vld [vmem:[%s15090_s13 + $0x28] sm:$0xff] }
0x23cc   : > { %v12251_v45 = vpack.c.bf16 %v7586_v44, %v7585_v43 }
0x23cd   : > { %v7344_v55 = vrot.slane %v7330_v50, %v14217_v47  ;;  %v7360_v56 = vrot.slane %v7346_v51, %v14217_v47  ;;  %v7337_v57 = vrot.slane %v7329_v52, %v14217_v47  ;;  %v7353_v58 = vrot.slane %v7345_v53, %v14217_v47 }
0x23ce   : > { %v12254_v50 = vpack.c.bf16 %v11320_v48, %v11319_v46 }
0x23cf   : > { %v7363_v59 = vcombine.low %v7344_v55, %v7360_v56  ;;  %v7362_v60 = vcombine.high %v7337_v57, %v7353_v58  ;;  %v7361_v30 = vcombine.low %v7337_v57, %v7353_v58  ;;  %v7364_v61 = vcombine.high %v7344_v55, %v7360_v56  ;;  %v11321_v56 = vld [vmem:[%s15090_s13 + $0x30] sm:$0xff]  ;;  %v11322_v57 = vld [vmem:[%s15090_s13 + $0x38] sm:$0xff] }
0x23d0   : > { %v12257_v58 = vpack.c.bf16 %v11322_v57, %v11321_v56 }
0x23d1   : > { %7370 = vrot.lane.b32.xlu1 %v7363_v59, %s15094_s8  ;;  %7366 = vrot.lane.b32.xlu0 %v7362_v60, %s15095_s14  ;;  %v11317_v59 = vld [vmem:[%s13652_s27] ss:$0 sm:$0xff] }
0x23d5   : > { %7374 = vrot.lane.b32.xlu1 %v7364_v61, %s15089_s9 }
0x2443   : > { %v7371_v62 = vpop.permute.xlu1 %7370  ;;  %v7367_v63 = vpop.permute.xlu0 %7366 }
0x2444   : > { %v7377_v49 = vsel %vm1603_vm2, %v7361_v30, %v7367_v63 }
0x2445   : > { %v7378_v26 = vsel %vm2661_vm3, %v7377_v49, %v7371_v62  ;;  %v11323_v62 = vld [vmem:[#allocation17 + $0x1] ss:$0 sm:$0xff] }
0x2447   : > { %v7375_v2 = vpop.permute.xlu1 %7374 }
0x2448   : > { %v7379_v36 = vsel %vm2663_vm4, %v7378_v26, %v7375_v2 }
0x2449   : > { %11937 = vmatmul.mubr.msk.f32.vlgmr.msra.gmra.mrb[38].mxu1 %vm1382_vm1, %v7379_v36 }
0x244a   : > { %11966 = vmatprep.mubr.msk.f32.mxu1 %vm13476_vm0, %v13477_v1  ;;  %12243 = vmatpush3.bf16.msra.mxu1 %v12242_v23 }
0x244b   : > { %12244 = vmatprep.subr.bf16.mxu1 %v13475_v0 }
0x244e   : > { %12246 = vmatpush3.bf16.msra.mxu1 %v12245_v27 }
0x244f   : > { %12247 = vmatprep.subr.bf16.mxu1 %v13475_v0 }
0x2452   : > { %12249 = vmatpush3.bf16.msra.mxu1 %v12248_v31 }
0x2453   : > { %12250 = vmatprep.subr.bf16.mxu1 %v13475_v0 }
0x2456   : > { %12252 = vmatpush3.bf16.msra.mxu1 %v12251_v45 }
0x2457   : > { %11990 = vmatprep.subr.mxu1 %v13477_v1 }
0x251c   : > { %v7460_v4 = vpop.f32.mrb[38].mxu1 }
0x251d   : > { %v7461_v5 = vadd.f32 %v11311_v3, %v7460_v4  ;;  %v11938_v6 = vpop.f32.mrb[39].mxu1 }
0x251f   : > { %v7466_v7 = vsel %vm1382_vm1, %v7461_v5, 0.0 }
0x2520   : > { %7467 = vadd.xlane.f32.xlu1 %v7466_v7 }
0x25ad   : > { %v7468_v9 = vpop.xlane.xlu1 %7467 }
0x25ae   : > { %v7469_v10 = vmul.f32 0.03125, %v7468_v9 }
0x25b0   : > { %v7470_v11 = vsub.f32 %v7461_v5, %v7469_v10 }
0x25b2   : > { %v7471_v12 = vmul.f32 %v7470_v11, %v7470_v11 }
0x25b4   : > { %v7472_v13 = vsel %vm1382_vm1, %v7471_v12, 0.0 }
0x25b5   : > { %7473 = vadd.xlane.f32.xlu0 %v7472_v13 }
0x2642   : > { %v7474_v32 = vpop.xlane.xlu0 %7473 }
0x2643   : > { %v7475_v33 = vmul.f32 0.03125, %v7474_v32 }
0x2645   : > { %v7476_v34 = vadd.f32 1e-05, %v7475_v33 }
0x2647   : > { %12674 = vrsqrt.f32 %v7476_v34 }
0x2651   : > { %v12675_v35 = vpop.eup %12674 }
0x2652   : > { %v7478_v38 = vmul.f32 %v12675_v35, %v7470_v11 }
0x2654   : > { %v7485_v40 = vmul.f32 %v11313_v37, %v7478_v38 }
0x2656   : > { %v7492_v42 = vadd.f32 %v11314_v39, %v7485_v40 }
0x2658   : > { %v7493_v8 = vadd.f32 %v7492_v42, %v14537_v54  ;;  %v11315_v54 = vld [vmem:[%s15102_s22] ss:$0 sm:$0xff] }
0x265a   : > { %11948 = vmatmul.mubr.msk.f32.vlgmr.msra.gmra.mrb[50].mxu0 %vm1382_vm1, %v7493_v8 }
0x265b   : > { %11977 = vmatprep.mubr.msk.f32.mxu0 %vm13476_vm0, %v13477_v1  ;;  %12255 = vmatpush3.bf16.msra.mxu0 %v12254_v50 }
0x265c   : > { %12256 = vmatprep.subr.bf16.mxu0 %v13475_v0 }
0x265f   : > { %12258 = vmatpush3.bf16.msra.mxu0 %v12257_v58 }
0x2660   : > { %11980 = vmatprep.subr.mxu0 %v13477_v1 }
0x272d   : > { %v7574_v51 = vpop.f32.mrb[50].mxu0 }
0x272e   : > { %v7575_v52 = vadd.f32 %v11315_v54, %v7574_v51  ;;  %v11949_v53 = vpop.f32.mrb[51].mxu0 }
0x2730   : > { %v7578_v55 = vmax.f32 %v7575_v52, 0.0 }
0x2732   : > { %11967 = vmatmul.mubr.msk.f32.vlgmr.msra.gmra.mrb[40].mxu1 %vm2880_vm5, %v7578_v55 }
0x2733   : > { %11992 = vmatprep.mubr.msk.f32.mxu1 %vm13476_vm0, %v13477_v1 }
0x2805   : > { %v7663_v60 = vpop.f32.mrb[40].mxu1 }
0x2806   : > { %v14653_v30 = vadd.f32 %v11317_v59, %v7663_v60  ;;  %v11968_v61 = vpop.f32.mrb[41].mxu1 }
0x2808   : > { %11978 = vmatmul.mubr.msk.f32.vlgmr.msra.gmra.mrb[52].mxu0 %vm1382_vm1, %v14653_v30 }
0x2809   : > { %11982 = vmatprep.mubr.msk.f32.mxu0 %vm13476_vm0, %v13477_v1 }
0x28db   : > { %v7749_v63 = vpop.f32.mrb[52].mxu0 }
0x28dc   : > { %v7750_v49 = vadd.f32 %v11323_v62, %v7749_v63  ;;  %v11979_v2 = vpop.f32.mrb[53].mxu0 }
0x28de   : > { %7756 = vrot.lane.b32.xlu1 %v7750_v49, %s15097_s2  ;;  %7754 = vrot.lane.b32.xlu0 %v7750_v49, %s15098_s3 }
0x28e2   : > { %7758 = vrot.lane.b32.xlu1 %v7750_v49, %s15099_s4  ;;  %7760 = vrot.lane.b32.xlu0 %v7750_v49, %s15100_s11 }
0x2950   : > { %v7757_v26 = vpop.permute.xlu1 %7756  ;;  %v7755_v36 = vpop.permute.xlu0 %7754 }
0x2951   : > { %7764 = vrot.lane.b32.xlu0 %v7757_v26, %s15100_s11  ;;  %7762 = vrot.lane.b32.xlu1 %v7755_v36, %s15100_s11 }
0x2954   : > { %v7759_v3 = vpop.permute.xlu1 %7758  ;;  %v7761_v4 = vpop.permute.xlu0 %7760 }
0x2955   : > { %7766 = vrot.lane.b32.xlu1 %v7759_v3, %s15100_s11 }
0x296f   : > { %7772 = vxpose.xlu0.b32.start.end [1/1] (short) (narrow) %v7761_v4, 8 }
0x29c3   : > { %v7763_v5 = vpop.permute.xlu1 %7762  ;;  %v7765_v6 = vpop.permute.xlu0 %7764 }
0x29c4   : > { %7804 = vxpose.xlu1.b32.start.end [1/1] (short) (narrow) %v7763_v5, 8  ;;  %7836 = vxpose.xlu0.b32.start.end [1/1] (short) (narrow) %v7765_v6, 8 }
0x29c7   : > { %v7767_v7 = vpop.permute.xlu1 %7766 }
0x29c8   : > { %7868 = vxpose.xlu0.b32.start.end [1/1] (short) (narrow) %v7767_v7, 8 }
0x29ef   : > { %v7788_v9 = vpop.trf.xlu0 }
0x29f0   : > { %11981 = vmatpush3.msra.mxu0 %v7788_v9 }
0x29f1   : > { %11983 = vmatmul.mubr.msk.f32.vlgmr.msra.gmra.mrb[54].mxu0 %vm1603_vm2, %v7750_v49  ;;  %11985 = vmatprep.subr.mxu0 %v13477_v1 }
0x29f2   : > { %11987 = vmatprep.mubr.msk.f32.mxu0 %vm13476_vm0, %v13477_v1 }
0x2a44   : > { %v7820_v10 = vpop.trf.xlu1  ;;  %v7852_v11 = vpop.trf.xlu0 }
0x2a45   : > { %11986 = vmatpush3.msra.mxu0 %v7820_v10  ;;  %11991 = vmatpush3.msra.mxu1 %v7852_v11 }
0x2a46   : > { %11988 = vmatmul.mubr.msk.f32.vlgmr.msra.gmra.mrb[56].mxu0 %vm1603_vm2, %v7755_v36  ;;  %11993 = vmatmul.mubr.msk.f32.vlgmr.msra.gmra.mrb[42].mxu1 %vm1603_vm2, %v7757_v26 }
0x2a47   : > { %11995 = vmatprep.subr.mxu0 %v13477_v1  ;;  %11997 = vmatprep.mubr.msk.f32.mxu0 %vm13476_vm0, %v13477_v1 }
0x2a48   : > { %v7884_v12 = vpop.trf.xlu0  ;;  %12000 = vmatprep.subr.mxu1 %v13477_v1  ;;  %12002 = vmatprep.mubr.msk.f32.mxu1 %vm13476_vm0, %v13477_v1 }
0x2a49   : > { %11996 = vmatpush3.msra.mxu0 %v7884_v12 }
0x2a4a   : > { %11998 = vmatmul.mubr.msk.f32.vlgmr.msra.gmra.mrb[58].mxu0 %vm1603_vm2, %v7759_v3  ;;  %12005 = vmatprep.subr.mxu0 %v13477_v1 }
0x2a4b   : > { %12007 = vmatprep.mubr.msk.f32.mxu0 %vm13476_vm0, %v13477_v1 }
0x2ac4   : > { %v7968_v13 = vpop.f32.mrb[54].mxu0 }
0x2ac5   : > { %v8188_v14 = vmul.f32 0.35355338, %v7968_v13  ;;  %v11984_v15 = vpop.f32.mrb[55].mxu0 }
0x2ac7   : > { %v8192_v16 = vsel %vm1603_vm2, %v8188_v14, -inf }
0x2ac8   : > { %8193 = vmax.xlane.f32.xlu0 %v8192_v16 }
0x2b19   : > { %v8040_v17 = vpop.f32.mrb[56].mxu0  ;;  %v8112_v18 = vpop.f32.mrb[42].mxu1 }
0x2b1a   : > { %v8189_v19 = vmul.f32 0.35355338, %v8040_v17  ;;  %v11989_v20 = vpop.f32.mrb[57].mxu0  ;;  %v11994_v21 = vpop.f32.mrb[43].mxu1  ;;  %v8190_v22 = vmul.f32 0.35355338, %v8112_v18 }
0x2b1b   : > { %v11340_v20 = vld [vmem:[%s15093_s6 + $0x28] sm:$0xff] }
0x2b1c   : > { %v8195_v23 = vsel %vm1603_vm2, %v8189_v19, -inf  ;;  %v8198_v29 = vsel %vm1603_vm2, %v8190_v22, -inf }
0x2b1d   : > { %8196 = vmax.xlane.f32.xlu1 %v8195_v23  ;;  %v8184_v25 = vpop.f32.mrb[58].mxu0 }
0x2b1e   : > { %v8191_v27 = vmul.f32 0.35355338, %v8184_v25  ;;  %v11999_v28 = vpop.f32.mrb[59].mxu0 }
0x2b20   : > { %v8201_v31 = vsel %vm1603_vm2, %v8191_v27, -inf }
0x2b21   : > { %8199 = vmax.xlane.f32.xlu1 %v8198_v29  ;;  %8202 = vmax.xlane.f32.xlu0 %v8201_v31 }
0x2b32   : > { %8236 = vrot.lane.b32.xlu1 %v7750_v49, %s15092_s10 }
0x2b36   : > { %8240 = vrot.lane.b32.xlu1 %v7757_v26, %s15092_s10 }
0x2b37   : > { %8238 = vrot.lane.b32.xlu0 %v7755_v36, %s15092_s10 }
0x2b3a   : > { %8242 = vrot.lane.b32.xlu1 %v7759_v3, %s15092_s10 }
0x2b55   : > { %v8194_v32 = vpop.xlane.xlu0 %8193 }
0x2b56   : > { %v8204_v33 = vsub.f32 %v8188_v14, %v8194_v32 }
0x2b58   : > { %v8208_v34 = vmul.f32 1.442695, %v8204_v33 }
0x2b5a   : > { %12676 = vpow2.f32 %v8208_v34 }
0x2b64   : > { %v12677_v35 = vpop.eup %12676 }
0x2b65   : > { %v8216_v37 = vsel %vm1603_vm2, %v12677_v35, 0.0 }
0x2b66   : > { %8217 = vadd.xlane.f32.xlu0 %v8216_v37 }
0x2baa   : > { %v8197_v38 = vpop.xlane.xlu1 %8196 }
0x2bab   : > { %v8205_v39 = vsub.f32 %v8189_v19, %v8197_v38  ;;  %v11339_v19 = vld [vmem:[%s15093_s6 + $0x20] sm:$0xff] }
0x2bac   : > { %v12260_v21 = vpack.c.bf16 %v11340_v20, %v11339_v19  ;;  %v11343_v19 = vld [vmem:[#allocation19 + $0x1] ss:$0 sm:$0xff] }
0x2bad   : > { %v8210_v40 = vmul.f32 1.442695, %v8205_v39 }
0x2bae   : > { %v8200_v42 = vpop.xlane.xlu1 %8199  ;;  %v8203_v8 = vpop.xlane.xlu0 %8202 }
0x2baf   : > { %12678 = vpow2.f32 %v8210_v40  ;;  %v8206_v43 = vsub.f32 %v8190_v22, %v8200_v42  ;;  %v8207_v44 = vsub.f32 %v8191_v27, %v8203_v8  ;;  %v11341_v8 = vld [vmem:[%s15093_s6 + $0x30] sm:$0xff] }
0x2bb1   : > { %v8212_v45 = vmul.f32 1.442695, %v8206_v43  ;;  %v8214_v46 = vmul.f32 1.442695, %v8207_v44  ;;  %v11342_v43 = vld [vmem:[%s15093_s6 + $0x38] sm:$0xff] }
0x2bb2   : > { %v8237_v55 = vpop.permute.xlu1 %8236  ;;  %v8239_v57 = vpop.permute.xlu0 %8238  ;;  %v12263_v44 = vpack.c.bf16 %v11342_v43, %v11341_v8 }
0x2bb3   : > { %12680 = vpow2.f32 %v8212_v45 }
0x2bb4   : > { %12682 = vpow2.f32 %v8214_v46 }
0x2bb6   : > { %v8241_v56 = vpop.permute.xlu1 %8240 }
0x2bb9   : > { %v12679_v48 = vpop.eup %12678 }
0x2bba   : > { %v8219_v50 = vsel %vm1603_vm2, %v12679_v48, 0.0  ;;  %v8243_v58 = vpop.permute.xlu1 %8242 }
0x2bbb   : > { %8220 = vadd.xlane.f32.xlu1 %v8219_v50 }
0x2bbd   : > { %v12681_v54 = vpop.eup %12680 }
0x2bbe   : > { %v8222_v51 = vsel %vm1603_vm2, %v12681_v54, 0.0  ;;  %v12683_v52 = vpop.eup %12682 }
0x2bbf   : > { %8223 = vadd.xlane.f32.xlu0 %v8222_v51  ;;  %v8225_v53 = vsel %vm1603_vm2, %v12683_v52, 0.0 }
0x2bc3   : > { %8226 = vadd.xlane.f32.xlu0 %v8225_v53 }
0x2bee   : > { %8248 = vxpose.xlu1.b32.start.end [1/1] (short) (narrow) %v8237_v55, 8 }
0x2bf0   : > { %8280 = vxpose.xlu0.b32.start.end [1/1] (short) (narrow) %v8239_v57, 8 }
0x2bf2   : > { %8344 = vxpose.xlu1.b32.start.end [1/1] (short) (narrow) %v8243_v58, 8 }
0x2bf3   : > { %v8218_v59 = vpop.xlane.xlu0 %8217 }
0x2bf4   : > { %12684 = vrcp.f32 %v8218_v59  ;;  %8312 = vxpose.xlu0.b32.start.end [1/1] (short) (narrow) %v8241_v56, 8 }
0x2bfe   : > { %v12685_v60 = vpop.eup %12684 }
0x2bff   : > { %v8229_v61 = vmul.f32 %v12685_v60, %v12677_v35 }
0x2c01   : > { %12001 = vmatpush3.xpose.msk.msra.mxu1 %vm1603_vm2, %v8229_v61 }
0x2c02   : > { %12010 = vmatprep.subr.mxu1 %v13477_v1 }
0x2c48   : > { %v8221_v62 = vpop.xlane.xlu1 %8220 }
0x2c49   : > { %12686 = vrcp.f32 %v8221_v62 }
0x2c4c   : > { %v8224_v2 = vpop.xlane.xlu0 %8223 }
0x2c4d   : > { %12688 = vrcp.f32 %v8224_v2 }
0x2c50   : > { %v8227_v26 = vpop.xlane.xlu0 %8226 }
0x2c51   : > { %12690 = vrcp.f32 %v8227_v26 }
0x2c53   : > { %v12687_v63 = vpop.eup %12686 }
0x2c54   : > { %v8231_v49 = vmul.f32 %v12687_v63, %v12679_v48 }
0x2c56   : > { %12006 = vmatpush3.xpose.msk.msra.mxu0 %vm1603_vm2, %v8231_v49 }
0x2c57   : > { %12015 = vmatprep.subr.mxu0 %v13477_v1  ;;  %v12689_v36 = vpop.eup %12688 }
0x2c58   : > { %v8233_v4 = vmul.f32 %v12689_v36, %v12681_v54 }
0x2c5b   : > { %v12691_v3 = vpop.eup %12690 }
0x2c5c   : > { %v8235_v6 = vmul.f32 %v12691_v3, %v12683_v52 }
0x2c6e   : > { %v8264_v5 = vpop.trf.xlu1 }
0x2c6f   : > { %12003 = vmatmul.mubr.msk.f32.vlgmr.msra.gmra.mrb[44].mxu1 %vm1603_vm2, %v8264_v5 }
0x2c70   : > { %12011 = vmatpush3.xpose.msk.msra.mxu1 %vm1603_vm2, %v8233_v4  ;;  %v8296_v7 = vpop.trf.xlu0  ;;  %12012 = vmatprep.mubr.msk.f32.mxu1 %vm13476_vm0, %v13477_v1 }
0x2c71   : > { %12008 = vmatmul.mubr.msk.f32.vlgmr.msra.gmra.mrb[60].mxu0 %vm1603_vm2, %v8296_v7  ;;  %12259 = vmatprep.subr.bf16.mxu1 %v13475_v0 }
0x2c72   : > { %12016 = vmatpush3.xpose.msk.msra.mxu0 %vm1603_vm2, %v8235_v6  ;;  %v8360_v9 = vpop.trf.xlu1  ;;  %12017 = vmatprep.mubr.msk.f32.mxu0 %vm13476_vm0, %v13477_v1 }
0x2c73   : > { %12265 = vmatprep.subr.bf16.mxu0 %v13475_v0 }
0x2c74   : > { %v8328_v10 = vpop.trf.xlu0 }
0x2c75   : > { %12013 = vmatmul.mubr.msk.f32.vlgmr.msra.gmra.mrb[46].mxu1 %vm1603_vm2, %v8328_v10  ;;  %12018 = vmatmul.mubr.msk.f32.vlgmr.msra.gmra.mrb[62].mxu0 %vm1603_vm2, %v8360_v9  ;;  %v9164_v9 = vld [vmem:[#allocation22 + $0x20] sm:$0xff]  ;;  %v9165_v10 = vld [vmem:[#allocation22 + $0x28] sm:$0xff] }
0x2c76   : > { %12028 = vmatprep.mubr.msk.f32.mxu1 %vm13476_vm0, %v13477_v1  ;;  %12039 = vmatprep.mubr.msk.f32.mxu0 %vm13476_vm0, %v13477_v1 }
0x2c77   : > { %12261 = vmatpush3.bf16.msra.mxu1 %v12260_v21 }
0x2c78   : > { %12262 = vmatprep.subr.bf16.mxu1 %v13475_v0 }
0x2c7b   : > { %12264 = vmatpush3.bf16.msra.mxu1 %v12263_v44 }
0x2c7c   : > { %12271 = vmatprep.subr.bf16.mxu1 %v13475_v0 }
0x2d42   : > { %v8448_v11 = vpop.f32.mrb[44].mxu1 }
0x2d43   : > { %v12004_v12 = vpop.f32.mrb[45].mxu1  ;;  %8680 = vxpose.xlu0.b32.start.end [1/1] (short) (narrow) %v8448_v11, 8 }
0x2d44   : > { %v8524_v13 = vpop.f32.mrb[60].mxu0  ;;  %v12272_v12 = vpack.c.bf16 %v9165_v10, %v9164_v9 }
0x2d45   : > { %8712 = vxpose.xlu1.b32.start.end [1/1] (short) (narrow) %v8524_v13, 8  ;;  %v12009_v14 = vpop.f32.mrb[61].mxu0 }
0x2d48   : > { %v8600_v15 = vpop.f32.mrb[46].mxu1  ;;  %v8676_v16 = vpop.f32.mrb[62].mxu0 }
0x2d49   : > { %8744 = vxpose.xlu0.b32.start.end [1/1] (short) (narrow) %v8600_v15, 8  ;;  %v12014_v17 = vpop.f32.mrb[47].mxu1  ;;  %8776 = vxpose.xlu1.b32.start.end [1/1] (short) (narrow) %v8676_v16, 8  ;;  %v12019_v18 = vpop.f32.mrb[63].mxu0  ;;  %v9166_v15 = vld [vmem:[#allocation22 + $0x30] sm:$0xff]  ;;  %v9167_v16 = vld [vmem:[#allocation22 + $0x38] sm:$0xff] }
0x2d4a   : > { %v12275_v18 = vpack.c.bf16 %v9167_v16, %v9166_v15 }
0x2dc3   : > { %v8696_v22 = vpop.trf.xlu0 }
0x2dc5   : > { %v8728_v23 = vpop.trf.xlu1 }
0x2dc9   : > { %v8760_v25 = vpop.trf.xlu0  ;;  %v8792_v27 = vpop.trf.xlu1 }
0x2dca   : > { %v8808_v28 = vcombine.low %v8696_v22, %v8760_v25  ;;  %v8809_v29 = vcombine.high %v8696_v22, %v8760_v25  ;;  %v8824_v31 = vcombine.low %v8728_v23, %v8792_v27  ;;  %v8825_v32 = vcombine.high %v8728_v23, %v8792_v27 }
0x2dcc   : > { %v8816_v33 = vrot.slane %v8808_v28, %v14215_v41  ;;  %v8823_v34 = vrot.slane %v8809_v29, %v14215_v41  ;;  %v8832_v35 = vrot.slane %v8824_v31, %v14215_v41  ;;  %v8839_v37 = vrot.slane %v8825_v32, %v14215_v41  ;;  %v11353_v28 = vld [vmem:[#allocation23 + $0x1] ss:$0 sm:$0xff] }
0x2dce   : > { %v8840_v38 = vcombine.low %v8816_v33, %v8832_v35  ;;  %v8841_v39 = vcombine.high %v8816_v33, %v8832_v35  ;;  %v8856_v40 = vcombine.low %v8823_v34, %v8839_v37  ;;  %v8857_v42 = vcombine.high %v8823_v34, %v8839_v37  ;;  %v11347_v35 = vld [vmem:[%s15096_s23 + $0x20] sm:$0xff]  ;;  %v11348_v37 = vld [vmem:[%s15096_s23 + $0x28] sm:$0xff] }
0x2dd0   : > { %v8848_v45 = vrot.slane %v8840_v38, %v14217_v47  ;;  %v8855_v46 = vrot.slane %v8841_v39, %v14217_v47  ;;  %v8864_v48 = vrot.slane %v8856_v40, %v14217_v47  ;;  %v8871_v50 = vrot.slane %v8857_v42, %v14217_v47  ;;  %v11349_v39 = vld [vmem:[%s15096_s23 + $0x30] sm:$0xff]  ;;  %v11350_v40 = vld [vmem:[%s15096_s23 + $0x38] sm:$0xff] }
0x2dd1   : > { %v12266_v38 = vpack.c.bf16 %v11348_v37, %v11347_v35  ;;  %v12269_v42 = vpack.c.bf16 %v11350_v40, %v11349_v39 }
0x2dd2   : > { %v8876_v54 = vcombine.low %v8848_v45, %v8855_v46  ;;  %v11337_v51 = vcombine.high %v8848_v45, %v8855_v46  ;;  %v8892_v52 = vcombine.low %v8864_v48, %v8871_v50  ;;  %v11338_v53 = vcombine.high %v8864_v48, %v8871_v50  ;;  %v11345_v50 = vld [vmem:[#allocation28 + $0x1] ss:$0 sm:$0xff] }
0x2dd3   : > { %12267 = vmatpush3.bf16.msra.mxu0 %v12266_v38 }
0x2dd4   : > { %v8883_v55 = vrot.slane %v8876_v54, %v14215_v41  ;;  %v8891_v56 = vrot.slane %v11337_v51, %v14215_v41  ;;  %v8899_v57 = vrot.slane %v8892_v52, %v14215_v41  ;;  %v8907_v58 = vrot.slane %v11338_v53, %v14215_v41  ;;  %12268 = vmatprep.subr.bf16.mxu0 %v13475_v0  ;;  %v11346_v51 = vld [vmem:[#allocation29 + $0x1] ss:$0 sm:$0xff] }
0x2dd6   : > { %v8909_v59 = vcombine.high %v8883_v55, %v8891_v56  ;;  %v8925_v60 = vcombine.high %v8899_v57, %v8907_v58  ;;  %v8908_v61 = vcombine.low %v8883_v55, %v8891_v56  ;;  %v8924_v62 = vcombine.low %v8899_v57, %v8907_v58  ;;  %v11351_v58 = vld [vmem:[#allocation20 + $0x1] ss:$0 sm:$0xff] }
0x2dd7   : > { %12270 = vmatpush3.bf16.msra.mxu0 %v12269_v42 }
0x2dd8   : > { %v8923_v63 = vrot.slane %v8909_v59, %v14217_v47  ;;  %v8939_v49 = vrot.slane %v8925_v60, %v14217_v47  ;;  %v8916_v2 = vrot.slane %v8908_v61, %v14217_v47  ;;  %v8932_v26 = vrot.slane %v8924_v62, %v14217_v47  ;;  %12053 = vmatprep.subr.mxu0 %v13477_v1 }
0x2dda   : > { %v8942_v36 = vcombine.low %v8923_v63, %v8939_v49  ;;  %v8941_v3 = vcombine.high %v8916_v2, %v8932_v26  ;;  %v8940_v4 = vcombine.low %v8916_v2, %v8932_v26  ;;  %v8943_v5 = vcombine.high %v8923_v63, %v8939_v49 }
0x2ddc   : > { %8949 = vrot.lane.b32.xlu1 %v8942_v36, %s15094_s8  ;;  %8945 = vrot.lane.b32.xlu0 %v8941_v3, %s15095_s14 }
0x2de0   : > { %8953 = vrot.lane.b32.xlu1 %v8943_v5, %s15089_s9 }
0x2e4e   : > { %v8950_v6 = vpop.permute.xlu1 %8949  ;;  %v8946_v7 = vpop.permute.xlu0 %8945 }
0x2e4f   : > { %v8956_v11 = vsel %vm1603_vm2, %v8940_v4, %v8946_v7 }
0x2e50   : > { %v8957_v14 = vsel %vm2661_vm3, %v8956_v11, %v8950_v6 }
0x2e52   : > { %v8954_v13 = vpop.permute.xlu1 %8953 }
0x2e53   : > { %v8958_v17 = vsel %vm2663_vm4, %v8957_v14, %v8954_v13 }
0x2e54   : > { %12029 = vmatmul.mubr.msk.f32.vlgmr.msra.gmra.mrb[48].mxu1 %vm1382_vm1, %v8958_v17 }
0x2e55   : > { %12273 = vmatpush3.bf16.msra.mxu1 %v12272_v12  ;;  %12050 = vmatprep.mubr.msk.f32.mxu1 %vm13476_vm0, %v13477_v1 }
0x2e56   : > { %12274 = vmatprep.subr.bf16.mxu1 %v13475_v0 }
0x2e59   : > { %12276 = vmatpush3.bf16.msra.mxu1 %v12275_v18 }
0x2e5a   : > { %12063 = vmatprep.subr.mxu1 %v13477_v1 }
0x2e5c   : > { %12051 = vmatmul.mubr.msk.f32.vlgmr.msra.gmra.mrb[50].mxu1 %vm1382_vm1, %v14514_v24 }
0x2e5d   : > { %12065 = vmatprep.mubr.msk.f32.mxu1 %vm13476_vm0, %v13477_v1 }
0x2f27   : > { %v9041_v20 = vpop.f32.mrb[48].mxu1 }
0x2f28   : > { %v9042_v21 = vadd.f32 %v11343_v19, %v9041_v20  ;;  %v12030_v22 = vpop.f32.mrb[49].mxu1 }
0x2f2a   : > { %v9049_v23 = vsel %vm1382_vm1, %v9042_v21, 0.0 }
0x2f2b   : > { %9050 = vadd.xlane.f32.xlu1 %v9049_v23 }
0x2f2f   : > { %v9242_v25 = vpop.f32.mrb[50].mxu1 }
0x2f30   : > { %v12052_v27 = vpop.f32.mrb[51].mxu1  ;;  %v14752_v29 = vadd.f32 %v11353_v28, %v9242_v25 }
0x2f3c   : > { %9257 = vrot.lane.b32.xlu1 %v14752_v29, %s15097_s2 }
0x2f40   : > { %9260 = vrot.lane.b32.xlu1 %v14752_v29, %s15099_s4 }
0x2fb8   : > { %v9051_v24 = vpop.xlane.xlu1 %9050 }
0x2fb9   : > { %v9052_v31 = vmul.f32 0.03125, %v9051_v24 }
0x2fbb   : > { %v9053_v32 = vsub.f32 %v9042_v21, %v9052_v31 }
0x2fbc   : > { %v14770_v46 = vpop.permute.xlu1 %9257 }
0x2fbd   : > { %v9054_v33 = vmul.f32 %v9053_v32, %v9053_v32 }
0x2fbf   : > { %v9055_v34 = vsel %vm1382_vm1, %v9054_v33, 0.0 }
0x2fc0   : > { %9056 = vadd.xlane.f32.xlu0 %v9055_v34 }
0x2fd6   : > { %9254 = vrot.lane.b32.xlu0 %v14752_v29, %s15098_s3 }
0x304d   : > { %v9057_v8 = vpop.xlane.xlu0 %9056 }
0x304e   : > { %v9058_v43 = vmul.f32 0.03125, %v9057_v8 }
0x3050   : > { %v9059_v44 = vadd.f32 1e-05, %v9058_v43 }
0x3051   : > { %v14767_v45 = vpop.permute.xlu0 %9254 }
0x3052   : > { %12692 = vrsqrt.f32 %v9059_v44  ;;  %9295 = vxpose.xlu0.b32.start.end [1/1] (short) (narrow) %v14767_v45, 8 }
0x3056   : > { %9327 = vxpose.xlu0.b32.start.end [1/1] (short) (narrow) %v14770_v46, 8 }
0x305c   : > { %v12693_v48 = vpop.eup %12692 }
0x305d   : > { %v9061_v54 = vmul.f32 %v12693_v48, %v9053_v32 }
0x305f   : > { %v9068_v52 = vmul.f32 %v11345_v50, %v9061_v54 }
0x3061   : > { %v9075_v53 = vadd.f32 %v11346_v51, %v9068_v52 }
0x3063   : > { %v14774_v55 = vadd.f32 %v9075_v53, %v14653_v30  ;;  %v9261_v30 = vpop.permute.xlu1 %9260 }
0x3065   : > { %12040 = vmatmul.mubr.msk.f32.vlgmr.msra.gmra.mrb[64].mxu0 %vm1382_vm1, %v14774_v55 }
0x3066   : > { %12055 = vmatprep.mubr.msk.f32.mxu0 %vm13476_vm0, %v13477_v1 }
0x30d2   : > { %v9311_v56 = vpop.trf.xlu0 }
0x30d6   : > { %v9343_v57 = vpop.trf.xlu0 }
0x30d7   : > { %12064 = vmatpush3.msra.mxu1 %v9343_v57 }
0x30d8   : > { %12073 = vmatprep.subr.mxu1 %v13477_v1 }
0x3138   : > { %v9159_v59 = vpop.f32.mrb[64].mxu0 }
0x3139   : > { %v9160_v60 = vadd.f32 %v11351_v58, %v9159_v59  ;;  %v12041_v61 = vpop.f32.mrb[65].mxu0 }
0x313b   : > { %9247 = vrot.lane.b32.xlu0 %v9160_v60, %s15098_s3  ;;  %9249 = vrot.lane.b32.xlu1 %v9160_v60, %s15097_s2  ;;  %s15104_s2 = sld [smem:[#allocation79_spill]]  ;;  %s10831_s3 = scalar_lea.sflag [#allocation4], %s14071_s19 }
0x313f   : > { %9251 = vrot.lane.b32.xlu0 %v9160_v60, %s15099_s4  ;;  %s11390_s4 = sshll.u32 %s13690_s26, 7  ;;  %s13488_s26 = smov [#allocation35]  }
0x315d   : > { %9359 = vxpose.xlu0.b32.start.end [1/1] (short) (narrow) %v9261_v30, 8 }
0x3164   : > { %9263 = vxpose.xlu1.b32.start.end [1/1] (short) (narrow) %v14752_v29, 8 }
0x31ad   : > { %v9250_v62 = vpop.permute.xlu1 %9249  ;;  %v9248_v63 = vpop.permute.xlu0 %9247 }
0x31ae   : > { %12066 = vmatmul.mubr.msk.f32.vlgmr.msra.gmra.mrb[52].mxu1 %vm1603_vm2, %v9250_v62 }
0x31af   : > { %12075 = vmatprep.mubr.msk.f32.mxu1 %vm13476_vm0, %v13477_v1 }
0x31b1   : > { %v9252_v49 = vpop.permute.xlu0 %9251 }
0x31dd   : > { %v9375_v26 = vpop.trf.xlu0 }
0x31e4   : > { %v9279_v2 = vpop.trf.xlu1 }
0x31e5   : > { %12054 = vmatpush3.msra.mxu0 %v9279_v2 }
0x31e6   : > { %12056 = vmatmul.mubr.msk.f32.vlgmr.msra.gmra.mrb[66].mxu0 %vm1603_vm2, %v9160_v60  ;;  %12058 = vmatprep.subr.mxu0 %v13477_v1 }
0x31e7   : > { %12059 = vmatpush3.msra.mxu0 %v9311_v56  ;;  %12060 = vmatprep.mubr.msk.f32.mxu0 %vm13476_vm0, %v13477_v1 }
0x31e8   : > { %12068 = vmatprep.subr.mxu0 %v13477_v1 }
0x31ea   : > { %12061 = vmatmul.mubr.msk.f32.vlgmr.msra.gmra.mrb[68].mxu0 %vm1603_vm2, %v9248_v63 }
0x31eb   : > { %12069 = vmatpush3.msra.mxu0 %v9375_v26  ;;  %12070 = vmatprep.mubr.msk.f32.mxu0 %vm13476_vm0, %v13477_v1 }
0x31ec   : > { %12078 = vmatprep.subr.mxu0 %v13477_v1 }
0x31ee   : > { %12071 = vmatmul.mubr.msk.f32.vlgmr.msra.gmra.mrb[70].mxu0 %vm1603_vm2, %v9252_v49 }
0x31ef   : > { %12080 = vmatprep.mubr.msk.f32.mxu0 %vm13476_vm0, %v13477_v1 }
0x3281   : > { %v9603_v36 = vpop.f32.mrb[52].mxu1 }
0x3282   : > { %v12067_v3 = vpop.f32.mrb[53].mxu1  ;;  %v9681_v7 = vmul.f32 0.35355338, %v9603_v36 }
0x3284   : > { %v9689_v13 = vsel %vm1603_vm2, %v9681_v7, -inf }
0x32b9   : > { %v9459_v4 = vpop.f32.mrb[66].mxu0 }
0x32ba   : > { %v9679_v5 = vmul.f32 0.35355338, %v9459_v4  ;;  %v12057_v6 = vpop.f32.mrb[67].mxu0 }
0x32bc   : > { %v9683_v9 = vsel %vm1603_vm2, %v9679_v5, -inf }
0x32bd   : > { %9684 = vmax.xlane.f32.xlu1 %v9683_v9  ;;  %v9531_v10 = vpop.f32.mrb[68].mxu0  ;;  %v10452_v9 = vld [vmem:[#allocation25 + $0x28] sm:$0xff] }
0x32be   : > { %v9680_v11 = vmul.f32 0.35355338, %v9531_v10  ;;  %v12062_v12 = vpop.f32.mrb[69].mxu0 }
0x32c0   : > { %v9686_v14 = vsel %vm1603_vm2, %v9680_v11, -inf }
0x32c1   : > { %9690 = vmax.xlane.f32.xlu1 %v9689_v13  ;;  %9687 = vmax.xlane.f32.xlu0 %v9686_v14  ;;  %v9675_v15 = vpop.f32.mrb[70].mxu0 }
0x32c2   : > { %v9682_v16 = vmul.f32 0.35355338, %v9675_v15  ;;  %v12072_v17 = vpop.f32.mrb[71].mxu0 }
0x32c4   : > { %v9692_v18 = vsel %vm1603_vm2, %v9682_v16, -inf }
0x32c5   : > { %9693 = vmax.xlane.f32.xlu1 %v9692_v18 }
0x32d6   : > { %9729 = vrot.lane.b32.xlu1 %v14767_v45, %s15100_s11 }
0x32d7   : > { %9727 = vrot.lane.b32.xlu0 %v14752_v29, %s15100_s11 }
0x32da   : > { %9731 = vrot.lane.b32.xlu1 %v14770_v46, %s15100_s11 }
0x32db   : > { %9733 = vrot.lane.b32.xlu0 %v9261_v30, %s15100_s11  ;;  %s15103_s11 = sld [smem:[#allocation78_spill]] }
0x334a   : > { %v9685_v19 = vpop.xlane.xlu1 %9684 }
0x334b   : > { %v9695_v20 = vsub.f32 %v9679_v5, %v9685_v19 }
0x334d   : > { %v9699_v21 = vmul.f32 1.442695, %v9695_v20 }
0x334e   : > { %v9691_v22 = vpop.xlane.xlu1 %9690  ;;  %v9688_v23 = vpop.xlane.xlu0 %9687 }
0x334f   : > { %12694 = vpow2.f32 %v9699_v21  ;;  %v9697_v25 = vsub.f32 %v9681_v7, %v9691_v22  ;;  %v9696_v27 = vsub.f32 %v9680_v11, %v9688_v23  ;;  %v10451_v7 = vld [vmem:[#allocation25 + $0x20] sm:$0xff] }
0x3350   : > { %v12278_v10 = vpack.c.bf16 %v10452_v9, %v10451_v7  ;;  %v10569_v9 = vld [vmem:[#allocation34 + $0x20] sm:$0xff] }
0x3351   : > { %v9701_v28 = vmul.f32 1.442695, %v9696_v27  ;;  %v9703_v24 = vmul.f32 1.442695, %v9697_v25 }
0x3352   : > { %v9694_v31 = vpop.xlane.xlu1 %9693  ;;  %v9728_v43 = vpop.permute.xlu0 %9727 }
0x3353   : > { %v9698_v32 = vsub.f32 %v9682_v16, %v9694_v31  ;;  %12696 = vpow2.f32 %v9701_v28  ;;  %v10454_v31 = vld [vmem:[#allocation25 + $0x38] sm:$0xff] }
0x3354   : > { %12698 = vpow2.f32 %v9703_v24  ;;  %v10453_v24 = vld [vmem:[#allocation25 + $0x30] sm:$0xff] }
0x3355   : > { %v9705_v33 = vmul.f32 1.442695, %v9698_v32 }
0x3356   : > { %v9730_v8 = vpop.permute.xlu1 %9729  ;;  %v9734_v45 = vpop.permute.xlu0 %9733 }
0x3357   : > { %12700 = vpow2.f32 %v9705_v33 }
0x3359   : > { %v12695_v29 = vpop.eup %12694 }
0x335a   : > { %v9707_v34 = vsel %vm1603_vm2, %v12695_v29, 0.0  ;;  %v9732_v44 = vpop.permute.xlu1 %9731 }
0x335b   : > { %9708 = vadd.xlane.f32.xlu1 %v9707_v34 }
0x335d   : > { %v12697_v35 = vpop.eup %12696 }
0x335e   : > { %v9710_v37 = vsel %vm1603_vm2, %v12697_v35, 0.0  ;;  %v12699_v38 = vpop.eup %12698 }
0x335f   : > { %9711 = vadd.xlane.f32.xlu0 %v9710_v37  ;;  %v9713_v42 = vsel %vm1603_vm2, %v12699_v38, 0.0 }
0x3361   : > { %v12701_v39 = vpop.eup %12700 }
0x3362   : > { %v9716_v40 = vsel %vm1603_vm2, %v12701_v39, 0.0 }
0x3363   : > { %9717 = vadd.xlane.f32.xlu1 %v9716_v40  ;;  %9714 = vadd.xlane.f32.xlu0 %v9713_v42 }
0x3390   : > { %9739 = vxpose.xlu0.b32.start.end [1/1] (short) (narrow) %v9728_v43, 8 }
0x3394   : > { %9803 = vxpose.xlu0.b32.start.end [1/1] (short) (narrow) %v9732_v44, 8 }
0x3396   : > { %9771 = vxpose.xlu1.b32.start.end [1/1] (short) (narrow) %v9730_v8, 8 }
0x3398   : > { %9835 = vxpose.xlu0.b32.start.end [1/1] (short) (narrow) %v9734_v45, 8 }
0x33e8   : > { %v9709_v46 = vpop.xlane.xlu1 %9708 }
0x33e9   : > { %12702 = vrcp.f32 %v9709_v46 }
0x33ec   : > { %v9712_v48 = vpop.xlane.xlu0 %9711 }
0x33ed   : > { %12704 = vrcp.f32 %v9712_v48 }
0x33f0   : > { %v9715_v53 = vpop.xlane.xlu0 %9714  ;;  %v9718_v56 = vpop.xlane.xlu1 %9717 }
0x33f1   : > { %12706 = vrcp.f32 %v9715_v53 }
0x33f2   : > { %12708 = vrcp.f32 %v9718_v56 }
0x33f3   : > { %v12703_v50 = vpop.eup %12702 }
0x33f4   : > { %v9720_v54 = vmul.f32 %v12703_v50, %v12695_v29 }
0x33f6   : > { %12074 = vmatpush3.xpose.msk.msra.mxu1 %vm1603_vm2, %v9720_v54 }
0x33f7   : > { %12083 = vmatprep.subr.mxu1 %v13477_v1  ;;  %v12705_v51 = vpop.eup %12704 }
0x33f8   : > { %v9722_v52 = vmul.f32 %v12705_v51, %v12697_v35  ;;  %v12281_v35 = vpack.c.bf16 %v10454_v31, %v10453_v24  ;;  %v11371_v31 = vld [vmem:[#allocation31 + $0x1] ss:$0 sm:$0xff] }
0x33fa   : > { %12079 = vmatpush3.xpose.msk.msra.mxu0 %vm1603_vm2, %v9722_v52 }
0x33fb   : > { %12088 = vmatprep.subr.mxu0 %v13477_v1  ;;  %v12707_v57 = vpop.eup %12706 }
0x33fc   : > { %v9724_v58 = vmul.f32 %v12707_v57, %v12699_v38  ;;  %v12709_v60 = vpop.eup %12708 }
0x33fd   : > { %v9726_v30 = vmul.f32 %v12709_v60, %v12701_v39 }
0x3410   : > { %v9755_v59 = vpop.trf.xlu0 }
0x3411   : > { %12076 = vmatmul.mubr.msk.f32.vlgmr.msra.gmra.mrb[54].mxu1 %vm1603_vm2, %v9755_v59 }
0x3412   : > { %12084 = vmatpush3.xpose.msk.msra.mxu1 %vm1603_vm2, %v9724_v58  ;;  %12085 = vmatprep.mubr.msk.f32.mxu1 %vm13476_vm0, %v13477_v1 }
0x3413   : > { %12277 = vmatprep.subr.bf16.mxu1 %v13475_v0 }
0x3414   : > { %v9819_v61 = vpop.trf.xlu0 }
0x3415   : > { %12086 = vmatmul.mubr.msk.f32.vlgmr.msra.gmra.mrb[56].mxu1 %vm1603_vm2, %v9819_v61 }
0x3416   : > { %v9787_v62 = vpop.trf.xlu1  ;;  %12101 = vmatprep.mubr.msk.f32.mxu1 %vm13476_vm0, %v13477_v1  ;;  %12279 = vmatpush3.bf16.msra.mxu1 %v12278_v10  ;;  %v10570_v10 = vld [vmem:[#allocation34 + $0x28] sm:$0xff] }
0x3417   : > { %12081 = vmatmul.mubr.msk.f32.vlgmr.msra.gmra.mrb[72].mxu0 %vm1603_vm2, %v9787_v62  ;;  %12280 = vmatprep.subr.bf16.mxu1 %v13475_v0 }
0x3418   : > { %12089 = vmatpush3.xpose.msk.msra.mxu0 %vm1603_vm2, %v9726_v30  ;;  %12090 = vmatprep.mubr.msk.f32.mxu0 %vm13476_vm0, %v13477_v1  ;;  %v9851_v63 = vpop.trf.xlu0 }
0x3419   : > { %12283 = vmatprep.subr.bf16.mxu0 %v13475_v0 }
0x341a   : > { %12282 = vmatpush3.bf16.msra.mxu1 %v12281_v35 }
0x341b   : > { %12091 = vmatmul.mubr.msk.f32.vlgmr.msra.gmra.mrb[74].mxu0 %vm1603_vm2, %v9851_v63  ;;  %12289 = vmatprep.subr.bf16.mxu1 %v13475_v0 }
0x341c   : > { %12112 = vmatprep.mubr.msk.f32.mxu0 %vm13476_vm0, %v13477_v1 }
0x34e4   : > { %v9939_v49 = vpop.f32.mrb[54].mxu1 }
0x34e5   : > { %v12077_v2 = vpop.f32.mrb[55].mxu1  ;;  %10171 = vxpose.xlu1.b32.start.end [1/1] (short) (narrow) %v9939_v49, 8 }
0x34e8   : > { %v10091_v26 = vpop.f32.mrb[56].mxu1 }
0x34e9   : > { %v12087_v3 = vpop.f32.mrb[57].mxu1  ;;  %10235 = vxpose.xlu1.b32.start.end [1/1] (short) (narrow) %v10091_v26, 8 }
0x34ea   : > { %v10015_v36 = vpop.f32.mrb[72].mxu0 }
0x34eb   : > { %10203 = vxpose.xlu0.b32.start.end [1/1] (short) (narrow) %v10015_v36, 8  ;;  %v12082_v4 = vpop.f32.mrb[73].mxu0 }
0x34ee   : > { %v10167_v5 = vpop.f32.mrb[74].mxu0 }
0x34ef   : > { %10267 = vxpose.xlu0.b32.start.end [1/1] (short) (narrow) %v10167_v5, 8  ;;  %v12092_v6 = vpop.f32.mrb[75].mxu0 }
0x3565   : > { %v10187_v11 = vpop.trf.xlu1 }
0x3569   : > { %v10251_v13 = vpop.trf.xlu1 }
0x356a   : > { %v10299_v14 = vcombine.low %v10187_v11, %v10251_v13  ;;  %v10300_v15 = vcombine.high %v10187_v11, %v10251_v13  ;;  %v12284_v11 = vpack.c.bf16 %v10570_v10, %v10569_v9  ;;  %v10572_v13 = vld [vmem:[#allocation34 + $0x38] sm:$0xff] }
0x356b   : > { %v10219_v12 = vpop.trf.xlu0 }
0x356c   : > { %v10307_v19 = vrot.slane %v10299_v14, %v14215_v41  ;;  %v10314_v20 = vrot.slane %v10300_v15, %v14215_v41  ;;  %12285 = vmatpush3.bf16.msra.mxu0 %v12284_v11  ;;  %v11376_v15 = vld [vmem:[%s15101_s21 + $0x40] sm:$0xff] }
0x356d   : > { %12286 = vmatprep.subr.bf16.mxu0 %v13475_v0 }
0x356f   : > { %v10283_v16 = vpop.trf.xlu0 }
0x3570   : > { %v10315_v17 = vcombine.low %v10219_v12, %v10283_v16  ;;  %v10316_v18 = vcombine.high %v10219_v12, %v10283_v16  ;;  %v10571_v12 = vld [vmem:[#allocation34 + $0x30] sm:$0xff]  ;;  %v11377_v16 = vld [vmem:[%s15101_s21 + $0x48] sm:$0xff] }
0x3571   : > { %v12287_v14 = vpack.c.bf16 %v10572_v13, %v10571_v12 }
0x3572   : > { %v10323_v21 = vrot.slane %v10315_v17, %v14215_v41  ;;  %v10330_v22 = vrot.slane %v10316_v18, %v14215_v41  ;;  %v11378_v17 = vld [vmem:[%s15101_s21 + $0x50] sm:$0xff]  ;;  %v12290_v18 = vpack.c.bf16 %v11377_v16, %v11376_v15 }
0x3573   : > { %12288 = vmatpush3.bf16.msra.mxu0 %v12287_v14 }
0x3574   : > { %v10331_v23 = vcombine.low %v10307_v19, %v10323_v21  ;;  %v10332_v25 = vcombine.high %v10307_v19, %v10323_v21  ;;  %v10347_v27 = vcombine.low %v10314_v20, %v10330_v22  ;;  %v10348_v28 = vcombine.high %v10314_v20, %v10330_v22  ;;  %12301 = vmatprep.subr.bf16.mxu0 %v13475_v0  ;;  %v11379_v19 = vld [vmem:[%s15101_s21 + $0x58] sm:$0xff]  ;;  %v11380_v21 = vld [vmem:[%s15101_s21 + $0x60] sm:$0xff]  ;;  %v11381_v22 = vld [vmem:[%s15101_s21 + $0x68] sm:$0xff] }
0x3575   : > { %v12293_v20 = vpack.c.bf16 %v11379_v19, %v11378_v17 }
0x3576   : > { %v10339_v32 = vrot.slane %v10331_v23, %v14217_v47  ;;  %v10346_v33 = vrot.slane %v10332_v25, %v14217_v47  ;;  %v10355_v29 = vrot.slane %v10347_v27, %v14217_v47  ;;  %v10362_v34 = vrot.slane %v10348_v28, %v14217_v47 }
0x3577   : > { %v12296_v23 = vpack.c.bf16 %v11381_v22, %v11380_v21 }
0x3578   : > { %v10367_v37 = vcombine.low %v10339_v32, %v10346_v33  ;;  %v11367_v38 = vcombine.high %v10339_v32, %v10346_v33  ;;  %v10383_v39 = vcombine.low %v10355_v29, %v10362_v34  ;;  %v11368_v40 = vcombine.high %v10355_v29, %v10362_v34  ;;  %v11372_v33 = vld [vmem:[#allocation32 + $0x1] ss:$0 sm:$0xff] }
0x357a   : > { %v10374_v42 = vrot.slane %v10367_v37, %v14215_v41  ;;  %v10382_v8 = vrot.slane %v11367_v38, %v14215_v41  ;;  %v10390_v43 = vrot.slane %v10383_v39, %v14215_v41  ;;  %v10398_v44 = vrot.slane %v11368_v40, %v14215_v41  ;;  %v11382_v37 = vld [vmem:[%s15101_s21 + $0x70] sm:$0xff]  ;;  %v11383_v38 = vld [vmem:[%s15101_s21 + $0x78] sm:$0xff]  ;;  %v10745_v40 = vld [vmem:[%s13657_s17] sm:$0xff] }
0x357b   : > { %v12299_v39 = vpack.c.bf16 %v11383_v38, %v11382_v37 }
0x357c   : > { %v10400_v45 = vcombine.high %v10374_v42, %v10382_v8  ;;  %v10416_v46 = vcombine.high %v10390_v43, %v10398_v44  ;;  %v10399_v48 = vcombine.low %v10374_v42, %v10382_v8  ;;  %v10415_v50 = vcombine.low %v10390_v43, %v10398_v44  ;;  %v10746_v42 = vld [vmem:[%s13657_s17 + $0x8] sm:$0xff] }
0x357d   : > { %v12302_v8 = vpack.c.bf16 %v10746_v42, %v10745_v40 }
0x357e   : > { %v10414_v54 = vrot.slane %v10400_v45, %v14217_v47  ;;  %v10430_v51 = vrot.slane %v10416_v46, %v14217_v47  ;;  %v10407_v52 = vrot.slane %v10399_v48, %v14217_v47  ;;  %v10423_v53 = vrot.slane %v10415_v50, %v14217_v47  ;;  %v11369_v47 = vld [vmem:[#allocation26 + $0x1] ss:$0 sm:$0xff]  ;;  %v10748_v48 = vld [vmem:[%s13657_s17 + $0x18] sm:$0xff] }
0x357f   : > { %v10747_v46 = vld [vmem:[%s13657_s17 + $0x10] sm:$0xff] }
0x3580   : > { %v10433_v56 = vcombine.low %v10414_v54, %v10430_v51  ;;  %v10432_v57 = vcombine.high %v10407_v52, %v10423_v53  ;;  %v10431_v58 = vcombine.low %v10407_v52, %v10423_v53  ;;  %v10434_v41 = vcombine.high %v10414_v54, %v10430_v51  ;;  %v11385_v54 = vld [vmem:[%s13652_s27 + $0x1] ss:$0 sm:$0xff]  ;;  %v11387_v53 = vld [vmem:[%s15103_s11] ss:$0 sm:$0xff] }
0x3581   : > { %v12305_v50 = vpack.c.bf16 %v10748_v48, %v10747_v46 }
0x3582   : > { %10440 = vrot.lane.b32.xlu0 %v10433_v56, %s15094_s8  ;;  %10436 = vrot.lane.b32.xlu1 %v10432_v57, %s15095_s14  ;;  %s1369_s8 = scalar_lea.vmem [#allocation35], %s14074_s20  ;;  %s13308_s20 = sshll.u32 %s13488_s26, 4  ;;  %s13309_s20 = int_to_ptr.vmem [resolvable:$false] %s13308_s20 }
0x3583   : > { %s10844_s14 = sshll.u32 %s1369_s8, 4  ;;  %s13310_s11 = scalar_lea.vmem %s13309_s20, 256  ;;  %s14896_s14 = int_to_ptr.vmem [resolvable:$true] %s10844_s14 }
0x3584   : > { %s13304_s10 = scalar_lea.vmem %s14896_s14, 128  ;;  %p13311_p4 = scmp.lt.s32.totalorder %s14896_s14, %s13309_s20 }
0x3585   : > { %p13305_p1 = scmp.ne.s32.totalorder %s14896_s14, %s13304_s10  ;;  %p13312_p9 = scmp.lt.s32.totalorder %s13310_s11, %s13304_s10 }
0x3586   : > { %10444 = vrot.lane.b32.xlu1 %v10434_v41, %s15089_s9  ;;  %s14894_s9 = scalar_lea.hbm %s15104_s2, %s11390_s4 }
0x3587   : > { %p13306_p6 = pnand %p13305_p1, %p15105_p3  ;;  %p13313_p0 = por %p13312_p9, %p13311_p4 }
0x3589   : > { %p13307_p11 = pneg %p13306_p6 }
0x358b   : > { %p13314_p8 = pnand %p13313_p0, %p13307_p11 }
0x35f4   : > { %v10437_v59 = vpop.permute.xlu1 %10436  ;;  %v10441_v60 = vpop.permute.xlu0 %10440 }
0x35f5   : > { %v10447_v61 = vsel %vm1603_vm2, %v10431_v58, %v10437_v59 }
0x35f6   : > { %v10448_v62 = vsel %vm2661_vm3, %v10447_v61, %v10441_v60 }
0x35f8   : > { %v10445_v30 = vpop.permute.xlu1 %10444 }
0x35f9   : > { %v10449_v63 = vsel %vm2663_vm4, %v10448_v62, %v10445_v30 }
0x35fa   : > { %12102 = vmatmul.mubr.msk.f32.vlgmr.msra.gmra.mrb[58].mxu1 %vm1382_vm1, %v10449_v63 }
0x35fb   : > { %12131 = vmatprep.mubr.msk.f32.mxu1 %vm13476_vm0, %v13477_v1  ;;  %12291 = vmatpush3.bf16.msra.mxu1 %v12290_v18 }
0x35fc   : > { %12292 = vmatprep.subr.bf16.mxu1 %v13475_v0 }
0x35ff   : > { %12294 = vmatpush3.bf16.msra.mxu1 %v12293_v20 }
0x3600   : > { %12295 = vmatprep.subr.bf16.mxu1 %v13475_v0 }
0x3603   : > { %12297 = vmatpush3.bf16.msra.mxu1 %v12296_v23 }
0x3604   : > { %12298 = vmatprep.subr.bf16.mxu1 %v13475_v0 }
0x3607   : > { %12300 = vmatpush3.bf16.msra.mxu1 %v12299_v39 }
0x36cd   : > { %v10532_v49 = vpop.f32.mrb[58].mxu1 }
0x36ce   : > { %v10533_v2 = vadd.f32 %v11369_v47, %v10532_v49  ;;  %v12103_v26 = vpop.f32.mrb[59].mxu1 }
0x36d0   : > { %v10540_v36 = vsel %vm1382_vm1, %v10533_v2, 0.0 }
0x36d1   : > { %10541 = vadd.xlane.f32.xlu1 %v10540_v36 }
0x375e   : > { %v10542_v3 = vpop.xlane.xlu1 %10541 }
0x375f   : > { %v10543_v4 = vmul.f32 0.03125, %v10542_v3 }
0x3761   : > { %v10544_v5 = vsub.f32 %v10533_v2, %v10543_v4 }
0x3763   : > { %v10545_v6 = vmul.f32 %v10544_v5, %v10544_v5 }
0x3765   : > { %v10546_v7 = vsel %vm1382_vm1, %v10545_v6, 0.0 }
0x3766   : > { %10547 = vadd.xlane.f32.xlu0 %v10546_v7 }
0x37f3   : > { %v10548_v25 = vpop.xlane.xlu0 %10547 }
0x37f4   : > { %v10549_v27 = vmul.f32 0.03125, %v10548_v25 }
0x37f6   : > { %v10550_v28 = vadd.f32 1e-05, %v10549_v27 }
0x37f8   : > { %12710 = vrsqrt.f32 %v10550_v28 }
0x3802   : > { %v12711_v24 = vpop.eup %12710 }
0x3803   : > { %v10552_v32 = vmul.f32 %v12711_v24, %v10544_v5 }
0x3805   : > { %v10559_v29 = vmul.f32 %v11371_v31, %v10552_v32 }
0x3807   : > { %v10566_v34 = vadd.f32 %v11372_v33, %v10559_v29 }
0x3809   : > { %v10567_v35 = vadd.f32 %v10566_v34, %v14774_v55  ;;  %v11374_v55 = vld [vmem:[%s15102_s22 + $0x1] ss:$0 sm:$0xff] }
0x380b   : > { %12113 = vmatmul.mubr.msk.f32.vlgmr.msra.gmra.mrb[76].mxu0 %vm1382_vm1, %v10567_v35 }
0x380c   : > { %12142 = vmatprep.mubr.msk.f32.mxu0 %vm13476_vm0, %v13477_v1  ;;  %12303 = vmatpush3.bf16.msra.mxu0 %v12302_v8 }
0x380d   : > { %12304 = vmatprep.subr.bf16.mxu0 %v13475_v0 }
0x3810   : > { %12306 = vmatpush3.bf16.msra.mxu0 %v12305_v50 }
0x38de   : > { %v10650_v43 = vpop.f32.mrb[76].mxu0 }
0x38df   : > { %v10651_v44 = vadd.f32 %v11374_v55, %v10650_v43  ;;  %v12114_v1 = vpop.f32.mrb[77].mxu0 }
0x38e1   : > { %v10654_v45 = vmax.f32 %v10651_v44, 0.0 }
0x38e3   : > { %12132 = vmatmul.mubr.msk.f32.vlgmr.msra.gmra.mrb[60].mxu1 %vm2880_vm5, %v10654_v45 }
0x39b6   : > { %v10741_v51 = vpop.f32.mrb[60].mxu1 }
0x39b7   : > { %v10742_v52 = vadd.f32 %v11385_v54, %v10741_v51  ;;  %v12133_v0 = vpop.f32.mrb[61].mxu1 }
0x39b9   : > { %12143 = vmatmul.mubr.msk.f32.vlgmr.msra.gmra.mrb[78].mxu0 %vm1382_vm1, %v10742_v52 }
0x3a8c   : > { %v10825_v56 = vpop.f32.mrb[78].mxu0 }
0x3a8d   : > { %v10826_v57 = vadd.f32 %v11387_v53, %v10825_v56  ;;  %v12144_v58 = vpop.f32.mrb[79].mxu0 }
0x3a8f   : > { %10829 = vst [vmem:[%s1369_s8] sm:$0xff] %v10826_v57 }
0x3a90   : > { %13317 = shalt.err (!%p13314_p8)
}
0x3a91   : > { %s13318_s19 = scalar_lea.hbm %s14894_s9, 128  ;;  %s13322_s4 = scalar_lea.hbm %s15104_s2, 256 }
0x3a92   : > { %p13319_p2 = scmp.ne.s32.totalorder %s14894_s9, %s13318_s19  ;;  %p13323_p13 = scmp.lt.u32.totalorder %s14894_s9, %s15104_s2 }
0x3a93   : > { %p13324_p5 = scmp.lt.u32.totalorder %s13322_s4, %s13318_s19  ;;  %p13326_p1 = scmp.lt.u32.totalorder %s13318_s19, %s14894_s9 }
0x3a94   : > { %p13320_p10 = pnand %p13319_p2, %p15105_p3 }
0x3a95   : > { %p13325_p7 = por %p13324_p5, %p13323_p13 }
0x3a96   : > { %p13321_p12 = pneg %p13320_p10 }
0x3a97   : > { %p13327_p6 = por %p13326_p1, %p13325_p7 }
0x3a99   : > { %p13328_p11 = pnand %p13327_p6, %p13321_p12 }
0x3a9b   : > { %13331 = shalt.err (!%p13328_p11)
}
0x3a9c   : > { %12387 = dma.vmem_to_hbm [thread:$0]  (%p15105_p3), %s14896_s14, 128, %s14894_s9, %s10831_s3  }
0x3a9d PF: > { %s10856_s8 = sand.u32 1, %s13402_s15   ;;  %p15106_p4 = scmp.ne.s32.totalorder %s15060_s1, 0 }
0x3a9e   : > { %p15107_p9 = scmp.ge.s32.totalorder %s13414_s18, 2  ;;  %s10857_s10 = scalar_lea.sflag [#allocation4], %s10856_s8 }
0x3aa0   : > { %p12455_p0 = pnand %p15107_p9, %p15106_p4 }
0x3aa2   : > { %13397 = dma.done.wait (!%p12455_p0), %s10857_s10, 128  }
0x3aa3   : > { %13399 = vsyncadd (!%p12455_p0), %s10857_s10, 4294967168  ;;  %p94_p8 = scmp.ge.s32.totalorder %s13984_s7, 4   ;;  %s15108_s15 = smov %s13406_s16 }
0x3aa4   : > { %s15109_s16 = smov %s13410_s0  ;;  %s15110_s0 = smov %s13996_s5 }
0x3aa5   : > { %s15111_s18 = smov %s13984_s7  ;;  %96 = sbr.rel (!%p94_p8) target bundleno = 90 (0x5a), region = 354 }
0x3aac   :  { %10862 = vsyncpa [#allocation3], 1 }
0x3aad   :  { %10864 = vsyncpa [#allocation3 + $0x1], 1 }
0x3aae   :  { %10865 = vsyncpa [#allocation6], 1 }
0x3aaf   :  { %10867 = vsyncpa [#allocation6 + $0x1], 1 }
0x3ab0   :  { %10868 = vsyncpa [#allocation9], 1 }
0x3ab1   :  { %10869 = vsyncpa [#allocation12], 1 }
0x3ab2   :  { %10870 = vsyncpa [#allocation15], 1 }
0x3ab3   :  { %10871 = vsyncpa [#allocation18], 1 }
0x3ab4   :  { %10872 = vsyncpa [#allocation21], 1 }
0x3ab5   :  { %10873 = vsyncpa [#allocation24], 1 }
0x3ab6   :  { %10874 = vsyncpa [#allocation27], 1 }
0x3ab7   :  { %10875 = vsyncpa [#allocation30], 1 }
0x3ab8   :  { %10876 = vsyncpa [#allocation33], 1 }
0x3ab9   :  { %10877 = vsyncpa [#allocation4], 1 }
0x3aba   :  { %10879 = vsyncpa [#allocation4 + $0x1], 1 }

</bundles_post_ra>
